<compile_context>
chip_gen: v6e
topology: v6e:2x2x1
jax: 0.10.0
libtpu: 0.0.40
codegen_flags: <defaults>
</compile_context>

<pallas_src>
import math
from functools import partial

import numpy as np
import jax
import jax.numpy as jnp
from jax.experimental import pallas as pl
from jax.experimental.pallas import tpu as pltpu


# -----------------------------------------------------------------------------
# wrapper-side glue (static geometry helpers)
# -----------------------------------------------------------------------------
def _round_up(x, m):
    return (x + m - 1) // m * m


def _pool_bins(in_size, out_size):
    """PyTorch AdaptiveMaxPool2d bin boundaries (static python ints)."""
    return [((i * in_size) // out_size,
             ((i + 1) * in_size + out_size - 1) // out_size)
            for i in range(out_size)]


def _build_pool_mask(ho, wo, wp, pools, l_tile):
    """(P, l_tile) float 0/1 mask over flat Wp-strided conv-output coords."""
    rows = []
    for s in pools:
        for hs, he in _pool_bins(ho, s):
            for ws, we in _pool_bins(wo, s):
                m = np.zeros((l_tile,), np.float32)
                for h in range(hs, he):
                    m[h * wp + ws:h * wp + we] = 1.0
                assert m.sum() > 0.0, "empty adaptive-pool bin"
                rows.append(m)
    return jnp.asarray(np.stack(rows, axis=0))


# -----------------------------------------------------------------------------
# fused ASSC kernel (one grid step = one batch element)
# -----------------------------------------------------------------------------
def _assc_fused_kernel(nbr_ref, tgt_ref, wq_ref, bq_ref, wk_ref, bk_ref,
                       cond_ref, mask_ref, o_ref, *,
                       qk_starts, dil_starts, l_tile, channels):
    C, L = channels, l_tile
    x = nbr_ref[0]                       # (C, Lx) padded neighbor, flat
    y = tgt_ref[0]                       # (C, Lx) padded target, flat
    wq = wq_ref[...]                     # (9, C, C) tap-major Tq weights
    wk = wk_ref[...]                     # (9, C, C) tap-major Tk weights
    cond = cond_ref[...]                 # (9, C, C) tap-major condition

    # ---- Tq / Tk: 3x3 valid conv as 9 accumulated MXU matmuls (no im2col) ----
    qf = jnp.zeros((C, L), jnp.float32)
    kf = jnp.zeros((C, L), jnp.float32)
    for t, s in enumerate(qk_starts):                     # static unroll (9)
        qf = qf + jnp.dot(wq[t], x[:, s:s + L],
                          preferred_element_type=jnp.float32)
        kf = kf + jnp.dot(wk[t], y[:, s:s + L],
                          preferred_element_type=jnp.float32)
    qf = qf + bq_ref[...]                                 # (C,1) broadcast
    kf = kf + bk_ref[...]

    # ---- pyramid adaptive max-pool via lane-dense per-bin masks ----
    m = mask_ref[...] > 0.5                               # (P, L) bool
    qp = jnp.max(jnp.where(m[None], qf[:, None, :], -jnp.inf), axis=-1)  # (C,P)
    kp = jnp.max(jnp.where(m[None], kf[:, None, :], -jnp.inf), axis=-1)  # (C,P)

    # ---- sigmoid attention ----
    att = jax.nn.sigmoid(
        jax.lax.dot_general(qp, kp, (((1,), (1,)), ((), ())),
                            preferred_element_type=jnp.float32))          # (C,C)

    # ---- dynamic grouped dilated conv: 9 accumulated matmuls over shifts ----
    acc = jnp.zeros((C, L), jnp.float32)
    for t, s in enumerate(dil_starts):                    # static unroll (9)
        agg_t = jnp.dot(att, cond[t], preferred_element_type=jnp.float32)  # (C,C)
        acc = acc + jnp.dot(agg_t, x[:, s:s + L],
                            preferred_element_type=jnp.float32)
    o_ref[0] = acc                                        # full-width stores


# -----------------------------------------------------------------------------
# forward wrapper
# -----------------------------------------------------------------------------
def assc_forward(neighbor, target, params, pools, rate):
    N, C, H, W = target.shape
    r = rate
    Hp, Wp = H + 2 * r, W + 2 * r
    Ho, Wo = H - 2, W - 2

    # constant lane shifts (row stride = Wp) for every conv tap
    qk_starts = tuple((r + kh) * Wp + (r + kw)
                      for kh in range(3) for kw in range(3))
    dil_starts = tuple(kh * r * Wp + kw * r
                       for kh in range(3) for kw in range(3))
    L = _round_up(H * Wp, 128)                         # lane-dense compute width
    Lx = _round_up(max(qk_starts + dil_starts) + L, 128)

    def flat_pad(a):
        af = jnp.pad(a.astype(jnp.float32),
                     ((0, 0), (0, 0), (r, r), (r, r))).reshape(N, C, Hp * Wp)
        return jnp.pad(af, ((0, 0), (0, 0), (0, Lx - Hp * Wp)))

    nbr_flat = flat_pad(neighbor)                      # (N, C, Lx)
    tgt_flat = flat_pad(target)                        # (N, C, Lx)

    def taps(w):                                       # (C,C,3,3) -> (9,C,C)
        return jnp.transpose(w.astype(jnp.float32), (2, 3, 0, 1)).reshape(9, C, C)

    wq_t = taps(params["Wq"])
    wk_t = taps(params["Wk"])
    cond_t = taps(params["condition"])
    bq = params["bq"].reshape(C, 1).astype(jnp.float32)
    bk = params["bk"].reshape(C, 1).astype(jnp.float32)
    mask = _build_pool_mask(Ho, Wo, Wp, pools, L)      # (P, L)
    P = mask.shape[0]

    # advisory cost estimate so XLA schedules the surrounding pads/reshapes well
    flops = N * (2 * 2 * 9 * C * C * L          # Tq + Tk convs
                 + 2 * C * C * P                # Q @ K^T
                 + 9 * 2 * C * C * C            # att @ condition taps
                 + 9 * 2 * C * C * L)           # dilated grouped conv
    bytes_accessed = 4 * (2 * N * C * Lx + N * C * L
                          + 3 * 9 * C * C + 2 * C + P * L)

    kernel = partial(_assc_fused_kernel, qk_starts=qk_starts,
                     dil_starts=dil_starts, l_tile=L, channels=C)

    out_flat = pl.pallas_call(
        kernel,
        out_shape=jax.ShapeDtypeStruct((N, C, L), jnp.float32),
        grid_spec=pltpu.PrefetchScalarGridSpec(
            num_scalar_prefetch=0,
            grid=(N,),                                  # parallel over batch
            in_specs=[
                pl.BlockSpec((1, C, Lx), lambda n: (n, 0, 0)),
                pl.BlockSpec((1, C, Lx), lambda n: (n, 0, 0)),
                pl.BlockSpec((9, C, C), lambda n: (0, 0, 0)),
                pl.BlockSpec((C, 1), lambda n: (0, 0)),
                pl.BlockSpec((9, C, C), lambda n: (0, 0, 0)),
                pl.BlockSpec((C, 1), lambda n: (0, 0)),
                pl.BlockSpec((9, C, C), lambda n: (0, 0, 0)),
                pl.BlockSpec((P, L), lambda n: (0, 0)),
            ],
            out_specs=pl.BlockSpec((1, C, L), lambda n: (n, 0, 0)),
        ),
        compiler_params=pltpu.CompilerParams(
            dimension_semantics=("parallel",),          # feeds both v7x TCs for N>=2
            vmem_limit_bytes=48 * 1024 * 1024,          # fits v7x 64 MiB physical VMEM
        ),
        cost_estimate=pl.CostEstimate(flops=flops, transcendentals=N * C * C,
                                      bytes_accessed=bytes_accessed),
    )(nbr_flat, tgt_flat, wq_t, bq, wk_t, bk, cond_t, mask)

    # valid outputs live at flat index h*Wp + w
    out = out_flat[:, :, :H * Wp].reshape(N, C, H, Wp)[:, :, :, :W]
    return out
    # TODO(synk): for production C/H*W, add an HW-tile grid axis for the final
    # matmul loop and cast the padded-input path to bf16 (kept f32 here to hold
    # the 1e-2 atol on near-zero outputs at toy sizes).


# -----------------------------------------------------------------------------
# pure-JAX reference (mirrors the PyTorch forward) for correctness check
# -----------------------------------------------------------------------------
def assc_reference(neighbor, target, params, pools, rate):
    N, C, H, W = target.shape
    hp = jax.lax.Precision.HIGHEST
    dn = ("NCHW", "OIHW", "NCHW")
    q_feat = jax.lax.conv_general_dilated(
        neighbor, params["Wq"], (1, 1), "VALID",
        dimension_numbers=dn, precision=hp) + params["bq"][None, :, None, None]
    k_feat = jax.lax.conv_general_dilated(
        target, params["Wk"], (1, 1), "VALID",
        dimension_numbers=dn, precision=hp) + params["bk"][None, :, None, None]

    def pyramid(x):
        _, _, h, w = x.shape
        cols = []
        for s in pools:
            for (hs, he) in _pool_bins(h, s):
                for (ws, we) in _pool_bins(w, s):
                    cols.append(jnp.max(x[:, :, hs:he, ws:we], axis=(2, 3)))
        return jnp.stack(cols, axis=-1)                 # (N, C, P)

    Q = pyramid(q_feat)
    Km = pyramid(k_feat)
    att = jax.nn.sigmoid(jnp.einsum("ncp,ndp->ncd", Q, Km, precision=hp))
    agg = jnp.dot(att.reshape(N * C, C), params["condition"].reshape(C, C * 9),
                  precision=hp)
    agg_w = agg.reshape(N * C, C, 3, 3)
    nbr = neighbor.reshape(1, N * C, H, W)
    out = jax.lax.conv_general_dilated(
        nbr, agg_w, (1, 1), [(rate, rate), (rate, rate)],
        rhs_dilation=(rate, rate), dimension_numbers=dn,
        feature_group_count=N, precision=hp)
    return out.reshape(N, C, H, W)


if __name__ == "__main__":
    N, C, H, W = 2, 4, 16, 16
    pools = (1, 3, 5, 7)
    rate = 2

    key = jax.random.PRNGKey(0)
    k1, k2, k3, k4, k5, k6 = jax.random.split(key, 6)
    bound = 1.0 / math.sqrt(C * 9)
    params = {
        "Wq": jax.random.uniform(k1, (C, C, 3, 3), jnp.float32, -bound, bound),
        "bq": jax.random.uniform(k2, (C,), jnp.float32, -bound, bound),
        "Wk": jax.random.uniform(k3, (C, C, 3, 3), jnp.float32, -bound, bound),
        "bk": jax.random.uniform(k4, (C,), jnp.float32, -bound, bound),
        # matches nn.Parameter(torch.ones(in_dim, in_dim, 3, 3))
        "condition": jnp.ones((C, C, 3, 3), jnp.float32),
    }
    neighbor = jax.random.normal(k5, (N, C, H, W), jnp.float32)
    target = jax.random.normal(k6, (N, C, H, W), jnp.float32)

    out = jax.block_until_ready(assc_forward(neighbor, target, params, pools, rate))
    ref = jax.block_until_ready(assc_reference(neighbor, target, params, pools, rate))

    assert out.shape == (N, C, H, W)
    max_err = float(jnp.max(jnp.abs(out - ref)))
    assert bool(jnp.allclose(out, ref, rtol=1e-2, atol=1e-2)), f"mismatch: {max_err}"
    print("KERNEL_OK")
</pallas_src>

<mosaic_0001>
module attributes {stable_mosaic.version = 11 : i64} {
  func.func @_assc_fused_kernel(%arg0: i32, %arg1: memref<1x4x512xf32, #tpu.memory_space<vmem>>, %arg2: memref<1x4x512xf32, #tpu.memory_space<vmem>>, %arg3: memref<9x4x4xf32, #tpu.memory_space<vmem>>, %arg4: memref<4x1xf32, #tpu.memory_space<vmem>>, %arg5: memref<9x4x4xf32, #tpu.memory_space<vmem>>, %arg6: memref<4x1xf32, #tpu.memory_space<vmem>>, %arg7: memref<9x4x4xf32, #tpu.memory_space<vmem>>, %arg8: memref<84x384xf32, #tpu.memory_space<vmem>>, %arg9: memref<1x4x384xf32, #tpu.memory_space<vmem>>) attributes {dimension_semantics = [#tpu.dimension_semantics<parallel>], iteration_bounds = array<i64: 2>, scalar_prefetch = 0 : i64, scratch_operands = 0 : i64, tpu.core_type = #tpu.core_type<tc>, window_params = [{transform_indices = @transform_0, window_bounds = array<i64: 1, 4, 512>}, {transform_indices = @transform_1, window_bounds = array<i64: 1, 4, 512>}, {pipeline_mode = #tpu.pipeline_mode<synchronous>, transform_indices = @transform_2, window_bounds = array<i64: 9, 4, 4>}, {pipeline_mode = #tpu.pipeline_mode<synchronous>, transform_indices = @transform_3, window_bounds = array<i64: 4, 1>}, {pipeline_mode = #tpu.pipeline_mode<synchronous>, transform_indices = @transform_4, window_bounds = array<i64: 9, 4, 4>}, {pipeline_mode = #tpu.pipeline_mode<synchronous>, transform_indices = @transform_5, window_bounds = array<i64: 4, 1>}, {pipeline_mode = #tpu.pipeline_mode<synchronous>, transform_indices = @transform_6, window_bounds = array<i64: 9, 4, 4>}, {pipeline_mode = #tpu.pipeline_mode<synchronous>, transform_indices = @transform_7, window_bounds = array<i64: 84, 384>}, {transform_indices = @transform_8, window_bounds = array<i64: 1, 4, 384>}]} {
    %c0 = arith.constant 0 : index
    %c0_0 = arith.constant 0 : index
    %c0_1 = arith.constant 0 : index
    %0 = vector.load %arg1[%c0, %c0_0, %c0_1] : memref<1x4x512xf32, #tpu.memory_space<vmem>>, vector<1x4x512xf32>
    %1 = vector.shape_cast %0 : vector<1x4x512xf32> to vector<4x512xf32>
    %c0_2 = arith.constant 0 : index
    %c0_3 = arith.constant 0 : index
    %c0_4 = arith.constant 0 : index
    %2 = vector.load %arg2[%c0_2, %c0_3, %c0_4] : memref<1x4x512xf32, #tpu.memory_space<vmem>>, vector<1x4x512xf32>
    %3 = vector.shape_cast %2 : vector<1x4x512xf32> to vector<4x512xf32>
    %c0_5 = arith.constant 0 : index
    %c0_6 = arith.constant 0 : index
    %c0_7 = arith.constant 0 : index
    %4 = vector.load %arg3[%c0_5, %c0_6, %c0_7] : memref<9x4x4xf32, #tpu.memory_space<vmem>>, vector<9x4x4xf32>
    %c0_8 = arith.constant 0 : index
    %c0_9 = arith.constant 0 : index
    %c0_10 = arith.constant 0 : index
    %5 = vector.load %arg5[%c0_8, %c0_9, %c0_10] : memref<9x4x4xf32, #tpu.memory_space<vmem>>, vector<9x4x4xf32>
    %c0_11 = arith.constant 0 : index
    %c0_12 = arith.constant 0 : index
    %c0_13 = arith.constant 0 : index
    %6 = vector.load %arg7[%c0_11, %c0_12, %c0_13] : memref<9x4x4xf32, #tpu.memory_space<vmem>>, vector<9x4x4xf32>
    %cst = arith.constant 0.000000e+00 : f32
    %7 = vector.broadcast %cst : f32 to vector<4x384xf32>
    %cst_14 = arith.constant 0.000000e+00 : f32
    %8 = vector.broadcast %cst_14 : f32 to vector<4x384xf32>
    %9 = vector.extract_strided_slice %4 {offsets = [0, 0, 0], sizes = [1, 4, 4], strides = [1, 1, 1]} : vector<9x4x4xf32> to vector<1x4x4xf32>
    %10 = vector.shape_cast %9 : vector<1x4x4xf32> to vector<4x4xf32>
    %11 = vector.extract_strided_slice %1 {offsets = [0, 42], sizes = [4, 384], strides = [1, 1]} : vector<4x512xf32> to vector<4x384xf32>
    %cst_15 = arith.constant dense<0.000000e+00> : vector<4x384xf32>
    %12 = tpu.matmul %10, %11, %cst_15 {dimension_numbers = #tpu.dot_dimension_numbers<[1], [0], [0], [1], [0, 0, 1, 1], [], []>} : vector<4x4xf32>, vector<4x384xf32>, vector<4x384xf32> -> vector<4x384xf32>
    %13 = arith.addf %7, %12 : vector<4x384xf32>
    %14 = vector.extract_strided_slice %5 {offsets = [0, 0, 0], sizes = [1, 4, 4], strides = [1, 1, 1]} : vector<9x4x4xf32> to vector<1x4x4xf32>
    %15 = vector.shape_cast %14 : vector<1x4x4xf32> to vector<4x4xf32>
    %16 = vector.extract_strided_slice %3 {offsets = [0, 42], sizes = [4, 384], strides = [1, 1]} : vector<4x512xf32> to vector<4x384xf32>
    %cst_16 = arith.constant dense<0.000000e+00> : vector<4x384xf32>
    %17 = tpu.matmul %15, %16, %cst_16 {dimension_numbers = #tpu.dot_dimension_numbers<[1], [0], [0], [1], [0, 0, 1, 1], [], []>} : vector<4x4xf32>, vector<4x384xf32>, vector<4x384xf32> -> vector<4x384xf32>
    %18 = arith.addf %8, %17 : vector<4x384xf32>
    %19 = vector.extract_strided_slice %4 {offsets = [1, 0, 0], sizes = [1, 4, 4], strides = [1, 1, 1]} : vector<9x4x4xf32> to vector<1x4x4xf32>
    %20 = vector.shape_cast %19 : vector<1x4x4xf32> to vector<4x4xf32>
    %21 = vector.extract_strided_slice %1 {offsets = [0, 43], sizes = [4, 384], strides = [1, 1]} : vector<4x512xf32> to vector<4x384xf32>
    %cst_17 = arith.constant dense<0.000000e+00> : vector<4x384xf32>
    %22 = tpu.matmul %20, %21, %cst_17 {dimension_numbers = #tpu.dot_dimension_numbers<[1], [0], [0], [1], [0, 0, 1, 1], [], []>} : vector<4x4xf32>, vector<4x384xf32>, vector<4x384xf32> -> vector<4x384xf32>
    %23 = arith.addf %13, %22 : vector<4x384xf32>
    %24 = vector.extract_strided_slice %5 {offsets = [1, 0, 0], sizes = [1, 4, 4], strides = [1, 1, 1]} : vector<9x4x4xf32> to vector<1x4x4xf32>
    %25 = vector.shape_cast %24 : vector<1x4x4xf32> to vector<4x4xf32>
    %26 = vector.extract_strided_slice %3 {offsets = [0, 43], sizes = [4, 384], strides = [1, 1]} : vector<4x512xf32> to vector<4x384xf32>
    %cst_18 = arith.constant dense<0.000000e+00> : vector<4x384xf32>
    %27 = tpu.matmul %25, %26, %cst_18 {dimension_numbers = #tpu.dot_dimension_numbers<[1], [0], [0], [1], [0, 0, 1, 1], [], []>} : vector<4x4xf32>, vector<4x384xf32>, vector<4x384xf32> -> vector<4x384xf32>
    %28 = arith.addf %18, %27 : vector<4x384xf32>
    %29 = vector.extract_strided_slice %4 {offsets = [2, 0, 0], sizes = [1, 4, 4], strides = [1, 1, 1]} : vector<9x4x4xf32> to vector<1x4x4xf32>
    %30 = vector.shape_cast %29 : vector<1x4x4xf32> to vector<4x4xf32>
    %31 = vector.extract_strided_slice %1 {offsets = [0, 44], sizes = [4, 384], strides = [1, 1]} : vector<4x512xf32> to vector<4x384xf32>
    %cst_19 = arith.constant dense<0.000000e+00> : vector<4x384xf32>
    %32 = tpu.matmul %30, %31, %cst_19 {dimension_numbers = #tpu.dot_dimension_numbers<[1], [0], [0], [1], [0, 0, 1, 1], [], []>} : vector<4x4xf32>, vector<4x384xf32>, vector<4x384xf32> -> vector<4x384xf32>
    %33 = arith.addf %23, %32 : vector<4x384xf32>
    %34 = vector.extract_strided_slice %5 {offsets = [2, 0, 0], sizes = [1, 4, 4], strides = [1, 1, 1]} : vector<9x4x4xf32> to vector<1x4x4xf32>
    %35 = vector.shape_cast %34 : vector<1x4x4xf32> to vector<4x4xf32>
    %36 = vector.extract_strided_slice %3 {offsets = [0, 44], sizes = [4, 384], strides = [1, 1]} : vector<4x512xf32> to vector<4x384xf32>
    %cst_20 = arith.constant dense<0.000000e+00> : vector<4x384xf32>
    %37 = tpu.matmul %35, %36, %cst_20 {dimension_numbers = #tpu.dot_dimension_numbers<[1], [0], [0], [1], [0, 0, 1, 1], [], []>} : vector<4x4xf32>, vector<4x384xf32>, vector<4x384xf32> -> vector<4x384xf32>
    %38 = arith.addf %28, %37 : vector<4x384xf32>
    %39 = vector.extract_strided_slice %4 {offsets = [3, 0, 0], sizes = [1, 4, 4], strides = [1, 1, 1]} : vector<9x4x4xf32> to vector<1x4x4xf32>
    %40 = vector.shape_cast %39 : vector<1x4x4xf32> to vector<4x4xf32>
    %41 = vector.extract_strided_slice %1 {offsets = [0, 62], sizes = [4, 384], strides = [1, 1]} : vector<4x512xf32> to vector<4x384xf32>
    %cst_21 = arith.constant dense<0.000000e+00> : vector<4x384xf32>
    %42 = tpu.matmul %40, %41, %cst_21 {dimension_numbers = #tpu.dot_dimension_numbers<[1], [0], [0], [1], [0, 0, 1, 1], [], []>} : vector<4x4xf32>, vector<4x384xf32>, vector<4x384xf32> -> vector<4x384xf32>
    %43 = arith.addf %33, %42 : vector<4x384xf32>
    %44 = vector.extract_strided_slice %5 {offsets = [3, 0, 0], sizes = [1, 4, 4], strides = [1, 1, 1]} : vector<9x4x4xf32> to vector<1x4x4xf32>
    %45 = vector.shape_cast %44 : vector<1x4x4xf32> to vector<4x4xf32>
    %46 = vector.extract_strided_slice %3 {offsets = [0, 62], sizes = [4, 384], strides = [1, 1]} : vector<4x512xf32> to vector<4x384xf32>
    %cst_22 = arith.constant dense<0.000000e+00> : vector<4x384xf32>
    %47 = tpu.matmul %45, %46, %cst_22 {dimension_numbers = #tpu.dot_dimension_numbers<[1], [0], [0], [1], [0, 0, 1, 1], [], []>} : vector<4x4xf32>, vector<4x384xf32>, vector<4x384xf32> -> vector<4x384xf32>
    %48 = arith.addf %38, %47 : vector<4x384xf32>
    %49 = vector.extract_strided_slice %4 {offsets = [4, 0, 0], sizes = [1, 4, 4], strides = [1, 1, 1]} : vector<9x4x4xf32> to vector<1x4x4xf32>
    %50 = vector.shape_cast %49 : vector<1x4x4xf32> to vector<4x4xf32>
    %51 = vector.extract_strided_slice %1 {offsets = [0, 63], sizes = [4, 384], strides = [1, 1]} : vector<4x512xf32> to vector<4x384xf32>
    %cst_23 = arith.constant dense<0.000000e+00> : vector<4x384xf32>
    %52 = tpu.matmul %50, %51, %cst_23 {dimension_numbers = #tpu.dot_dimension_numbers<[1], [0], [0], [1], [0, 0, 1, 1], [], []>} : vector<4x4xf32>, vector<4x384xf32>, vector<4x384xf32> -> vector<4x384xf32>
    %53 = arith.addf %43, %52 : vector<4x384xf32>
    %54 = vector.extract_strided_slice %5 {offsets = [4, 0, 0], sizes = [1, 4, 4], strides = [1, 1, 1]} : vector<9x4x4xf32> to vector<1x4x4xf32>
    %55 = vector.shape_cast %54 : vector<1x4x4xf32> to vector<4x4xf32>
    %56 = vector.extract_strided_slice %3 {offsets = [0, 63], sizes = [4, 384], strides = [1, 1]} : vector<4x512xf32> to vector<4x384xf32>
    %cst_24 = arith.constant dense<0.000000e+00> : vector<4x384xf32>
    %57 = tpu.matmul %55, %56, %cst_24 {dimension_numbers = #tpu.dot_dimension_numbers<[1], [0], [0], [1], [0, 0, 1, 1], [], []>} : vector<4x4xf32>, vector<4x384xf32>, vector<4x384xf32> -> vector<4x384xf32>
    %58 = arith.addf %48, %57 : vector<4x384xf32>
    %59 = vector.extract_strided_slice %4 {offsets = [5, 0, 0], sizes = [1, 4, 4], strides = [1, 1, 1]} : vector<9x4x4xf32> to vector<1x4x4xf32>
    %60 = vector.shape_cast %59 : vector<1x4x4xf32> to vector<4x4xf32>
    %61 = vector.extract_strided_slice %1 {offsets = [0, 64], sizes = [4, 384], strides = [1, 1]} : vector<4x512xf32> to vector<4x384xf32>
    %cst_25 = arith.constant dense<0.000000e+00> : vector<4x384xf32>
    %62 = tpu.matmul %60, %61, %cst_25 {dimension_numbers = #tpu.dot_dimension_numbers<[1], [0], [0], [1], [0, 0, 1, 1], [], []>} : vector<4x4xf32>, vector<4x384xf32>, vector<4x384xf32> -> vector<4x384xf32>
    %63 = arith.addf %53, %62 : vector<4x384xf32>
    %64 = vector.extract_strided_slice %5 {offsets = [5, 0, 0], sizes = [1, 4, 4], strides = [1, 1, 1]} : vector<9x4x4xf32> to vector<1x4x4xf32>
    %65 = vector.shape_cast %64 : vector<1x4x4xf32> to vector<4x4xf32>
    %66 = vector.extract_strided_slice %3 {offsets = [0, 64], sizes = [4, 384], strides = [1, 1]} : vector<4x512xf32> to vector<4x384xf32>
    %cst_26 = arith.constant dense<0.000000e+00> : vector<4x384xf32>
    %67 = tpu.matmul %65, %66, %cst_26 {dimension_numbers = #tpu.dot_dimension_numbers<[1], [0], [0], [1], [0, 0, 1, 1], [], []>} : vector<4x4xf32>, vector<4x384xf32>, vector<4x384xf32> -> vector<4x384xf32>
    %68 = arith.addf %58, %67 : vector<4x384xf32>
    %69 = vector.extract_strided_slice %4 {offsets = [6, 0, 0], sizes = [1, 4, 4], strides = [1, 1, 1]} : vector<9x4x4xf32> to vector<1x4x4xf32>
    %70 = vector.shape_cast %69 : vector<1x4x4xf32> to vector<4x4xf32>
    %71 = vector.extract_strided_slice %1 {offsets = [0, 82], sizes = [4, 384], strides = [1, 1]} : vector<4x512xf32> to vector<4x384xf32>
    %cst_27 = arith.constant dense<0.000000e+00> : vector<4x384xf32>
    %72 = tpu.matmul %70, %71, %cst_27 {dimension_numbers = #tpu.dot_dimension_numbers<[1], [0], [0], [1], [0, 0, 1, 1], [], []>} : vector<4x4xf32>, vector<4x384xf32>, vector<4x384xf32> -> vector<4x384xf32>
    %73 = arith.addf %63, %72 : vector<4x384xf32>
    %74 = vector.extract_strided_slice %5 {offsets = [6, 0, 0], sizes = [1, 4, 4], strides = [1, 1, 1]} : vector<9x4x4xf32> to vector<1x4x4xf32>
    %75 = vector.shape_cast %74 : vector<1x4x4xf32> to vector<4x4xf32>
    %76 = vector.extract_strided_slice %3 {offsets = [0, 82], sizes = [4, 384], strides = [1, 1]} : vector<4x512xf32> to vector<4x384xf32>
    %cst_28 = arith.constant dense<0.000000e+00> : vector<4x384xf32>
    %77 = tpu.matmul %75, %76, %cst_28 {dimension_numbers = #tpu.dot_dimension_numbers<[1], [0], [0], [1], [0, 0, 1, 1], [], []>} : vector<4x4xf32>, vector<4x384xf32>, vector<4x384xf32> -> vector<4x384xf32>
    %78 = arith.addf %68, %77 : vector<4x384xf32>
    %79 = vector.extract_strided_slice %4 {offsets = [7, 0, 0], sizes = [1, 4, 4], strides = [1, 1, 1]} : vector<9x4x4xf32> to vector<1x4x4xf32>
    %80 = vector.shape_cast %79 : vector<1x4x4xf32> to vector<4x4xf32>
    %81 = vector.extract_strided_slice %1 {offsets = [0, 83], sizes = [4, 384], strides = [1, 1]} : vector<4x512xf32> to vector<4x384xf32>
    %cst_29 = arith.constant dense<0.000000e+00> : vector<4x384xf32>
    %82 = tpu.matmul %80, %81, %cst_29 {dimension_numbers = #tpu.dot_dimension_numbers<[1], [0], [0], [1], [0, 0, 1, 1], [], []>} : vector<4x4xf32>, vector<4x384xf32>, vector<4x384xf32> -> vector<4x384xf32>
    %83 = arith.addf %73, %82 : vector<4x384xf32>
    %84 = vector.extract_strided_slice %5 {offsets = [7, 0, 0], sizes = [1, 4, 4], strides = [1, 1, 1]} : vector<9x4x4xf32> to vector<1x4x4xf32>
    %85 = vector.shape_cast %84 : vector<1x4x4xf32> to vector<4x4xf32>
    %86 = vector.extract_strided_slice %3 {offsets = [0, 83], sizes = [4, 384], strides = [1, 1]} : vector<4x512xf32> to vector<4x384xf32>
    %cst_30 = arith.constant dense<0.000000e+00> : vector<4x384xf32>
    %87 = tpu.matmul %85, %86, %cst_30 {dimension_numbers = #tpu.dot_dimension_numbers<[1], [0], [0], [1], [0, 0, 1, 1], [], []>} : vector<4x4xf32>, vector<4x384xf32>, vector<4x384xf32> -> vector<4x384xf32>
    %88 = arith.addf %78, %87 : vector<4x384xf32>
    %89 = vector.extract_strided_slice %4 {offsets = [8, 0, 0], sizes = [1, 4, 4], strides = [1, 1, 1]} : vector<9x4x4xf32> to vector<1x4x4xf32>
    %90 = vector.shape_cast %89 : vector<1x4x4xf32> to vector<4x4xf32>
    %91 = vector.extract_strided_slice %1 {offsets = [0, 84], sizes = [4, 384], strides = [1, 1]} : vector<4x512xf32> to vector<4x384xf32>
    %cst_31 = arith.constant dense<0.000000e+00> : vector<4x384xf32>
    %92 = tpu.matmul %90, %91, %cst_31 {dimension_numbers = #tpu.dot_dimension_numbers<[1], [0], [0], [1], [0, 0, 1, 1], [], []>} : vector<4x4xf32>, vector<4x384xf32>, vector<4x384xf32> -> vector<4x384xf32>
    %93 = arith.addf %83, %92 : vector<4x384xf32>
    %94 = vector.extract_strided_slice %5 {offsets = [8, 0, 0], sizes = [1, 4, 4], strides = [1, 1, 1]} : vector<9x4x4xf32> to vector<1x4x4xf32>
    %95 = vector.shape_cast %94 : vector<1x4x4xf32> to vector<4x4xf32>
    %96 = vector.extract_strided_slice %3 {offsets = [0, 84], sizes = [4, 384], strides = [1, 1]} : vector<4x512xf32> to vector<4x384xf32>
    %cst_32 = arith.constant dense<0.000000e+00> : vector<4x384xf32>
    %97 = tpu.matmul %95, %96, %cst_32 {dimension_numbers = #tpu.dot_dimension_numbers<[1], [0], [0], [1], [0, 0, 1, 1], [], []>} : vector<4x4xf32>, vector<4x384xf32>, vector<4x384xf32> -> vector<4x384xf32>
    %98 = arith.addf %88, %97 : vector<4x384xf32>
    %c0_33 = arith.constant 0 : index
    %c0_34 = arith.constant 0 : index
    %99 = vector.load %arg4[%c0_33, %c0_34] : memref<4x1xf32, #tpu.memory_space<vmem>>, vector<4x1xf32>
    %100 = vector.broadcast %99 : vector<4x1xf32> to vector<4x384xf32>
    %101 = arith.addf %93, %100 : vector<4x384xf32>
    %c0_35 = arith.constant 0 : index
    %c0_36 = arith.constant 0 : index
    %102 = vector.load %arg6[%c0_35, %c0_36] : memref<4x1xf32, #tpu.memory_space<vmem>>, vector<4x1xf32>
    %103 = vector.broadcast %102 : vector<4x1xf32> to vector<4x384xf32>
    %104 = arith.addf %98, %103 : vector<4x384xf32>
    %c0_37 = arith.constant 0 : index
    %c0_38 = arith.constant 0 : index
    %105 = vector.load %arg8[%c0_37, %c0_38] : memref<84x384xf32, #tpu.memory_space<vmem>>, vector<84x384xf32>
    %cst_39 = arith.constant 5.000000e-01 : f32
    %106 = vector.broadcast %cst_39 : f32 to vector<84x384xf32>
    %107 = arith.cmpf ogt, %105, %106 : vector<84x384xf32>
    %108 = vector.shape_cast %107 : vector<84x384xi1> to vector<1x84x384xi1>
    %109 = vector.shape_cast %101 : vector<4x384xf32> to vector<4x1x384xf32>
    %cst_40 = arith.constant 0xFF800000 : f32
    %110 = vector.shape_cast %108 : vector<1x84x384xi1> to vector<1x84x384xi1>
    %111 = vector.broadcast %110 : vector<1x84x384xi1> to vector<4x84x384xi1>
    %112 = vector.shape_cast %109 : vector<4x1x384xf32> to vector<4x1x384xf32>
    %113 = vector.broadcast %112 : vector<4x1x384xf32> to vector<4x84x384xf32>
    %114 = vector.broadcast %cst_40 : f32 to vector<4x84x384xf32>
    %115 = arith.select %111, %113, %114 : vector<4x84x384xi1>, vector<4x84x384xf32>
    %cst_41 = arith.constant dense<0xFF800000> : vector<4x84xf32>
    %116 = vector.multi_reduction <maximumf>, %115, %cst_41 [2] : vector<4x84x384xf32> to vector<4x84xf32>
    %117 = vector.shape_cast %107 : vector<84x384xi1> to vector<1x84x384xi1>
    %118 = vector.shape_cast %104 : vector<4x384xf32> to vector<4x1x384xf32>
    %cst_42 = arith.constant 0xFF800000 : f32
    %119 = vector.shape_cast %117 : vector<1x84x384xi1> to vector<1x84x384xi1>
    %120 = vector.broadcast %119 : vector<1x84x384xi1> to vector<4x84x384xi1>
    %121 = vector.shape_cast %118 : vector<4x1x384xf32> to vector<4x1x384xf32>
    %122 = vector.broadcast %121 : vector<4x1x384xf32> to vector<4x84x384xf32>
    %123 = vector.broadcast %cst_42 : f32 to vector<4x84x384xf32>
    %124 = arith.select %120, %122, %123 : vector<4x84x384xi1>, vector<4x84x384xf32>
    %cst_43 = arith.constant dense<0xFF800000> : vector<4x84xf32>
    %125 = vector.multi_reduction <maximumf>, %124, %cst_43 [2] : vector<4x84x384xf32> to vector<4x84xf32>
    %cst_44 = arith.constant dense<0.000000e+00> : vector<4x4xf32>
    %126 = tpu.matmul %116, %125, %cst_44 {dimension_numbers = #tpu.dot_dimension_numbers<[1], [1], [0], [0], [0, 0, 1, 0], [], []>} : vector<4x84xf32>, vector<4x84xf32>, vector<4x4xf32> -> vector<4x4xf32>
    %127 = arith.negf %126 : vector<4x4xf32>
    %128 = math.exp %127 : vector<4x4xf32>
    %cst_45 = arith.constant 1.000000e+00 : f32
    %129 = vector.broadcast %cst_45 : f32 to vector<4x4xf32>
    %130 = arith.addf %129, %128 : vector<4x4xf32>
    %131 = arith.divf %129, %130 : vector<4x4xf32>
    %cst_46 = arith.constant 0.000000e+00 : f32
    %132 = vector.broadcast %cst_46 : f32 to vector<4x384xf32>
    %133 = vector.extract_strided_slice %6 {offsets = [0, 0, 0], sizes = [1, 4, 4], strides = [1, 1, 1]} : vector<9x4x4xf32> to vector<1x4x4xf32>
    %134 = vector.shape_cast %133 : vector<1x4x4xf32> to vector<4x4xf32>
    %cst_47 = arith.constant dense<0.000000e+00> : vector<4x4xf32>
    %135 = tpu.matmul %131, %134, %cst_47 {dimension_numbers = #tpu.dot_dimension_numbers<[1], [0], [0], [1], [0, 0, 1, 1], [], []>} : vector<4x4xf32>, vector<4x4xf32>, vector<4x4xf32> -> vector<4x4xf32>
    %136 = vector.extract_strided_slice %1 {offsets = [0, 0], sizes = [4, 384], strides = [1, 1]} : vector<4x512xf32> to vector<4x384xf32>
    %cst_48 = arith.constant dense<0.000000e+00> : vector<4x384xf32>
    %137 = tpu.matmul %135, %136, %cst_48 {dimension_numbers = #tpu.dot_dimension_numbers<[1], [0], [0], [1], [0, 0, 1, 1], [], []>} : vector<4x4xf32>, vector<4x384xf32>, vector<4x384xf32> -> vector<4x384xf32>
    %138 = arith.addf %132, %137 : vector<4x384xf32>
    %139 = vector.extract_strided_slice %6 {offsets = [1, 0, 0], sizes = [1, 4, 4], strides = [1, 1, 1]} : vector<9x4x4xf32> to vector<1x4x4xf32>
    %140 = vector.shape_cast %139 : vector<1x4x4xf32> to vector<4x4xf32>
    %cst_49 = arith.constant dense<0.000000e+00> : vector<4x4xf32>
    %141 = tpu.matmul %131, %140, %cst_49 {dimension_numbers = #tpu.dot_dimension_numbers<[1], [0], [0], [1], [0, 0, 1, 1], [], []>} : vector<4x4xf32>, vector<4x4xf32>, vector<4x4xf32> -> vector<4x4xf32>
    %142 = vector.extract_strided_slice %1 {offsets = [0, 2], sizes = [4, 384], strides = [1, 1]} : vector<4x512xf32> to vector<4x384xf32>
    %cst_50 = arith.constant dense<0.000000e+00> : vector<4x384xf32>
    %143 = tpu.matmul %141, %142, %cst_50 {dimension_numbers = #tpu.dot_dimension_numbers<[1], [0], [0], [1], [0, 0, 1, 1], [], []>} : vector<4x4xf32>, vector<4x384xf32>, vector<4x384xf32> -> vector<4x384xf32>
    %144 = arith.addf %138, %143 : vector<4x384xf32>
    %145 = vector.extract_strided_slice %6 {offsets = [2, 0, 0], sizes = [1, 4, 4], strides = [1, 1, 1]} : vector<9x4x4xf32> to vector<1x4x4xf32>
    %146 = vector.shape_cast %145 : vector<1x4x4xf32> to vector<4x4xf32>
    %cst_51 = arith.constant dense<0.000000e+00> : vector<4x4xf32>
    %147 = tpu.matmul %131, %146, %cst_51 {dimension_numbers = #tpu.dot_dimension_numbers<[1], [0], [0], [1], [0, 0, 1, 1], [], []>} : vector<4x4xf32>, vector<4x4xf32>, vector<4x4xf32> -> vector<4x4xf32>
    %148 = vector.extract_strided_slice %1 {offsets = [0, 4], sizes = [4, 384], strides = [1, 1]} : vector<4x512xf32> to vector<4x384xf32>
    %cst_52 = arith.constant dense<0.000000e+00> : vector<4x384xf32>
    %149 = tpu.matmul %147, %148, %cst_52 {dimension_numbers = #tpu.dot_dimension_numbers<[1], [0], [0], [1], [0, 0, 1, 1], [], []>} : vector<4x4xf32>, vector<4x384xf32>, vector<4x384xf32> -> vector<4x384xf32>
    %150 = arith.addf %144, %149 : vector<4x384xf32>
    %151 = vector.extract_strided_slice %6 {offsets = [3, 0, 0], sizes = [1, 4, 4], strides = [1, 1, 1]} : vector<9x4x4xf32> to vector<1x4x4xf32>
    %152 = vector.shape_cast %151 : vector<1x4x4xf32> to vector<4x4xf32>
    %cst_53 = arith.constant dense<0.000000e+00> : vector<4x4xf32>
    %153 = tpu.matmul %131, %152, %cst_53 {dimension_numbers = #tpu.dot_dimension_numbers<[1], [0], [0], [1], [0, 0, 1, 1], [], []>} : vector<4x4xf32>, vector<4x4xf32>, vector<4x4xf32> -> vector<4x4xf32>
    %154 = vector.extract_strided_slice %1 {offsets = [0, 40], sizes = [4, 384], strides = [1, 1]} : vector<4x512xf32> to vector<4x384xf32>
    %cst_54 = arith.constant dense<0.000000e+00> : vector<4x384xf32>
    %155 = tpu.matmul %153, %154, %cst_54 {dimension_numbers = #tpu.dot_dimension_numbers<[1], [0], [0], [1], [0, 0, 1, 1], [], []>} : vector<4x4xf32>, vector<4x384xf32>, vector<4x384xf32> -> vector<4x384xf32>
    %156 = arith.addf %150, %155 : vector<4x384xf32>
    %157 = vector.extract_strided_slice %6 {offsets = [4, 0, 0], sizes = [1, 4, 4], strides = [1, 1, 1]} : vector<9x4x4xf32> to vector<1x4x4xf32>
    %158 = vector.shape_cast %157 : vector<1x4x4xf32> to vector<4x4xf32>
    %cst_55 = arith.constant dense<0.000000e+00> : vector<4x4xf32>
    %159 = tpu.matmul %131, %158, %cst_55 {dimension_numbers = #tpu.dot_dimension_numbers<[1], [0], [0], [1], [0, 0, 1, 1], [], []>} : vector<4x4xf32>, vector<4x4xf32>, vector<4x4xf32> -> vector<4x4xf32>
    %160 = vector.extract_strided_slice %1 {offsets = [0, 42], sizes = [4, 384], strides = [1, 1]} : vector<4x512xf32> to vector<4x384xf32>
    %cst_56 = arith.constant dense<0.000000e+00> : vector<4x384xf32>
    %161 = tpu.matmul %159, %160, %cst_56 {dimension_numbers = #tpu.dot_dimension_numbers<[1], [0], [0], [1], [0, 0, 1, 1], [], []>} : vector<4x4xf32>, vector<4x384xf32>, vector<4x384xf32> -> vector<4x384xf32>
    %162 = arith.addf %156, %161 : vector<4x384xf32>
    %163 = vector.extract_strided_slice %6 {offsets = [5, 0, 0], sizes = [1, 4, 4], strides = [1, 1, 1]} : vector<9x4x4xf32> to vector<1x4x4xf32>
    %164 = vector.shape_cast %163 : vector<1x4x4xf32> to vector<4x4xf32>
    %cst_57 = arith.constant dense<0.000000e+00> : vector<4x4xf32>
    %165 = tpu.matmul %131, %164, %cst_57 {dimension_numbers = #tpu.dot_dimension_numbers<[1], [0], [0], [1], [0, 0, 1, 1], [], []>} : vector<4x4xf32>, vector<4x4xf32>, vector<4x4xf32> -> vector<4x4xf32>
    %166 = vector.extract_strided_slice %1 {offsets = [0, 44], sizes = [4, 384], strides = [1, 1]} : vector<4x512xf32> to vector<4x384xf32>
    %cst_58 = arith.constant dense<0.000000e+00> : vector<4x384xf32>
    %167 = tpu.matmul %165, %166, %cst_58 {dimension_numbers = #tpu.dot_dimension_numbers<[1], [0], [0], [1], [0, 0, 1, 1], [], []>} : vector<4x4xf32>, vector<4x384xf32>, vector<4x384xf32> -> vector<4x384xf32>
    %168 = arith.addf %162, %167 : vector<4x384xf32>
    %169 = vector.extract_strided_slice %6 {offsets = [6, 0, 0], sizes = [1, 4, 4], strides = [1, 1, 1]} : vector<9x4x4xf32> to vector<1x4x4xf32>
    %170 = vector.shape_cast %169 : vector<1x4x4xf32> to vector<4x4xf32>
    %cst_59 = arith.constant dense<0.000000e+00> : vector<4x4xf32>
    %171 = tpu.matmul %131, %170, %cst_59 {dimension_numbers = #tpu.dot_dimension_numbers<[1], [0], [0], [1], [0, 0, 1, 1], [], []>} : vector<4x4xf32>, vector<4x4xf32>, vector<4x4xf32> -> vector<4x4xf32>
    %172 = vector.extract_strided_slice %1 {offsets = [0, 80], sizes = [4, 384], strides = [1, 1]} : vector<4x512xf32> to vector<4x384xf32>
    %cst_60 = arith.constant dense<0.000000e+00> : vector<4x384xf32>
    %173 = tpu.matmul %171, %172, %cst_60 {dimension_numbers = #tpu.dot_dimension_numbers<[1], [0], [0], [1], [0, 0, 1, 1], [], []>} : vector<4x4xf32>, vector<4x384xf32>, vector<4x384xf32> -> vector<4x384xf32>
    %174 = arith.addf %168, %173 : vector<4x384xf32>
    %175 = vector.extract_strided_slice %6 {offsets = [7, 0, 0], sizes = [1, 4, 4], strides = [1, 1, 1]} : vector<9x4x4xf32> to vector<1x4x4xf32>
    %176 = vector.shape_cast %175 : vector<1x4x4xf32> to vector<4x4xf32>
    %cst_61 = arith.constant dense<0.000000e+00> : vector<4x4xf32>
    %177 = tpu.matmul %131, %176, %cst_61 {dimension_numbers = #tpu.dot_dimension_numbers<[1], [0], [0], [1], [0, 0, 1, 1], [], []>} : vector<4x4xf32>, vector<4x4xf32>, vector<4x4xf32> -> vector<4x4xf32>
    %178 = vector.extract_strided_slice %1 {offsets = [0, 82], sizes = [4, 384], strides = [1, 1]} : vector<4x512xf32> to vector<4x384xf32>
    %cst_62 = arith.constant dense<0.000000e+00> : vector<4x384xf32>
    %179 = tpu.matmul %177, %178, %cst_62 {dimension_numbers = #tpu.dot_dimension_numbers<[1], [0], [0], [1], [0, 0, 1, 1], [], []>} : vector<4x4xf32>, vector<4x384xf32>, vector<4x384xf32> -> vector<4x384xf32>
    %180 = arith.addf %174, %179 : vector<4x384xf32>
    %181 = vector.extract_strided_slice %6 {offsets = [8, 0, 0], sizes = [1, 4, 4], strides = [1, 1, 1]} : vector<9x4x4xf32> to vector<1x4x4xf32>
    %182 = vector.shape_cast %181 : vector<1x4x4xf32> to vector<4x4xf32>
    %cst_63 = arith.constant dense<0.000000e+00> : vector<4x4xf32>
    %183 = tpu.matmul %131, %182, %cst_63 {dimension_numbers = #tpu.dot_dimension_numbers<[1], [0], [0], [1], [0, 0, 1, 1], [], []>} : vector<4x4xf32>, vector<4x4xf32>, vector<4x4xf32> -> vector<4x4xf32>
    %184 = vector.extract_strided_slice %1 {offsets = [0, 84], sizes = [4, 384], strides = [1, 1]} : vector<4x512xf32> to vector<4x384xf32>
    %cst_64 = arith.constant dense<0.000000e+00> : vector<4x384xf32>
    %185 = tpu.matmul %183, %184, %cst_64 {dimension_numbers = #tpu.dot_dimension_numbers<[1], [0], [0], [1], [0, 0, 1, 1], [], []>} : vector<4x4xf32>, vector<4x384xf32>, vector<4x384xf32> -> vector<4x384xf32>
    %186 = arith.addf %180, %185 : vector<4x384xf32>
    %c0_65 = arith.constant 0 : index
    %c0_66 = arith.constant 0 : index
    %c0_67 = arith.constant 0 : index
    %187 = vector.load %arg9[%c0_65, %c0_66, %c0_67] : memref<1x4x384xf32, #tpu.memory_space<vmem>>, vector<1x4x384xf32>
    %188 = vector.shape_cast %187 : vector<1x4x384xf32> to vector<4x384xf32>
    %189 = vector.shape_cast %186 : vector<4x384xf32> to vector<1x4x384xf32>
    tpu.vector_store %arg9[%c0_65, %c0_66, %c0_67], %189 {strides = array<i32>} : memref<1x4x384xf32, #tpu.memory_space<vmem>>, vector<1x4x384xf32>,
    return
  }
  func.func @transform_0(%arg0: i32) -> (i32, i32, i32) {
    %c0_i32 = arith.constant 0 : i32
    %c0_i32_0 = arith.constant 0 : i32
    %c0_i32_1 = arith.constant 0 : i32
    return %arg0, %c0_i32, %c0_i32_0 : i32, i32, i32
  }
  func.func @transform_1(%arg0: i32) -> (i32, i32, i32) {
    %c0_i32 = arith.constant 0 : i32
    %c0_i32_0 = arith.constant 0 : i32
    %c0_i32_1 = arith.constant 0 : i32
    return %arg0, %c0_i32, %c0_i32_0 : i32, i32, i32
  }
  func.func @transform_2(%arg0: i32) -> (i32, i32, i32) {
    %c0_i32 = arith.constant 0 : i32
    %c0_i32_0 = arith.constant 0 : i32
    %c0_i32_1 = arith.constant 0 : i32
    %c0_i32_2 = arith.constant 0 : i32
    return %c0_i32, %c0_i32_0, %c0_i32_1 : i32, i32, i32
  }
  func.func @transform_3(%arg0: i32) -> (i32, i32) {
    %c0_i32 = arith.constant 0 : i32
    %c0_i32_0 = arith.constant 0 : i32
    %c0_i32_1 = arith.constant 0 : i32
    return %c0_i32, %c0_i32_0 : i32, i32
  }
  func.func @transform_4(%arg0: i32) -> (i32, i32, i32) {
    %c0_i32 = arith.constant 0 : i32
    %c0_i32_0 = arith.constant 0 : i32
    %c0_i32_1 = arith.constant 0 : i32
    %c0_i32_2 = arith.constant 0 : i32
    return %c0_i32, %c0_i32_0, %c0_i32_1 : i32, i32, i32
  }
  func.func @transform_5(%arg0: i32) -> (i32, i32) {
    %c0_i32 = arith.constant 0 : i32
    %c0_i32_0 = arith.constant 0 : i32
    %c0_i32_1 = arith.constant 0 : i32
    return %c0_i32, %c0_i32_0 : i32, i32
  }
  func.func @transform_6(%arg0: i32) -> (i32, i32, i32) {
    %c0_i32 = arith.constant 0 : i32
    %c0_i32_0 = arith.constant 0 : i32
    %c0_i32_1 = arith.constant 0 : i32
    %c0_i32_2 = arith.constant 0 : i32
    return %c0_i32, %c0_i32_0, %c0_i32_1 : i32, i32, i32
  }
  func.func @transform_7(%arg0: i32) -> (i32, i32) {
    %c0_i32 = arith.constant 0 : i32
    %c0_i32_0 = arith.constant 0 : i32
    %c0_i32_1 = arith.constant 0 : i32
    return %c0_i32, %c0_i32_0 : i32, i32
  }
  func.func @transform_8(%arg0: i32) -> (i32, i32, i32) {
    %c0_i32 = arith.constant 0 : i32
    %c0_i32_0 = arith.constant 0 : i32
    %c0_i32_1 = arith.constant 0 : i32
    return %arg0, %c0_i32, %c0_i32_0 : i32, i32, i32
  }
}

</mosaic_0001>

<bundles_post_ra>
// kernel: tpu_custom_call.1
= control target key start
LH: loop header
LB: loop body
LE: loop exit
PB: predicated region body
PF: predicated region fallthrough
CT: control target
= control target key end

     0   :  { %13 = vsyncpa [#allocation3], 0  ;;  %s9960_s0 = inlined_call_operand.vmem [shape: f32[2,4,512], index: 0, kind: input, shape index: {}]   ;;  %s9961_s1 = inlined_call_operand.vmem [shape: f32[2,4,512], index: 1, kind: input, shape index: {}]   ;;  %s9962_s2 = inlined_call_operand.vmem [shape: f32[9,4,4], index: 2, kind: input, shape index: {}]   ;;  %s9963_s3 = inlined_call_operand.vmem [shape: f32[4,1], index: 3, kind: input, shape index: {}]   ;;  %s9964_s4 = inlined_call_operand.vmem [shape: f32[9,4,4], index: 4, kind: input, shape index: {}]   ;;  %s9965_s5 = inlined_call_operand.vmem [shape: f32[4,1], index: 5, kind: input, shape index: {}]   ;;  %s9966_s6 = inlined_call_operand.vmem [shape: f32[9,4,4], index: 6, kind: input, shape index: {}]   ;;  %s9967_s7 = inlined_call_operand.hbm [shape: f32[84,384], index: 7, kind: input, shape index: {}]   ;;  %s9968_s8 = inlined_call_operand.hbm [shape: f32[2,4,384], index: 8, kind: output, shape index: {}]  }
   0x1   :  { %14 = vsyncpa [#allocation4], 0 }
   0x2   :  { %16 = vsyncpa [#allocation4 + $0x1], 0  ;;  %s7772_s27 = smov 0   ;;  %s7774_s28 = smov 0  }
   0x3   :  { %s7776_s29 = smov 0   ;;  %s7778_s30 = smov 0  }
   0x4 LB: > { %s7793_s9 = sadd.s32 4294967295, %s7704_s30   ;;  %s7101_s10 = sadd.s32 4294967294, %s7704_s30   ;;  %s7704_s30 = sphi %s7778_s30, %s10345_s30   ;;  %s7700_s29 = sphi %s7776_s29, %s10344_s29   ;;  %s7696_s28 = sphi %s7774_s28, %s10343_s28   ;;  %s7692_s27 = sphi %s7772_s27, %s10342_s27  }
   0x5   : > { %s7797_s11 = sadd.s32 1, %s7704_s30   ;;  %s207_s12 = sadd.s32 1, %s7700_s29 }
   0x6   : > { %s204_s13 = ssub.s32 %s7704_s30, %s7797_s11  ;;  %p217_p0 = scmp.ne.s32.totalorder %s7700_s29, %s7696_s28 }
   0x7   : > { %p205_p1 = scmp.eq.s32.totalorder %s204_s13, 0  ;;  %p218_p2 = scmp.eq.s32.totalorder %s7793_s9, 1 }
   0x8   : > { %p223_p3 = scmp.ne.s32.totalorder %s7696_s28, %s7692_s27  ;;  %p224_p4 = scmp.eq.s32.totalorder %s7101_s10, 1 }
   0x9   : > { %s7808_s14 = scalar_select %p205_p1, %s7700_s29, %s207_s12  }
   0xa   : > { %p7810_p5 = por %p218_p2, %p217_p0  ;;  %p7814_p6 = por %p224_p4, %p223_p3 }
   0xb   : > { %p7102_p7 = scmp.ge.s32.totalorder %s7704_s30, 1  ;;  %p231_p8 = scmp.lt.s32.totalorder %s7704_s30, 3 }
   0xc   : > { %s10038_s16 = scalar_select %p7814_p6, 1, 0 }
   0xd   : > { %p7547_p9 = scmp.eq.s32.totalorder %s7793_s9, 0  ;;  %p7821_p10 = pnand %p7102_p7, %p231_p8 }
   0xe   : > { %s7706_s18 = smov [#allocation2]  }
   0xf   : > { %s258_s19 = sshll.u32 %s7706_s18, 4  ;;  %p7539_p11 = pneg %p7821_p10  ;;  %s259_s19 = int_to_ptr.vmem [resolvable:$true] %s258_s19 }
  0x10   : > { %s7625_s20 = scalar_lea.vmem %s259_s19, 4224  ;;  %p7633_p3 = scmp.lt.s32.totalorder %s259_s19, %s259_s19 }
  0x11   : > { %p7540_p12 = pnand %p7547_p9, %p7539_p11  ;;  %p7626_p0 = scmp.ne.s32.totalorder %s259_s19, %s7625_s20 }
  0x12   : > { %p7634_p4 = scmp.lt.s32.totalorder %s7625_s20, %s7625_s20 }
  0x13   : > { %p7616_p13 = pneg %p7540_p12 }
  0x14   : > { %p7635_p6 = por %p7634_p4, %p7633_p3 }
  0x15   : > { %p7628_p1 = pnand %p7626_p0, %p7616_p13 }
  0x17   : > { %p7629_p2 = pneg %p7628_p1 }
  0x19   : > { %p7636_p7 = pnand %p7635_p6, %p7629_p2 }
  0x1b   : > { %7639 = shalt.err (!%p7636_p7)
}
  0x1c   : > { %s7707_s21 = smov 384   ;;  %s7708_s22 = smov 24  }
  0x1d   : > { %7542 = dma.hbm_to_vmem [thread:$0]  (!%p7540_p12), %s9967_s7, 4224, %s259_s19, [#allocation3], %s7707_s21, %s7707_s21, %s7708_s22  }
  0x1e   : > { %290 = sbr.rel (%p7821_p10) target bundleno = 2863 (0xb2f), region = 52 }
  0x23   : > { %7683 = dma.done.wait (%p7547_p9), [#allocation3], 4224  }
  0x24   : > { %7685 = vsyncadd (%p7547_p9), [#allocation3], 4294963072  ;;  %p329_p8 = scmp.lt.s32.totalorder %s7793_s9, 1  ;;  %v9972_v0 = vmov 0.0   ;;  %s7710_s17 = smov 85   ;;  %vm9970_vm0 = vmmov 0  }
  0x25   : > { %7346 = vmatprep.subr.mxu1 %v9972_v0  ;;  %461 = vmatprep.mubr.f32.mxu0 %v9972_v0  ;;  %s7711_s21 = smov 86   ;;  %s7713_s22 = smov 84   ;;  %vm382_vm1 = vcmask 695296   ;;  %vm9994_vm2 = vcmask 1043456   ;;  %vm546_vm3 = vcmask 703488   ;;  %vm9969_vm4 = vcmask 31744  }
  0x26   : > { %s330_s25 = scalar_select %p329_p8, %s7793_s9, 1  ;;  %7348 = vmatprep.mubr.msk.f32.mxu1 %vm9970_vm0, %v9972_v0  ;;  %v344_v18 = vld [vmem:[%s9962_s2 + $0x4] sm:$0xf]  ;;  %v343_v23 = vld [vmem:[%s9962_s2] sm:$0xf]  ;;  %v7720_v28 = vmov 0  }
  0x27   : > { %s7714_s23 = smov 66   ;;  %s7715_s24 = smov 65   ;;  %7603 = vset.pattern.permute.xlu1 %v7720_v28  ;;  %v353_v31 = vld [vmem:[%s9964_s4 + $0x4] sm:$0xf]  ;;  %7602 = vset.pattern.permute.xlu0 %v7720_v28  ;;  %v3329_v37 = vld [vmem:[%s9963_s3] sm:$0xf] }
  0x28   : > { %s7270_s26 = sshll.u32 %s330_s25, 4  ;;  %s7716_s25 = smov 64   ;;  %v352_v40 = vld [vmem:[%s9964_s4] sm:$0xf]  ;;  %vm9976_vm5 = vcmask 687104   ;;  %vm1363_vm6 = vcmask 539648  }
  0x29   : > { %s7845_s13 = scalar_lea.vmem %s9960_s0, %s7270_s26  ;;  %s338_s20 = scalar_lea.vmem %s9961_s1, %s7270_s26  ;;  %v3338_v41 = vld [vmem:[%s9965_s5] sm:$0xf]  ;;  %v345_v49 = vld [vmem:[%s9962_s2 + $0x8] sm:$0xf]  ;;  %vm1692_vm7 = vcmask 531456   ;;  %vm2021_vm8 = vcmask 523264  }
  0x2a   : > { %v7848_v1 = vld [vmem:[%s7845_s13 + $0x8] sm:$0xff]  ;;  %v7851_v2 = vld [vmem:[%s7845_s13] sm:$0xff]  ;;  %s7717_s26 = smov 46   ;;  %s7718_s10 = smov 45   ;;  %vm2350_vm9 = vcmask 375808   ;;  %vm2679_vm10 = vcmask 367616  }
  0x2b   : > { %378 = vrot.lane.b32.xlu0 %v7848_v1, %s7710_s17  ;;  %374 = vrot.lane.b32.xlu1 %v7851_v2, %s7710_s17  ;;  %v7857_v3 = vcombine.high %v7851_v2, %v7851_v2  ;;  %v7866_v4 = vcombine.high %v7848_v1, %v7848_v1  ;;  %v7868_v5 = vld [vmem:[%s338_s20] sm:$0xff]  ;;  %v7880_v7 = vld [vmem:[%s338_s20 + $0x8] sm:$0xff]  ;;  %s7719_s12 = smov 44   ;;  %vm3008_vm11 = vcmask 359424   ;;  %s7532_s19 = smul.u32 192, %s7793_s9 }
  0x2c   : > { %v7876_v6 = vcombine.high %v7868_v5, %v7868_v5  ;;  %v7888_v8 = vcombine.high %v7880_v7, %v7880_v7  ;;  %v354_v57 = vld [vmem:[%s9964_s4 + $0x8] sm:$0xf]  ;;  %s7726_s9 = smov [#allocation5]  }
  0x2d   : > { %10040 = vst [vmem:[#allocation8_spill] sm:$0xff] %v7857_v3  ;;  %10041 = vst [vmem:[#allocation9_spill] sm:$0xff] %v7866_v4 }
  0x2f   : > { %542 = vrot.lane.b32.xlu0 %v7848_v1, %s7711_s21  ;;  %540 = vrot.lane.b32.xlu1 %v7857_v3, %s7711_s21 }
  0x33   : > { %380 = vrot.lane.b32.xlu1 %v7866_v4, %s7710_s17  ;;  %376 = vrot.lane.b32.xlu0 %v7857_v3, %s7710_s17 }
  0x37   : > { %706 = vrot.lane.b32.xlu1 %v7876_v6, %s7710_s17  ;;  %538 = vrot.lane.b32.xlu0 %v7851_v2, %s7711_s21 }
  0x3b   : > { %544 = vrot.lane.b32.xlu1 %v7866_v4, %s7711_s21  ;;  %708 = vrot.lane.b32.xlu0 %v7880_v7, %s7710_s17 }
  0x3f   : > { %867 = vrot.lane.b32.xlu1 %v7876_v6, %s7711_s21  ;;  %704 = vrot.lane.b32.xlu0 %v7868_v5, %s7710_s17 }
  0x43   : > { %710 = vrot.lane.b32.xlu1 %v7888_v8, %s7710_s17  ;;  %869 = vrot.lane.b32.xlu0 %v7880_v7, %s7711_s21 }
  0x47   : > { %1028 = vrot.lane.b32.xlu1 %v7857_v3, %s7713_s22  ;;  %865 = vrot.lane.b32.xlu0 %v7868_v5, %s7711_s21 }
  0x4b   : > { %871 = vrot.lane.b32.xlu1 %v7888_v8, %s7711_s21  ;;  %1030 = vrot.lane.b32.xlu0 %v7848_v1, %s7713_s22  ;;  %s7725_s21 = smov 48  }
  0x4f   : > { %1193 = vrot.lane.b32.xlu1 %v7876_v6, %s7713_s22  ;;  %1026 = vrot.lane.b32.xlu0 %v7851_v2, %s7713_s22 }
  0x53   : > { %1032 = vrot.lane.b32.xlu1 %v7866_v4, %s7713_s22  ;;  %1195 = vrot.lane.b32.xlu0 %v7880_v7, %s7713_s22 }
  0x57   : > { %1357 = vrot.lane.b32.xlu1 %v7857_v3, %s7714_s23  ;;  %1191 = vrot.lane.b32.xlu0 %v7868_v5, %s7713_s22 }
  0x5b   : > { %1197 = vrot.lane.b32.xlu1 %v7888_v8, %s7713_s22  ;;  %1359 = vrot.lane.b32.xlu0 %v7848_v1, %s7714_s23 }
  0x5f   : > { %1522 = vrot.lane.b32.xlu1 %v7876_v6, %s7714_s23  ;;  %1355 = vrot.lane.b32.xlu0 %v7851_v2, %s7714_s23 }
  0x63   : > { %1361 = vrot.lane.b32.xlu1 %v7866_v4, %s7714_s23  ;;  %1524 = vrot.lane.b32.xlu0 %v7880_v7, %s7714_s23 }
  0x67   : > { %1686 = vrot.lane.b32.xlu1 %v7857_v3, %s7715_s24  ;;  %1520 = vrot.lane.b32.xlu0 %v7868_v5, %s7714_s23 }
  0x6b   : > { %1526 = vrot.lane.b32.xlu1 %v7888_v8, %s7714_s23  ;;  %1688 = vrot.lane.b32.xlu0 %v7848_v1, %s7715_s24 }
  0x6f   : > { %1851 = vrot.lane.b32.xlu1 %v7876_v6, %s7715_s24  ;;  %1684 = vrot.lane.b32.xlu0 %v7851_v2, %s7715_s24 }
  0x73   : > { %1690 = vrot.lane.b32.xlu1 %v7866_v4, %s7715_s24  ;;  %1853 = vrot.lane.b32.xlu0 %v7880_v7, %s7715_s24 }
  0x77   : > { %2015 = vrot.lane.b32.xlu1 %v7857_v3, %s7716_s25  ;;  %1849 = vrot.lane.b32.xlu0 %v7868_v5, %s7715_s24 }
  0x7b   : > { %1855 = vrot.lane.b32.xlu1 %v7888_v8, %s7715_s24  ;;  %2017 = vrot.lane.b32.xlu0 %v7848_v1, %s7716_s25  ;;  %s7016_s24 = scalar_lea.hbm %s9968_s8, %s7532_s19 }
  0x7f   : > { %2180 = vrot.lane.b32.xlu1 %v7876_v6, %s7716_s25  ;;  %2013 = vrot.lane.b32.xlu0 %v7851_v2, %s7716_s25 }
  0x83   : > { %2019 = vrot.lane.b32.xlu1 %v7866_v4, %s7716_s25  ;;  %2182 = vrot.lane.b32.xlu0 %v7880_v7, %s7716_s25 }
  0x87   : > { %2344 = vrot.lane.b32.xlu1 %v7857_v3, %s7717_s26  ;;  %2178 = vrot.lane.b32.xlu0 %v7868_v5, %s7716_s25 }
  0x8b   : > { %2184 = vrot.lane.b32.xlu1 %v7888_v8, %s7716_s25  ;;  %2346 = vrot.lane.b32.xlu0 %v7848_v1, %s7717_s26  ;;  %s7722_s25 = smov 126  }
  0x8f   : > { %2509 = vrot.lane.b32.xlu1 %v7876_v6, %s7717_s26  ;;  %2342 = vrot.lane.b32.xlu0 %v7851_v2, %s7717_s26 }
  0x93   : > { %2348 = vrot.lane.b32.xlu1 %v7866_v4, %s7717_s26  ;;  %2511 = vrot.lane.b32.xlu0 %v7880_v7, %s7717_s26 }
  0x97   : > { %2673 = vrot.lane.b32.xlu1 %v7857_v3, %s7718_s10  ;;  %2507 = vrot.lane.b32.xlu0 %v7868_v5, %s7717_s26 }
  0x9b   : > { %2513 = vrot.lane.b32.xlu1 %v7888_v8, %s7717_s26  ;;  %2675 = vrot.lane.b32.xlu0 %v7848_v1, %s7718_s10  ;;  %s7724_s26 = smov 88  }
  0x9d   : > { %v379_v9 = vpop.permute.xlu0 %378  ;;  %v375_v10 = vpop.permute.xlu1 %374 }
  0x9f   : > { %2838 = vrot.lane.b32.xlu1 %v7876_v6, %s7718_s10  ;;  %2671 = vrot.lane.b32.xlu0 %v7851_v2, %s7718_s10 }
  0xa1   : > { %v543_v11 = vpop.permute.xlu0 %542  ;;  %v541_v12 = vpop.permute.xlu1 %540 }
  0xa2   : > { %v7960_v20 = vsel %vm546_vm3, %v541_v12, %v543_v11 }
  0xa3   : > { %2677 = vrot.lane.b32.xlu1 %v7866_v4, %s7718_s10  ;;  %2840 = vrot.lane.b32.xlu0 %v7880_v7, %s7718_s10  ;;  %10042 = vst [vmem:[#allocation10_spill] sm:$0xff] %v7960_v20 }
  0xa5   : > { %v381_v13 = vpop.permute.xlu1 %380  ;;  %v377_v14 = vpop.permute.xlu0 %376 }
  0xa6   : > { %v385_v15 = vsel %vm382_vm1, %v379_v9, %v381_v13  ;;  %v384_v16 = vsel %vm382_vm1, %v377_v14, %v379_v9  ;;  %v383_v17 = vsel %vm382_vm1, %v375_v10, %v377_v14 }
  0xa7   : > { %3002 = vrot.lane.b32.xlu1 %v7857_v3, %s7719_s12  ;;  %7347 = vmatpush3.msk.msra.mxu1 %vm9994_vm2, %v385_v15  ;;  %v8535_v3 = vld [vmem:[#allocation2 + $0xe0] sm:$0xff] }
  0xa8   : > { %2836 = vrot.lane.b32.xlu0 %v7868_v5, %s7718_s10  ;;  %7111 = vmatprep.subr.msk.mxu0 %vm9994_vm2, %v384_v16 }
  0xa9   : > { %7112 = vmatpush1.msk.msra.mxu0 %vm9994_vm2, %v383_v17  ;;  %v707_v19 = vpop.permute.xlu1 %706  ;;  %v539_v21 = vpop.permute.xlu0 %538  ;;  %7351 = vmatprep.subr.mxu1 %v9972_v0 }
  0xaa   : > { %7116 = vmatprep.subr.msk.mxu0 %vm9994_vm2, %v7960_v20  ;;  %v7966_v22 = vsel %vm546_vm3, %v539_v21, %v541_v12  ;;  %7113 = vmatmul.mubr.msk.f32.vlgmr.msra.gmra.mxu0 %vm9969_vm4, %v344_v18  ;;  %v355_v12 = vld [vmem:[%s9964_s4 + $0xc] sm:$0xf]  ;;  %v347_v21 = vld [vmem:[%s9962_s2 + $0x10] sm:$0xf] }
  0xab   : > { %10043 = vst [vmem:[#allocation11_spill] sm:$0xff] %v7966_v22  ;;  %2842 = vrot.lane.b32.xlu1 %v7888_v8, %s7718_s10  ;;  %7117 = vmatpush1.msk.msra.mxu0 %vm9994_vm2, %v7966_v22 }
  0xac   : > { %3004 = vrot.lane.b32.xlu0 %v7848_v1, %s7719_s12  ;;  %7349 = vmatmul.mubr.msk.f32.vlgmr.msra.gmra.mxu1 %vm9969_vm4, %v344_v18 }
  0xad   : > { %v545_v24 = vpop.permute.xlu1 %544  ;;  %v709_v25 = vpop.permute.xlu0 %708  ;;  %623 = vmatprep.mubr.f32.mxu0 %v9972_v0  ;;  %7353 = vmatprep.mubr.msk.f32.mxu1 %vm9970_vm0, %v9972_v0 }
  0xae   : > { %v7983_v26 = vsel %vm546_vm3, %v543_v11, %v545_v24  ;;  %v713_v27 = vsel %vm382_vm1, %v707_v19, %v709_v25  ;;  %7118 = vmatmul.mubr.msk.f32.vlgmr.msra.gmra.mxu0 %vm9969_vm4, %v343_v23 }
  0xaf   : > { %10044 = vst [vmem:[#allocation12_spill] sm:$0xff] %v7983_v26  ;;  %3167 = vrot.lane.b32.xlu1 %v7876_v6, %s7719_s12  ;;  %7352 = vmatpush3.msk.msra.mxu1 %vm9994_vm2, %v7983_v26 }
  0xb0   : > { %3000 = vrot.lane.b32.xlu0 %v7851_v2, %s7719_s12  ;;  %7121 = vmatprep.subr.msk.mxu0 %vm9994_vm2, %v713_v27  ;;  %v346_v2 = vld [vmem:[%s9962_s2 + $0xc] sm:$0xf] }
  0xb1   : > { %v868_v29 = vpop.permute.xlu1 %867  ;;  %v705_v30 = vpop.permute.xlu0 %704  ;;  %7356 = vmatprep.subr.mxu1 %v9972_v0  ;;  %7354 = vmatmul.mubr.msk.f32.vlgmr.msra.gmra.mxu1 %vm9969_vm4, %v343_v23 }
  0xb2   : > { %v712_v32 = vsel %vm382_vm1, %v705_v30, %v707_v19  ;;  %788 = vmatprep.mubr.f32.mxu0 %v9972_v0  ;;  %7358 = vmatprep.mubr.msk.f32.mxu1 %vm9970_vm0, %v9972_v0 }
  0xb3   : > { %3006 = vrot.lane.b32.xlu1 %v7866_v4, %s7719_s12  ;;  %7122 = vmatpush1.msk.msra.mxu0 %vm9994_vm2, %v712_v32  ;;  %v8533_v4 = vld [vmem:[#allocation2 + $0xd8] sm:$0xff] }
  0xb4   : > { %3169 = vrot.lane.b32.xlu0 %v7880_v7, %s7719_s12  ;;  %7123 = vmatmul.mubr.msk.f32.vlgmr.msra.gmra.mxu0 %vm9969_vm4, %v353_v31 }
  0xb5   : > { %v711_v33 = vpop.permute.xlu1 %710  ;;  %v870_v34 = vpop.permute.xlu0 %869  ;;  %949 = vmatprep.mubr.f32.mxu0 %v9972_v0 }
  0xb6   : > { %v714_v35 = vsel %vm382_vm1, %v709_v25, %v711_v33  ;;  %v874_v36 = vsel %vm546_vm3, %v868_v29, %v870_v34 }
  0xb7   : > { %3171 = vrot.lane.b32.xlu1 %v7888_v8, %s7719_s12  ;;  %7357 = vmatpush3.msk.msra.mxu1 %vm9994_vm2, %v714_v35 }
  0xb8   : > { %3165 = vrot.lane.b32.xlu0 %v7868_v5, %s7719_s12  ;;  %7126 = vmatprep.subr.msk.mxu0 %vm9994_vm2, %v874_v36  ;;  %s326_s12 = sand.u32 1, %s7696_s28  }
  0xb9   : > { %v1029_v38 = vpop.permute.xlu1 %1028  ;;  %v866_v39 = vpop.permute.xlu0 %865  ;;  %7361 = vmatprep.subr.mxu1 %v9972_v0  ;;  %7359 = vmatmul.mubr.msk.f32.vlgmr.msra.gmra.mxu1 %vm9969_vm4, %v353_v31  ;;  %v356_v31 = vld [vmem:[%s9964_s4 + $0x10] sm:$0xf]  ;;  %s7531_s18 = smul.u32 12, %s326_s12 }
  0xba   : > { %v873_v42 = vsel %vm546_vm3, %v866_v39, %v868_v29  ;;  %7363 = vmatprep.mubr.msk.f32.mxu1 %vm9970_vm0, %v9972_v0  ;;  %v348_v39 = vld [vmem:[%s9962_s2 + $0x14] sm:$0xf] }
  0xbb   : > { %7127 = vmatpush1.msk.msra.mxu0 %vm9994_vm2, %v873_v42  ;;  %3332 = vperm.xlu1 %7603, %v3329_v37   ;;  %s328_s20 = scalar_lea.vmem [#allocation5], %s7531_s18 }
  0xbc   : > { %7128 = vmatmul.mubr.msk.f32.vlgmr.msra.gmra.mxu0 %vm9969_vm4, %v352_v40  ;;  %3341 = vperm.xlu0 %7602, %v3338_v41  }
  0xbd   : > { %v872_v43 = vpop.permute.xlu1 %871  ;;  %v1031_v44 = vpop.permute.xlu0 %1030  ;;  %1111 = vmatprep.mubr.f32.mxu0 %v9972_v0 }
  0xbe   : > { %v875_v45 = vsel %vm546_vm3, %v870_v34, %v872_v43  ;;  %v8037_v46 = vsel %vm9976_vm5, %v1029_v38, %v1031_v44 }
  0xbf   : > { %10045 = vst [vmem:[#allocation13_spill] sm:$0xff] %v8037_v46  ;;  %7362 = vmatpush3.msk.msra.mxu1 %vm9994_vm2, %v875_v45  ;;  %7131 = vmatprep.subr.msk.mxu0 %vm9994_vm2, %v8037_v46 }
  0xc0   : > { %7366 = vmatprep.subr.mxu1 %v9972_v0  ;;  %7364 = vmatmul.mubr.msk.f32.vlgmr.msra.gmra.mxu1 %vm9969_vm4, %v352_v40 }
  0xc1   : > { %v1194_v47 = vpop.permute.xlu1 %1193  ;;  %v1027_v48 = vpop.permute.xlu0 %1026  ;;  %7368 = vmatprep.mubr.msk.f32.mxu1 %vm9970_vm0, %v9972_v0 }
  0xc2   : > { %v8050_v50 = vsel %vm9976_vm5, %v1027_v48, %v1029_v38  ;;  %v357_v48 = vld [vmem:[%s9964_s4 + $0x14] sm:$0xf] }
  0xc3   : > { %10046 = vst [vmem:[#allocation14_spill] sm:$0xff] %v8050_v50  ;;  %7132 = vmatpush1.msk.msra.mxu0 %vm9994_vm2, %v8050_v50  ;;  %v8497_v50 = vld [vmem:[#allocation2 + $0xb8] sm:$0xff] }
  0xc4   : > { %7133 = vmatmul.mubr.msk.f32.vlgmr.msra.gmra.mxu0 %vm9969_vm4, %v345_v49 }
  0xc5   : > { %v1033_v51 = vpop.permute.xlu1 %1032  ;;  %v1196_v52 = vpop.permute.xlu0 %1195  ;;  %1275 = vmatprep.mubr.f32.mxu0 %v9972_v0 }
  0xc6   : > { %v8057_v53 = vsel %vm9976_vm5, %v1031_v44, %v1033_v51  ;;  %v1200_v54 = vsel %vm9976_vm5, %v1194_v47, %v1196_v52 }
  0xc7   : > { %10047 = vst [vmem:[#allocation15_spill] sm:$0xff] %v8057_v53  ;;  %7367 = vmatpush3.msk.msra.mxu1 %vm9994_vm2, %v8057_v53  ;;  %7136 = vmatprep.subr.msk.mxu0 %vm9994_vm2, %v1200_v54 }
  0xc8   : > { %7371 = vmatprep.subr.mxu1 %v9972_v0  ;;  %7369 = vmatmul.mubr.msk.f32.vlgmr.msra.gmra.mxu1 %vm9969_vm4, %v345_v49 }
  0xc9   : > { %v1358_v55 = vpop.permute.xlu1 %1357  ;;  %v1192_v56 = vpop.permute.xlu0 %1191  ;;  %7373 = vmatprep.mubr.msk.f32.mxu1 %vm9970_vm0, %v9972_v0 }
  0xca   : > { %v1199_v58 = vsel %vm9976_vm5, %v1192_v56, %v1194_v47 }
  0xcb   : > { %7137 = vmatpush1.msk.msra.mxu0 %vm9994_vm2, %v1199_v58  ;;  %v349_v58 = vld [vmem:[%s9962_s2 + $0x18] sm:$0xf] }
  0xcc   : > { %7138 = vmatmul.mubr.msk.f32.vlgmr.msra.gmra.mxu0 %vm9969_vm4, %v354_v57 }
  0xcd   : > { %v1198_v59 = vpop.permute.xlu1 %1197  ;;  %v1360_v60 = vpop.permute.xlu0 %1359  ;;  %1440 = vmatprep.mubr.f32.mxu0 %v9972_v0 }
  0xce   : > { %v1201_v61 = vsel %vm9976_vm5, %v1196_v52, %v1198_v59  ;;  %v1365_v62 = vsel %vm1363_vm6, %v1358_v55, %v1360_v60 }
  0xcf   : > { %7372 = vmatpush3.msk.msra.mxu1 %vm9994_vm2, %v1201_v61  ;;  %7141 = vmatprep.subr.msk.mxu0 %vm9994_vm2, %v1365_v62 }
  0xd0   : > { %7376 = vmatprep.subr.mxu1 %v9972_v0  ;;  %7374 = vmatmul.mubr.msk.f32.vlgmr.msra.gmra.mxu1 %vm9969_vm4, %v354_v57 }
  0xd1   : > { %v1523_v63 = vpop.permute.xlu1 %1522  ;;  %v1356_v1 = vpop.permute.xlu0 %1355  ;;  %7378 = vmatprep.mubr.msk.f32.mxu1 %vm9970_vm0, %v9972_v0 }
  0xd2   : > { %v1364_v5 = vsel %vm1363_vm6, %v1356_v1, %v1358_v55 }
  0xd3   : > { %7142 = vmatpush1.msk.msra.mxu0 %vm9994_vm2, %v1364_v5  ;;  %v358_v5 = vld [vmem:[%s9964_s4 + $0x18] sm:$0xf] }
  0xd4   : > { %7143 = vmatmul.mubr.msk.f32.vlgmr.msra.gmra.mxu0 %vm9969_vm4, %v346_v2 }
  0xd5   : > { %v1362_v6 = vpop.permute.xlu1 %1361  ;;  %v1525_v7 = vpop.permute.xlu0 %1524  ;;  %1604 = vmatprep.mubr.f32.mxu0 %v9972_v0 }
  0xd6   : > { %v1366_v8 = vsel %vm1363_vm6, %v1360_v60, %v1362_v6  ;;  %v1529_v9 = vsel %vm1363_vm6, %v1523_v63, %v1525_v7 }
  0xd7   : > { %7377 = vmatpush3.msk.msra.mxu1 %vm9994_vm2, %v1366_v8  ;;  %7146 = vmatprep.subr.msk.mxu0 %vm9994_vm2, %v1529_v9 }
  0xd8   : > { %7381 = vmatprep.subr.mxu1 %v9972_v0  ;;  %7379 = vmatmul.mubr.msk.f32.vlgmr.msra.gmra.mxu1 %vm9969_vm4, %v346_v2 }
  0xd9   : > { %v1687_v10 = vpop.permute.xlu1 %1686  ;;  %v1521_v11 = vpop.permute.xlu0 %1520  ;;  %7383 = vmatprep.mubr.msk.f32.mxu1 %vm9970_vm0, %v9972_v0 }
  0xda   : > { %v1528_v13 = vsel %vm1363_vm6, %v1521_v11, %v1523_v63 }
  0xdb   : > { %7147 = vmatpush1.msk.msra.mxu0 %vm9994_vm2, %v1528_v13  ;;  %v350_v13 = vld [vmem:[%s9962_s2 + $0x1c] sm:$0xf] }
  0xdc   : > { %7148 = vmatmul.mubr.msk.f32.vlgmr.msra.gmra.mxu0 %vm9969_vm4, %v355_v12 }
  0xdd   : > { %v1527_v14 = vpop.permute.xlu1 %1526  ;;  %v1689_v15 = vpop.permute.xlu0 %1688  ;;  %1769 = vmatprep.mubr.f32.mxu0 %v9972_v0 }
  0xde   : > { %v1530_v16 = vsel %vm1363_vm6, %v1525_v7, %v1527_v14  ;;  %v1694_v17 = vsel %vm1692_vm7, %v1687_v10, %v1689_v15 }
  0xdf   : > { %7382 = vmatpush3.msk.msra.mxu1 %vm9994_vm2, %v1530_v16  ;;  %7151 = vmatprep.subr.msk.mxu0 %vm9994_vm2, %v1694_v17 }
  0xe0   : > { %7386 = vmatprep.subr.mxu1 %v9972_v0  ;;  %7384 = vmatmul.mubr.msk.f32.vlgmr.msra.gmra.mxu1 %vm9969_vm4, %v355_v12 }
  0xe1   : > { %v1852_v18 = vpop.permute.xlu1 %1851  ;;  %v1685_v19 = vpop.permute.xlu0 %1684  ;;  %7388 = vmatprep.mubr.msk.f32.mxu1 %vm9970_vm0, %v9972_v0 }
  0xe2   : > { %v1693_v23 = vsel %vm1692_vm7, %v1685_v19, %v1687_v10 }
  0xe3   : > { %7152 = vmatpush1.msk.msra.mxu0 %vm9994_vm2, %v1693_v23  ;;  %v359_v23 = vld [vmem:[%s9964_s4 + $0x1c] sm:$0xf] }
  0xe4   : > { %7153 = vmatmul.mubr.msk.f32.vlgmr.msra.gmra.mxu0 %vm9969_vm4, %v347_v21 }
  0xe5   : > { %v1691_v24 = vpop.permute.xlu1 %1690  ;;  %v1854_v25 = vpop.permute.xlu0 %1853  ;;  %1933 = vmatprep.mubr.f32.mxu0 %v9972_v0 }
  0xe6   : > { %v1695_v27 = vsel %vm1692_vm7, %v1689_v15, %v1691_v24  ;;  %v1858_v28 = vsel %vm1692_vm7, %v1852_v18, %v1854_v25 }
  0xe7   : > { %7387 = vmatpush3.msk.msra.mxu1 %vm9994_vm2, %v1695_v27  ;;  %7156 = vmatprep.subr.msk.mxu0 %vm9994_vm2, %v1858_v28 }
  0xe8   : > { %7391 = vmatprep.subr.mxu1 %v9972_v0  ;;  %7389 = vmatmul.mubr.msk.f32.vlgmr.msra.gmra.mxu1 %vm9969_vm4, %v347_v21 }
  0xe9   : > { %v2016_v29 = vpop.permute.xlu1 %2015  ;;  %v1850_v30 = vpop.permute.xlu0 %1849  ;;  %7393 = vmatprep.mubr.msk.f32.mxu1 %vm9970_vm0, %v9972_v0 }
  0xea   : > { %v1857_v32 = vsel %vm1692_vm7, %v1850_v30, %v1852_v18 }
  0xeb   : > { %7157 = vmatpush1.msk.msra.mxu0 %vm9994_vm2, %v1857_v32  ;;  %v351_v32 = vld [vmem:[%s9962_s2 + $0x20] sm:$0xf] }
  0xec   : > { %7158 = vmatmul.mubr.msk.f32.vlgmr.msra.gmra.mxu0 %vm9969_vm4, %v356_v31 }
  0xed   : > { %v1856_v33 = vpop.permute.xlu1 %1855  ;;  %v2018_v34 = vpop.permute.xlu0 %2017  ;;  %2098 = vmatprep.mubr.f32.mxu0 %v9972_v0 }
  0xee   : > { %v1859_v35 = vsel %vm1692_vm7, %v1854_v25, %v1856_v33  ;;  %v2023_v36 = vsel %vm2021_vm8, %v2016_v29, %v2018_v34 }
  0xef   : > { %7392 = vmatpush3.msk.msra.mxu1 %vm9994_vm2, %v1859_v35  ;;  %7161 = vmatprep.subr.msk.mxu0 %vm9994_vm2, %v2023_v36 }
  0xf0   : > { %7394 = vmatmul.mubr.msk.f32.vlgmr.msra.gmra.mxu1 %vm9969_vm4, %v356_v31  ;;  %7396 = vmatprep.subr.mxu1 %v9972_v0 }
  0xf1   : > { %v2181_v37 = vpop.permute.xlu1 %2180  ;;  %v2014_v38 = vpop.permute.xlu0 %2013  ;;  %7398 = vmatprep.mubr.msk.f32.mxu1 %vm9970_vm0, %v9972_v0 }
  0xf2   : > { %v2022_v40 = vsel %vm2021_vm8, %v2014_v38, %v2016_v29 }
  0xf3   : > { %7162 = vmatpush1.msk.msra.mxu0 %vm9994_vm2, %v2022_v40 }
  0xf4   : > { %7163 = vmatmul.mubr.msk.f32.vlgmr.msra.gmra.mxu0 %vm9969_vm4, %v348_v39 }
  0xf5   : > { %v2020_v41 = vpop.permute.xlu1 %2019  ;;  %v2183_v42 = vpop.permute.xlu0 %2182  ;;  %2262 = vmatprep.mubr.f32.mxu0 %v9972_v0 }
  0xf6   : > { %v2024_v43 = vsel %vm2021_vm8, %v2018_v34, %v2020_v41  ;;  %v2187_v44 = vsel %vm2021_vm8, %v2181_v37, %v2183_v42 }
  0xf7   : > { %7397 = vmatpush3.msk.msra.mxu1 %vm9994_vm2, %v2024_v43  ;;  %7166 = vmatprep.subr.msk.mxu0 %vm9994_vm2, %v2187_v44 }
  0xf8   : > { %7399 = vmatmul.mubr.msk.f32.vlgmr.msra.gmra.mxu1 %vm9969_vm4, %v348_v39  ;;  %7401 = vmatprep.subr.mxu1 %v9972_v0  ;;  %v360_v39 = vld [vmem:[%s9964_s4 + $0x20] sm:$0xf] }
  0xf9   : > { %v2345_v45 = vpop.permute.xlu1 %2344  ;;  %v2179_v47 = vpop.permute.xlu0 %2178  ;;  %7403 = vmatprep.mubr.msk.f32.mxu1 %vm9970_vm0, %v9972_v0 }
  0xfa   : > { %v2186_v49 = vsel %vm2021_vm8, %v2179_v47, %v2181_v37 }
  0xfb   : > { %7167 = vmatpush1.msk.msra.mxu0 %vm9994_vm2, %v2186_v49 }
  0xfc   : > { %7168 = vmatmul.mubr.msk.f32.vlgmr.msra.gmra.mxu0 %vm9969_vm4, %v357_v48 }
  0xfd   : > { %v2185_v51 = vpop.permute.xlu1 %2184  ;;  %v2347_v52 = vpop.permute.xlu0 %2346  ;;  %2427 = vmatprep.mubr.f32.mxu0 %v9972_v0 }
  0xfe   : > { %v2188_v54 = vsel %vm2021_vm8, %v2183_v42, %v2185_v51  ;;  %v8166_v55 = vsel %vm2350_vm9, %v2345_v45, %v2347_v52 }
  0xff   : > { %10048 = vst [vmem:[#allocation16_spill] sm:$0xff] %v8166_v55  ;;  %7402 = vmatpush3.msk.msra.mxu1 %vm9994_vm2, %v2188_v54  ;;  %7171 = vmatprep.subr.msk.mxu0 %vm9994_vm2, %v8166_v55 }
 0x100   : > { %7404 = vmatmul.mubr.msk.f32.vlgmr.msra.gmra.mxu1 %vm9969_vm4, %v357_v48  ;;  %7406 = vmatprep.subr.mxu1 %v9972_v0 }
 0x101   : > { %v2510_v56 = vpop.permute.xlu1 %2509  ;;  %v2343_v57 = vpop.permute.xlu0 %2342  ;;  %7408 = vmatprep.mubr.msk.f32.mxu1 %vm9970_vm0, %v9972_v0 }
 0x102   : > { %v8179_v59 = vsel %vm2350_vm9, %v2343_v57, %v2345_v45 }
 0x103   : > { %10049 = vst [vmem:[#allocation17_spill] sm:$0xff] %v8179_v59  ;;  %7172 = vmatpush1.msk.msra.mxu0 %vm9994_vm2, %v8179_v59 }
 0x104   : > { %7173 = vmatmul.mubr.msk.f32.vlgmr.msra.gmra.mxu0 %vm9969_vm4, %v349_v58 }
 0x105   : > { %v2349_v60 = vpop.permute.xlu1 %2348  ;;  %v2512_v61 = vpop.permute.xlu0 %2511  ;;  %2591 = vmatprep.mubr.f32.mxu0 %v9972_v0 }
 0x106   : > { %v8186_v62 = vsel %vm2350_vm9, %v2347_v52, %v2349_v60  ;;  %v2516_v63 = vsel %vm2350_vm9, %v2510_v56, %v2512_v61 }
 0x107   : > { %10050 = vst [vmem:[#allocation18_spill] sm:$0xff] %v8186_v62  ;;  %7407 = vmatpush3.msk.msra.mxu1 %vm9994_vm2, %v8186_v62  ;;  %7176 = vmatprep.subr.msk.mxu0 %vm9994_vm2, %v2516_v63 }
 0x108   : > { %7409 = vmatmul.mubr.msk.f32.vlgmr.msra.gmra.mxu1 %vm9969_vm4, %v349_v58  ;;  %7411 = vmatprep.subr.mxu1 %v9972_v0 }
 0x109   : > { %v2674_v1 = vpop.permute.xlu1 %2673  ;;  %v2508_v2 = vpop.permute.xlu0 %2507  ;;  %7413 = vmatprep.mubr.msk.f32.mxu1 %vm9970_vm0, %v9972_v0 }
 0x10a   : > { %v2515_v6 = vsel %vm2350_vm9, %v2508_v2, %v2510_v56 }
 0x10b   : > { %7177 = vmatpush1.msk.msra.mxu0 %vm9994_vm2, %v2515_v6 }
 0x10c   : > { %7178 = vmatmul.mubr.msk.f32.vlgmr.msra.gmra.mxu0 %vm9969_vm4, %v358_v5 }
 0x10d   : > { %v2514_v7 = vpop.permute.xlu1 %2513  ;;  %v2676_v8 = vpop.permute.xlu0 %2675  ;;  %2756 = vmatprep.mubr.f32.mxu0 %v9972_v0 }
 0x10e   : > { %v2517_v9 = vsel %vm2350_vm9, %v2512_v61, %v2514_v7  ;;  %v2681_v10 = vsel %vm2679_vm10, %v2674_v1, %v2676_v8 }
 0x10f   : > { %7412 = vmatpush3.msk.msra.mxu1 %vm9994_vm2, %v2517_v9  ;;  %7181 = vmatprep.subr.msk.mxu0 %vm9994_vm2, %v2681_v10 }
 0x110   : > { %7414 = vmatmul.mubr.msk.f32.vlgmr.msra.gmra.mxu1 %vm9969_vm4, %v358_v5  ;;  %7416 = vmatprep.subr.mxu1 %v9972_v0 }
 0x111   : > { %v2839_v11 = vpop.permute.xlu1 %2838  ;;  %v2672_v12 = vpop.permute.xlu0 %2671  ;;  %7418 = vmatprep.mubr.msk.f32.mxu1 %vm9970_vm0, %v9972_v0 }
 0x112   : > { %v2680_v14 = vsel %vm2679_vm10, %v2672_v12, %v2674_v1 }
 0x113   : > { %7182 = vmatpush1.msk.msra.mxu0 %vm9994_vm2, %v2680_v14 }
 0x114   : > { %7183 = vmatmul.mubr.msk.f32.vlgmr.msra.gmra.mxu0 %vm9969_vm4, %v350_v13 }
 0x115   : > { %v2678_v15 = vpop.permute.xlu1 %2677  ;;  %v2841_v16 = vpop.permute.xlu0 %2840  ;;  %2920 = vmatprep.mubr.f32.mxu0 %v9972_v0 }
 0x116   : > { %v2682_v17 = vsel %vm2679_vm10, %v2676_v8, %v2678_v15  ;;  %v2845_v18 = vsel %vm2679_vm10, %v2839_v11, %v2841_v16 }
 0x117   : > { %7417 = vmatpush3.msk.msra.mxu1 %vm9994_vm2, %v2682_v17  ;;  %7186 = vmatprep.subr.msk.mxu0 %vm9994_vm2, %v2845_v18 }
 0x118   : > { %7419 = vmatmul.mubr.msk.f32.vlgmr.msra.gmra.mxu1 %vm9969_vm4, %v350_v13  ;;  %7421 = vmatprep.subr.mxu1 %v9972_v0 }
 0x119   : > { %v3003_v19 = vpop.permute.xlu1 %3002  ;;  %7423 = vmatprep.mubr.msk.f32.mxu1 %vm9970_vm0, %v9972_v0 }
 0x11a   : > { %v2837_v21 = vpop.permute.xlu0 %2836 }
 0x11b   : > { %v2844_v24 = vsel %vm2679_vm10, %v2837_v21, %v2839_v11 }
 0x11c   : > { %7187 = vmatpush1.msk.msra.mxu0 %vm9994_vm2, %v2844_v24 }
 0x11d   : > { %7188 = vmatmul.mubr.msk.f32.vlgmr.msra.gmra.mxu0 %vm9969_vm4, %v359_v23  ;;  %v2843_v25 = vpop.permute.xlu1 %2842 }
 0x11e   : > { %v2846_v27 = vsel %vm2679_vm10, %v2841_v16, %v2843_v25  ;;  %v3005_v28 = vpop.permute.xlu0 %3004  ;;  %3085 = vmatprep.mubr.f32.mxu0 %v9972_v0 }
 0x11f   : > { %7422 = vmatpush3.msk.msra.mxu1 %vm9994_vm2, %v2846_v27  ;;  %v8236_v29 = vsel %vm3008_vm11, %v3003_v19, %v3005_v28 }
 0x120   : > { %10051 = vst [vmem:[#allocation19_spill] sm:$0xff] %v8236_v29  ;;  %7191 = vmatprep.subr.msk.mxu0 %vm9994_vm2, %v8236_v29  ;;  %7424 = vmatmul.mubr.msk.f32.vlgmr.msra.gmra.mxu1 %vm9969_vm4, %v359_v23 }
 0x121   : > { %v3168_v30 = vpop.permute.xlu1 %3167  ;;  %7426 = vmatprep.subr.mxu1 %v9972_v0  ;;  %7428 = vmatprep.mubr.msk.f32.mxu1 %vm9970_vm0, %v9972_v0 }
 0x122   : > { %v3001_v31 = vpop.permute.xlu0 %3000 }
 0x123   : > { %v8248_v33 = vsel %vm3008_vm11, %v3001_v31, %v3003_v19 }
 0x124   : > { %10052 = vst [vmem:[#allocation20_spill] sm:$0xff] %v8248_v33  ;;  %7192 = vmatpush1.msk.msra.mxu0 %vm9994_vm2, %v8248_v33  ;;  %v8438_v33 = vld [vmem:[#allocation2 + $0x88] sm:$0xff] }
 0x125   : > { %7193 = vmatmul.mubr.msk.f32.vlgmr.msra.gmra.mxu0 %vm9969_vm4, %v351_v32  ;;  %v3007_v34 = vpop.permute.xlu1 %3006 }
 0x126   : > { %v8254_v35 = vsel %vm3008_vm11, %v3005_v28, %v3007_v34  ;;  %v3170_v36 = vpop.permute.xlu0 %3169  ;;  %3249 = vmatprep.mubr.f32.mxu0 %v9972_v0 }
 0x127   : > { %10053 = vst [vmem:[#allocation21_spill] sm:$0xff] %v8254_v35  ;;  %7427 = vmatpush3.msk.msra.mxu1 %vm9994_vm2, %v8254_v35  ;;  %v3174_v37 = vsel %vm3008_vm11, %v3168_v30, %v3170_v36 }
 0x128   : > { %7196 = vmatprep.subr.msk.mxu0 %vm9994_vm2, %v3174_v37  ;;  %7429 = vmatmul.mubr.msk.f32.vlgmr.msra.gmra.mxu1 %vm9969_vm4, %v351_v32 }
 0x129   : > { %v3172_v38 = vpop.permute.xlu1 %3171  ;;  %7431 = vmatprep.subr.mxu1 %v9972_v0  ;;  %7433 = vmatprep.mubr.msk.f32.mxu1 %vm9970_vm0, %v9972_v0 }
 0x12a   : > { %v3175_v40 = vsel %vm3008_vm11, %v3170_v36, %v3172_v38  ;;  %v3166_v41 = vpop.permute.xlu0 %3165 }
 0x12b   : > { %v3173_v42 = vsel %vm3008_vm11, %v3166_v41, %v3168_v30  ;;  %7432 = vmatpush3.msk.msra.mxu1 %vm9994_vm2, %v3175_v40 }
 0x12c   : > { %7197 = vmatpush1.msk.msra.mxu0 %vm9994_vm2, %v3173_v42  ;;  %7434 = vmatmul.mubr.msk.f32.vlgmr.msra.gmra.mxu1 %vm9969_vm4, %v360_v39 }
 0x12d   : > { %7198 = vmatmul.mubr.msk.f32.vlgmr.msra.gmra.mxu0 %vm9969_vm4, %v360_v39  ;;  %7436 = vmatprep.subr.mxu0 %v9972_v0 }
 0x12e   : > { %7438 = vmatprep.mubr.msk.f32.mxu0 %vm9970_vm0, %v9972_v0  ;;  %7441 = vmatprep.subr.mxu1 %v9972_v0 }
 0x12f   : > { %7443 = vmatprep.mubr.msk.f32.mxu1 %vm9970_vm0, %v9972_v0 }
 0x16a   : > { %v8280_v43 = vpop.f32.mrf.mxu0 }
 0x16c   : > { %v8282_v44 = vpop.f32.mrf.mxu0  ;;  %v534_v45 = vpop.f32.mrf.mxu1 }
 0x16e   : > { %v8284_v47 = vpop.f32.mrf.mxu0  ;;  %v7350_v48 = vpop.f32.mrf.mxu1 }
 0x170   : > { %v8286_v49 = vpop.f32.mrf.mxu0 }
 0x171   : > { %v696_v51 = vpop.f32.mrf.mxu1 }
 0x172   : > { %v697_v52 = vadd.f32 %v696_v51, %v534_v45 }
 0x173   : > { %v7355_v54 = vpop.f32.mrf.mxu1 }
 0x174   : > { %v790_v56 = vpop.f32.mrf.mxu0 }
 0x176   : > { %v792_v57 = vpop.f32.mrf.mxu0 }
 0x179   : > { %v861_v58 = vpop.f32.mrf.mxu1 }
 0x17b   : > { %v7360_v60 = vpop.f32.mrf.mxu1 }
 0x17c   : > { %v951_v61 = vpop.f32.mrf.mxu0 }
 0x17d   : > { %v952_v63 = vadd.f32 %v951_v61, %v790_v56 }
 0x17e   : > { %v953_v1 = vpop.f32.mrf.mxu0 }
 0x17f   : > { %v954_v2 = vadd.f32 %v953_v1, %v792_v57 }
 0x180   : > { %v1022_v5 = vpop.f32.mrf.mxu1 }
 0x181   : > { %v1023_v6 = vadd.f32 %v1022_v5, %v861_v58 }
 0x182   : > { %v7365_v7 = vpop.f32.mrf.mxu1 }
 0x184   : > { %v1113_v8 = vpop.f32.mrf.mxu0 }
 0x186   : > { %v1115_v9 = vpop.f32.mrf.mxu0 }
 0x188   : > { %v1184_v10 = vpop.f32.mrf.mxu1 }
 0x189   : > { %v1190_v11 = vadd.f32 %v1184_v10, %v697_v52 }
 0x18a   : > { %v7370_v12 = vpop.f32.mrf.mxu1 }
 0x18c   : > { %v1277_v13 = vpop.f32.mrf.mxu0 }
 0x18d   : > { %v1352_v14 = vadd.f32 %v1277_v13, %v952_v63 }
 0x18e   : > { %v1279_v15 = vpop.f32.mrf.mxu0 }
 0x18f   : > { %v1353_v16 = vadd.f32 %v1279_v15, %v954_v2 }
 0x190   : > { %v1348_v17 = vpop.f32.mrf.mxu1 }
 0x191   : > { %v1354_v18 = vadd.f32 %v1348_v17, %v1023_v6 }
 0x192   : > { %v7375_v19 = vpop.f32.mrf.mxu1 }
 0x194   : > { %v1442_v21 = vpop.f32.mrf.mxu0 }
 0x196   : > { %v1444_v23 = vpop.f32.mrf.mxu0 }
 0x198   : > { %v1513_v24 = vpop.f32.mrf.mxu1 }
 0x199   : > { %v1519_v25 = vadd.f32 %v1513_v24, %v1190_v11 }
 0x19a   : > { %v7380_v27 = vpop.f32.mrf.mxu1 }
 0x19b   : > { %v626_v27 = vadd.f32 %v8284_v47, %v8280_v43 }
 0x19c   : > { %v1606_v28 = vpop.f32.mrf.mxu0 }
 0x19d   : > { %v1681_v30 = vadd.f32 %v1606_v28, %v1352_v14 }
 0x19e   : > { %v1608_v31 = vpop.f32.mrf.mxu0 }
 0x19f   : > { %v1682_v32 = vadd.f32 %v1608_v31, %v1353_v16  ;;  %v1188_v31 = vadd.f32 %v1113_v8, %v626_v27  ;;  %v3342_v27 = vpop.permute.xlu0 %3341 }
 0x1a0   : > { %v1677_v34 = vpop.f32.mrf.mxu1 }
 0x1a1   : > { %v1683_v36 = vadd.f32 %v1677_v34, %v1354_v18 }
 0x1a2   : > { %v7385_v37 = vpop.f32.mrf.mxu1 }
 0x1a3   : > { %v1517_v37 = vadd.f32 %v1442_v21, %v1188_v31 }
 0x1a4   : > { %v1771_v38 = vpop.f32.mrf.mxu0 }
 0x1a6   : > { %v1773_v40 = vpop.f32.mrf.mxu0 }
 0x1a8   : > { %v1842_v39 = vpop.f32.mrf.mxu1 }
 0x1a9   : > { %v1848_v47 = vadd.f32 %v1842_v39, %v1519_v25  ;;  %v3333_v25 = vpop.permute.xlu1 %3332 }
 0x1aa   : > { %v7390_v41 = vpop.f32.mrf.mxu1 }
 0x1ac   : > { %v1935_v42 = vpop.f32.mrf.mxu0 }
 0x1ad   : > { %v2010_v45 = vadd.f32 %v1935_v42, %v1681_v30  ;;  %v628_v30 = vadd.f32 %v8286_v49, %v8282_v44  ;;  %v9974_v49 = vlaneseq }
 0x1ae   : > { %v1937_v48 = vpop.f32.mrf.mxu0 }
 0x1af   : > { %v2011_v51 = vadd.f32 %v1937_v48, %v1682_v32  ;;  %v1189_v34 = vadd.f32 %v1115_v9, %v628_v30 }
 0x1b0   : > { %v2006_v52 = vpop.f32.mrf.mxu1 }
 0x1b1   : > { %v2012_v54 = vadd.f32 %v2006_v52, %v1683_v36 }
 0x1b2   : > { %v7395_v56 = vpop.f32.mrf.mxu1 }
 0x1b4   : > { %v2100_v57 = vpop.f32.mrf.mxu0 }
 0x1b6   : > { %v2102_v60 = vpop.f32.mrf.mxu0 }
 0x1b8   : > { %v2171_v58 = vpop.f32.mrf.mxu1 }
 0x1b9   : > { %v2177_v21 = vadd.f32 %v2171_v58, %v1848_v47 }
 0x1ba   : > { %v7400_v61 = vpop.f32.mrf.mxu1 }
 0x1bc   : > { %v2264_v63 = vpop.f32.mrf.mxu0 }
 0x1bd   : > { %v2339_v1 = vadd.f32 %v2264_v63, %v2010_v45  ;;  %v1518_v45 = vadd.f32 %v1444_v23, %v1189_v34 }
 0x1be   : > { %v2266_v2 = vpop.f32.mrf.mxu0 }
 0x1bf   : > { %v2340_v5 = vadd.f32 %v2266_v2, %v2011_v51  ;;  %v1846_v51 = vadd.f32 %v1771_v38, %v1517_v37  ;;  %v1847_v56 = vadd.f32 %v1773_v40, %v1518_v45  ;;  %v7721_v2 = vmov 1966171168   ;;  %v8304_v37 = vld [vmem:[#allocation2 + $0x28] sm:$0xff] }
 0x1c0   : > { %v2335_v6 = vpop.f32.mrf.mxu1  ;;  %v3418_v44 = vunpack.c.l.s4 %v7721_v2  ;;  %v8320_v2 = vld [vmem:[#allocation2 + $0x10] sm:$0xff]  ;;  %vm9983_vm14 = vcmp.gt.f32.partialorder %v8304_v37, 0.5 }
 0x1c1   : > { %v2341_v7 = vadd.f32 %v2335_v6, %v2012_v54  ;;  %v2175_v61 = vadd.f32 %v2100_v57, %v1846_v51  ;;  %v2176_v8 = vadd.f32 %v2102_v60, %v1847_v56  ;;  %v8315_v56 = vld [vmem:[#allocation2] sm:$0xff]  ;;  %vm9982_vm3 = vcmp.gt.f32.partialorder %v8320_v2, 0.5 }
 0x1c2   : > { %v7405_v10 = vpop.f32.mrf.mxu1  ;;  %v3419_v38 = vunpack.c.0.s8 %v3418_v44  ;;  %v8322_v44 = vld [vmem:[#allocation2 + $0x30] sm:$0xff]  ;;  %vm9979_vm15 = vcmp.gt.f32.partialorder %v8315_v56, 0.5 }
 0x1c3   : > { %vm9984_vm6 = vcmp.gt.f32.partialorder %v8322_v44, 0.5 }
 0x1c4   : > { %v2429_v11 = vpop.f32.mrf.mxu0 }
 0x1c5   : > { %v2504_v9 = vadd.f32 %v2429_v11, %v2175_v61  ;;  %v8317_v61 = vld [vmem:[#allocation2 + $0x8] sm:$0xff] }
 0x1c6   : > { %v2431_v13 = vpop.f32.mrf.mxu0  ;;  %vm9978_vm1 = vcmp.gt.f32.partialorder %v8317_v61, 0.5 }
 0x1c7   : > { %v2505_v6 = vadd.f32 %v2431_v13, %v2176_v8  ;;  %v8324_v8 = vld [vmem:[#allocation2 + $0x38] sm:$0xff] }
 0x1c8   : > { %v2500_v12 = vpop.f32.mrf.mxu1  ;;  %vm9996_vm7 = vcmp.gt.f32.partialorder %v8324_v8, 0.5 }
 0x1c9   : > { %v2506_v23 = vadd.f32 %v2500_v12, %v2177_v21 }
 0x1ca   : > { %v7410_v14 = vpop.f32.mrf.mxu1 }
 0x1cb   : > { %v8293_v14 = vshrl.u32 %v9974_v49, 7 }
 0x1cc   : > { %v2593_v15 = vpop.f32.mrf.mxu0 }
 0x1cd   : > { %v2668_v16 = vadd.f32 %v2593_v15, %v2339_v1  ;;  %10054 = vst [vmem:[#allocation22_spill] sm:$0xff] %v8293_v14  ;;  %v8296_v60 = vsub.s32 %v3419_v38, %v8293_v14  ;;  %v8310_v45 = vsub.s32 1, %v8293_v14  ;;  %v8344_v38 = vld [vmem:[#allocation2 + $0x40] sm:$0xff] }
 0x1ce   : > { %v2595_v17 = vpop.f32.mrf.mxu0  ;;  %vm10001_vm8 = vcmp.gt.f32.partialorder %v8344_v38, 0.5 }
 0x1cf   : > { %v2669_v18 = vadd.f32 %v2595_v17, %v2340_v5 }
 0x1d0   : > { %v2664_v19 = vpop.f32.mrf.mxu1 }
 0x1d1   : > { %v2670_v24 = vadd.f32 %v2664_v19, %v2341_v7 }
 0x1d2   : > { %v7415_v28 = vpop.f32.mrf.mxu1 }
 0x1d4   : > { %v2758_v32 = vpop.f32.mrf.mxu0 }
 0x1d5   : > { %v2833_v7 = vadd.f32 %v2758_v32, %v2504_v9  ;;  %v8299_v32 = vld [vmem:[#allocation2 + $0x18] sm:$0xff] }
 0x1d6   : > { %v2760_v42 = vpop.f32.mrf.mxu0  ;;  %vm9993_vm12 = vcmp.gt.f32.partialorder %v8299_v32, 0.5 }
 0x1d7   : > { %v2834_v40 = vadd.f32 %v2760_v42, %v2505_v6  ;;  %v8307_v42 = vsub.s32 0, %v8293_v14 }
 0x1d8   : > { %v2829_v36 = vpop.f32.mrf.mxu1 }
 0x1d9   : > { %v2835_v15 = vadd.f32 %v2829_v36, %v2506_v23  ;;  %v8302_v36 = vld [vmem:[#allocation2 + $0x20] sm:$0xff] }
 0x1da   : > { %v7420_v41 = vpop.f32.mrf.mxu1  ;;  %vm9988_vm13 = vcmp.gt.f32.partialorder %v8302_v36, 0.5 }
 0x1dd   : > { %v2922_v48 = vpop.f32.mrf.mxu0 }
 0x1de   : > { %v2997_v52 = vadd.f32 %v2922_v48, %v2668_v16  ;;  %v8313_v48 = vsub.s32 2, %v8293_v14 }
 0x1df   : > { %v2924_v54 = vpop.f32.mrf.mxu0 }
 0x1e0   : > { %v2998_v63 = vadd.f32 %v2924_v54, %v2669_v18  ;;  %v2993_v43 = vpop.f32.mrf.mxu1 }
 0x1e1   : > { %v2999_v1 = vadd.f32 %v2993_v43, %v2670_v24 }
 0x1e2   : > { %v7425_v5 = vpop.f32.mrf.mxu1 }
 0x1e5   : > { %v3087_v10 = vpop.f32.mrf.mxu0 }
 0x1e6   : > { %v3162_v57 = vadd.f32 %v3087_v10, %v2833_v7 }
 0x1e7   : > { %v3089_v39 = vpop.f32.mrf.mxu0 }
 0x1e8   : > { %v3163_v16 = vadd.f32 %v3089_v39, %v2834_v40  ;;  %v3158_v17 = vpop.f32.mrf.mxu1  ;;  %v3335_v58 = vadd.f32 %v3333_v25, %v3162_v57  ;;  %v8355_v39 = vld [vmem:[#allocation2 + $0x48] sm:$0xff] }
 0x1e9   : > { %v3164_v11 = vadd.f32 %v3158_v17, %v2835_v15  ;;  %vm10005_vm9 = vcmp.gt.f32.partialorder %v8355_v39, 0.5 }
 0x1ea   : > { %v3336_v13 = vadd.f32 %v3333_v25, %v3163_v16  ;;  %v7430_v18 = vpop.f32.mrf.mxu1  ;;  %v8357_v16 = vld [vmem:[#allocation2 + $0x50] sm:$0xff] }
 0x1eb   : > { %v3337_v12 = vadd.f32 %v3333_v25, %v3164_v11  ;;  %vm10012_vm10 = vcmp.gt.f32.partialorder %v8357_v16, 0.5 }
 0x1ec   : > { %v3416_v19 = vcombine.low %v3335_v58, %v3336_v13  ;;  %v3322_v24 = vpop.f32.mrf.mxu1 }
 0x1ed   : > { %v3430_v28 = vrot.slane %v3337_v12, %v8296_v60  ;;  %v3251_v30 = vpop.f32.mrf.mxu0  ;;  %v3328_v31 = vadd.f32 %v3322_v24, %v2999_v1 }
 0x1ee   : > { %v3423_v34 = vrot.slane %v3416_v19, %v8296_v60  ;;  %v7435_v41 = vpop.f32.mrf.mxu1  ;;  %v3326_v9 = vadd.f32 %v3251_v30, %v2997_v52  ;;  %v8385_v30 = vld [vmem:[#allocation2 + $0x68] sm:$0xff] }
 0x1ef   : > { %v3253_v51 = vpop.f32.mrf.mxu0  ;;  %v3346_v54 = vadd.f32 %v3342_v27, %v3328_v31  ;;  %vm10015_vm0 = vcmp.gt.f32.partialorder %v8385_v30, 0.5 }
 0x1f0   : > { %v3431_v43 = vcombine.low %v3423_v34, %v3430_v28  ;;  %v3432_v47 = vcombine.high %v3423_v34, %v3430_v28  ;;  %v3327_v1 = vadd.f32 %v3253_v51, %v2998_v63  ;;  %v3344_v25 = vadd.f32 %v3342_v27, %v3326_v9  ;;  %v8383_v28 = vld [vmem:[#allocation2 + $0x60] sm:$0xff]  ;;  %v8405_v9 = vld [vmem:[#allocation2 + $0x70] sm:$0xff] }
 0x1f1   : > { %v8327_v5 = vrot.slane %v3346_v54, %v8296_v60  ;;  %vm10017_vm4 = vcmp.gt.f32.partialorder %v8383_v28, 0.5  ;;  %vm10016_vm5 = vcmp.gt.f32.partialorder %v8405_v9, 0.5 }
 0x1f2   : > { %v3439_v21 = vrot.slane %v3431_v43, %v8296_v60  ;;  %v3446_v63 = vrot.slane %v3432_v47, %v8296_v60  ;;  %v3345_v6 = vadd.f32 %v3342_v27, %v3327_v1  ;;  %v8381_v27 = vld [vmem:[#allocation2 + $0x58] sm:$0xff] }
 0x1f3   : > { %vm10011_vm11 = vcmp.gt.f32.partialorder %v8381_v27, 0.5 }
 0x1f4   : > { %v3447_v52 = vcombine.high %v3439_v21, %v3439_v21  ;;  %v3448_v7 = vcombine.high %v3446_v63, %v3446_v63  ;;  %v8339_v23 = vrot.slane %v3439_v21, %v8307_v42  ;;  %v8342_v10 = vrot.slane %v3439_v21, %v8310_v45 }
 0x1f5   : > { %v8347_v40 = vrot.slane %v3439_v21, %v8313_v48  ;;  %v8350_v57 = vrot.slane %v3446_v63, %v8307_v42  ;;  %v8353_v15 = vrot.slane %v3446_v63, %v8310_v45  ;;  %v8360_v17 = vrot.slane %v3446_v63, %v8313_v48 }
 0x1f6   : > { %v8363_v11 = vrot.slane %v3447_v52, %v8307_v42  ;;  %v8366_v58 = vrot.slane %v3447_v52, %v8310_v45  ;;  %v8369_v13 = vrot.slane %v3447_v52, %v8313_v48  ;;  %v8372_v18 = vrot.slane %v3448_v7, %v8307_v42 }
 0x1f7   : > { %v8375_v12 = vrot.slane %v3448_v7, %v8310_v45  ;;  %v3898_v19 = vcombine.low %v3344_v25, %v3345_v6  ;;  %v3578_v24 = vsel %vm9993_vm12, %v8339_v23, -inf  ;;  %v8388_v31 = vrot.slane %v3448_v7, %v8313_v48  ;;  %v8422_v7 = vld [vmem:[#allocation2 + $0x78] sm:$0xff]  ;;  %v8424_v25 = vld [vmem:[#allocation2 + $0x80] sm:$0xff] }
 0x1f8   : > { %10055 = vst [vmem:[#allocation23_spill] sm:$0xff] %v8372_v18  ;;  %v3579_v34 = vsel %vm9988_vm13, %v8342_v10, -inf  ;;  %v3575_v41 = vsel %vm9979_vm15, %v8339_v23, -inf  ;;  %v3576_v51 = vsel %vm9978_vm1, %v8342_v10, -inf  ;;  %v3580_v43 = vsel %vm9983_vm14, %v8347_v40, -inf }
 0x1f9   : > { %10056 = vst [vmem:[#allocation24_spill] sm:$0xff] %v8375_v12  ;;  %10057 = vst [vmem:[#allocation25_spill] sm:$0xff] %v8388_v31  ;;  %v3905_v54 = vrot.slane %v3898_v19, %v8296_v60  ;;  %v3711_v47 = vmax.f32 %v3578_v24, %v3579_v34  ;;  %v3707_v1 = vmax.f32 %v3575_v41, %v3576_v51  ;;  %v3577_v21 = vsel %vm9982_vm3, %v8347_v40, -inf }
 0x1fa   : > { %v3611_v63 = vsel %vm9993_vm12, %v8350_v57, -inf  ;;  %v3612_v6 = vsel %vm9988_vm13, %v8353_v15, -inf  ;;  %v3608_v52 = vsel %vm9979_vm15, %v8350_v57, -inf  ;;  %v3613_v51 = vsel %vm9983_vm14, %v8360_v17, -inf }
 0x1fb   : > { %v3913_v19 = vcombine.low %v3905_v54, %v8327_v5  ;;  %v3914_v24 = vcombine.high %v3905_v54, %v8327_v5  ;;  %v3712_v34 = vmax.f32 %v3711_v47, %v3580_v43  ;;  %v3708_v41 = vmax.f32 %v3707_v1, %v3577_v21  ;;  %v8440_v5 = vld [vmem:[#allocation2 + $0x90] sm:$0xff]  ;;  %v8452_v21 = vld [vmem:[#allocation2 + $0x98] sm:$0xff] }
 0x1fc   : > { %v3758_v0 = vmax.f32 %v3611_v63, %v3612_v6  ;;  %v3609_v49 = vsel %vm9978_vm1, %v8353_v15, -inf  ;;  %v3614_v35 = vsel %vm9984_vm6, %v8350_v57, -inf  ;;  %v3610_v47 = vsel %vm9982_vm3, %v8360_v17, -inf }
 0x1fd   : > { %v3921_v54 = vrot.slane %v3913_v19, %v8296_v60  ;;  %v3928_v43 = vrot.slane %v3914_v24, %v8296_v60  ;;  %3713 = vmax.xlane.f32.xlu0 %v3712_v34  ;;  %3709 = vmax.xlane.f32.xlu1 %v3708_v41  ;;  %v3615_v1 = vsel %vm9996_vm7, %v8353_v15, -inf  ;;  %vm10018_vm1 = vcmp.gt.f32.partialorder %v8422_v7, 0.5  ;;  %v8457_v24 = vld [vmem:[#allocation2 + $0xa0] sm:$0xff] }
 0x1fe   : > { %vm3396_vm15 = vcmp.gt.f32.partialorder %v8424_v25, 0.5  ;;  %v3759_v63 = vmax.f32 %v3758_v0, %v3613_v51  ;;  %v3754_v6 = vmax.f32 %v3608_v52, %v3609_v49  ;;  %v3762_v19 = vmax.f32 %v3614_v35, %v3615_v1  ;;  %v8467_v0 = vld [vmem:[#allocation2 + $0xa8] sm:$0xff]  ;;  %v8469_v35 = vld [vmem:[#allocation2 + $0xb0] sm:$0xff] }
 0x1ff   : > { %v3581_v60 = vsel %vm9984_vm6, %v8339_v23, -inf  ;;  %v3929_v34 = vcombine.high %v3921_v54, %v3921_v54  ;;  %v3930_v41 = vcombine.high %v3928_v43, %v3928_v43  ;;  %v8460_v29 = vrot.slane %v3921_v54, %v8307_v42 }
 0x200   : > { %v8463_v62 = vrot.slane %v3921_v54, %v8310_v45  ;;  %vm10019_vm3 = vcmp.gt.f32.partialorder %v8438_v33, 0.5  ;;  %vm3398_vm14 = vcmp.gt.f32.partialorder %v8440_v5, 0.5  ;;  %v8472_v49 = vrot.slane %v3921_v54, %v8313_v48 }
 0x201   : > { %10058 = vst [vmem:[#allocation26_spill] sm:$0xff] %v8460_v29  ;;  %v8475_v52 = vrot.slane %v3928_v43, %v8307_v42  ;;  %v8478_v51 = vrot.slane %v3928_v43, %v8310_v45  ;;  %v8481_v1 = vrot.slane %v3928_v43, %v8313_v48  ;;  %vm3399_vm6 = vcmp.gt.f32.partialorder %v8452_v21, 0.5  ;;  %3760 = vmax.xlane.f32.xlu0 %v3759_v63  ;;  %v8499_v43 = vld [vmem:[#allocation2 + $0xc0] sm:$0xff] }
 0x202   : > { %10059 = vst [vmem:[#allocation27_spill] sm:$0xff] %v8463_v62  ;;  %10060 = vst [vmem:[#allocation28_spill] sm:$0xff] %v8472_v49  ;;  %v8485_v59 = vrot.slane %v3929_v34, %v8307_v42  ;;  %v8488_v55 = vrot.slane %v3929_v34, %v8310_v45  ;;  %v8491_v54 = vrot.slane %v3929_v34, %v8313_v48  ;;  %vm10022_vm13 = vcmp.gt.f32.partialorder %v8457_v24, 0.5 }
 0x203   : > { %10061 = vst [vmem:[#allocation29_spill] sm:$0xff] %v8475_v52  ;;  %10062 = vst [vmem:[#allocation30_spill] sm:$0xff] %v8478_v51  ;;  %v8494_v53 = vrot.slane %v3930_v41, %v8307_v42  ;;  %v8502_v46 = vrot.slane %v3930_v41, %v8310_v45  ;;  %v8505_v26 = vrot.slane %v3930_v41, %v8313_v48  ;;  %v3616_v34 = vsel %vm10001_vm8, %v8360_v17, -inf  ;;  %v8512_v42 = vld [vmem:[#allocation2 + $0xc8] sm:$0xff] }
 0x204   : > { %10063 = vst [vmem:[#allocation31_spill] sm:$0xff] %v8481_v1  ;;  %10064 = vst [vmem:[#allocation32_spill] sm:$0xff] %v8485_v59  ;;  %v3755_v22 = vmax.f32 %v3754_v6, %v3610_v47  ;;  %vm3401_vm12 = vcmp.gt.f32.partialorder %v8467_v0, 0.5  ;;  %v3763_v63 = vmax.f32 %v3762_v19, %v3616_v34  ;;  %v3582_v45 = vsel %vm9996_vm7, %v8342_v10, -inf  ;;  %v8523_v6 = vld [vmem:[#allocation2 + $0xd0] sm:$0xff] }
 0x205   : > { %10065 = vst [vmem:[#allocation33_spill] sm:$0xff] %v8488_v55  ;;  %10066 = vst [vmem:[#allocation34_spill] sm:$0xff] %v8491_v54  ;;  %v3617_v48 = vsel %vm10005_vm9, %v8350_v57, -inf  ;;  %v3618_v47 = vsel %vm10012_vm10, %v8353_v15, -inf  ;;  %v3583_v41 = vsel %vm10001_vm8, %v8347_v40, -inf  ;;  %v3715_v19 = vmax.f32 %v3581_v60, %v3582_v45 }
 0x206   : > { %10067 = vst [vmem:[#allocation35_spill] sm:$0xff] %v8494_v53  ;;  %10068 = vst [vmem:[#allocation36_spill] sm:$0xff] %v8502_v46  ;;  %3756 = vmax.xlane.f32.xlu1 %v3755_v22  ;;  %v3766_v34 = vmax.f32 %v3617_v48, %v3618_v47  ;;  %v3584_v20 = vsel %vm10005_vm9, %v8339_v23, -inf  ;;  %vm3403_vm7 = vcmp.gt.f32.partialorder %v8497_v50, 0.5  ;;  %vm3404_vm2 = vcmp.gt.f32.partialorder %v8499_v43, 0.5  ;;  %3764 = vmax.xlane.f32.xlu0 %v3763_v63  ;;  %v8554_v46 = vld [vmem:[#allocation2 + $0xe8] sm:$0xff] }
 0x207   : > { %10069 = vst [vmem:[#allocation37_spill] sm:$0xff] %v8505_v26  ;;  %v3619_v22 = vsel %vm10011_vm11, %v8360_v17, -inf  ;;  %v3585_v60 = vsel %vm10012_vm10, %v8342_v10, -inf  ;;  %v3587_v45 = vsel %vm10017_vm4, %v8339_v23, -inf  ;;  %v3588_v48 = vsel %vm10015_vm0, %v8342_v10, -inf }
 0x208   : > { %vm3405_vm8 = vcmp.gt.f32.partialorder %v8512_v42, 0.5  ;;  %v3716_v47 = vmax.f32 %v3715_v19, %v3583_v41  ;;  %v3767_v63 = vmax.f32 %v3766_v34, %v3619_v22  ;;  %v3586_v14 = vsel %vm10011_vm11, %v8347_v40, -inf  ;;  %v8556_v53 = vld [vmem:[#allocation2 + $0xf0] sm:$0xf]  ;;  %v8558_v54 = vld [vmem:[#allocation2 + $0xf8] sm:$0xf] }
 0x209   : > { %v3719_v26 = vmax.f32 %v3584_v20, %v3585_v60  ;;  %vm3406_vm9 = vcmp.gt.f32.partialorder %v8523_v6, 0.5  ;;  %10070 = vst [vmem:[#allocation38_spill] sm:$0xff] %v8558_v54  ;;  %v3589_v55 = vsel %vm10016_vm5, %v8347_v40, -inf  ;;  %v3723_v59 = vmax.f32 %v3587_v45, %v3588_v48  ;;  %v8571_v19 = vld [vmem:[#allocation2 + $0x100] sm:$0xf] }
 0x20a   : > { %v3620_v41 = vsel %vm10017_vm4, %v8350_v57, -inf  ;;  %v3621_v20 = vsel %vm10015_vm0, %v8353_v15, -inf  ;;  %vm3407_vm11 = vcmp.gt.f32.partialorder %v8533_v4, 0.5  ;;  %vm3408_vm10 = vcmp.gt.f32.partialorder %v8535_v3, 0.5  ;;  %3717 = vmax.xlane.f32.xlu1 %v3716_v47  ;;  %3768 = vmax.xlane.f32.xlu0 %v3767_v63 }
 0x20b   : > { %v3622_v34 = vsel %vm10016_vm5, %v8360_v17, -inf  ;;  %v3770_v22 = vmax.f32 %v3620_v41, %v3621_v20  ;;  %v3590_v60 = vsel %vm10018_vm1, %v8339_v23, -inf  ;;  %v3591_v45 = vsel %vm3396_vm15, %v8342_v10, -inf }
 0x20c   : > { %v3720_v48 = vmax.f32 %v3719_v26, %v3586_v14  ;;  %v3724_v1 = vmax.f32 %v3723_v59, %v3589_v55  ;;  %v3727_v51 = vmax.f32 %v3590_v60, %v3591_v45  ;;  %v3623_v47 = vsel %vm10018_vm1, %v8350_v57, -inf }
 0x20d   : > { %vm10025_vm0 = vcmp.gt.f32.partialorder %v8554_v46, 0.5  ;;  %vm10026_vm5 = vcmp.gt.f32.partialorder %v8556_v53, 0.5  ;;  %v3771_v41 = vmax.f32 %v3770_v22, %v3622_v34  ;;  %v3592_v20 = vsel %vm10019_vm3, %v8347_v40, -inf }
 0x20e   : > { %v3624_v63 = vsel %vm3396_vm15, %v8353_v15, -inf  ;;  %v3593_v26 = vsel %vm3398_vm14, %v8339_v23, -inf  ;;  %vm10027_vm4 = vcmp.gt.f32.partialorder %v8558_v54, 0.5  ;;  %vm10028_vm1 = vcmp.gt.f32.partialorder %v8571_v19, 0.5  ;;  %3721 = vmax.xlane.f32.xlu1 %v3720_v48  ;;  %3725 = vmax.xlane.f32.xlu0 %v3724_v1 }
 0x20f   : > { %v3728_v55 = vmax.f32 %v3727_v51, %v3592_v20  ;;  %v3625_v59 = vsel %vm10019_vm3, %v8360_v17, -inf  ;;  %v3774_v14 = vmax.f32 %v3623_v47, %v3624_v63  ;;  %v3594_v34 = vsel %vm3399_vm6, %v8342_v10, -inf }
 0x210   : > { %v3595_v22 = vsel %vm10022_vm13, %v8347_v40, -inf  ;;  %v3731_v60 = vmax.f32 %v3593_v26, %v3594_v34  ;;  %v3626_v45 = vsel %vm3398_vm14, %v8350_v57, -inf  ;;  %v3627_v51 = vsel %vm3399_vm6, %v8353_v15, -inf }
 0x211   : > { %v3628_v47 = vsel %vm10022_vm13, %v8360_v17, -inf  ;;  %v3778_v20 = vmax.f32 %v3626_v45, %v3627_v51  ;;  %v3596_v48 = vsel %vm3401_vm12, %v8339_v23, -inf  ;;  %vm10071_vm3 = vcmp.gt.f32.partialorder %v8469_v35, 0.5 }
 0x212   : > { %v3597_v63 = vsel %vm10071_vm3, %v8342_v10, -inf  ;;  %v3775_v26 = vmax.f32 %v3774_v14, %v3625_v59  ;;  %v3732_v34 = vmax.f32 %v3731_v60, %v3595_v22  ;;  %v3629_v1 = vsel %vm3401_vm12, %v8350_v57, -inf  ;;  %vm10072_vm13 = vmmov %vm10071_vm3  ;;  %3772 = vmax.xlane.f32.xlu1 %v3771_v41  ;;  %3729 = vmax.xlane.f32.xlu0 %v3728_v55 }
 0x213   : > { %v3735_v52 = vmax.f32 %v3596_v48, %v3597_v63  ;;  %v3779_v49 = vmax.f32 %v3778_v20, %v3628_v47  ;;  %v3598_v45 = vsel %vm3403_vm7, %v8347_v40, -inf  ;;  %v3630_v51 = vsel %vm10072_vm13, %v8353_v15, -inf }
 0x214   : > { %v3599_v62 = vsel %vm3404_vm2, %v8339_v23, -inf  ;;  %v3631_v14 = vsel %vm3403_vm7, %v8360_v17, -inf  ;;  %v3782_v22 = vmax.f32 %v3629_v1, %v3630_v51  ;;  %v3600_v60 = vsel %vm3405_vm8, %v8342_v10, -inf }
 0x215   : > { %v3736_v59 = vmax.f32 %v3735_v52, %v3598_v45  ;;  %v3601_v47 = vsel %vm3406_vm9, %v8347_v40, -inf  ;;  %v3739_v20 = vmax.f32 %v3599_v62, %v3600_v60  ;;  %v3632_v41 = vsel %vm3404_vm2, %v8350_v57, -inf }
 0x216   : > { %v3633_v52 = vsel %vm3405_vm8, %v8353_v15, -inf  ;;  %v3634_v48 = vsel %vm3406_vm9, %v8360_v17, -inf  ;;  %v3602_v55 = vsel %vm3407_vm11, %v8339_v23, -inf  ;;  %v3603_v62 = vsel %vm3408_vm10, %v8342_v10, -inf  ;;  %3776 = vmax.xlane.f32.xlu1 %v3775_v26  ;;  %3733 = vmax.xlane.f32.xlu0 %v3732_v34 }
 0x217   : > { %v3786_v63 = vmax.f32 %v3632_v41, %v3633_v52  ;;  %v3783_v1 = vmax.f32 %v3782_v22, %v3631_v14  ;;  %v3740_v45 = vmax.f32 %v3739_v20, %v3601_v47  ;;  %v3743_v51 = vmax.f32 %v3602_v55, %v3603_v62 }
 0x218   : > { %v3635_v60 = vsel %vm3407_vm11, %v8350_v57, -inf  ;;  %v3604_v41 = vsel %vm10025_vm0, %v8347_v40, -inf  ;;  %v3636_v52 = vsel %vm3408_vm10, %v8353_v15, -inf  ;;  %v3638_v14 = vsel %vm10026_vm5, %v8350_v57, -inf }
 0x219   : > { %v3787_v29 = vmax.f32 %v3786_v63, %v3634_v48  ;;  %v3637_v22 = vsel %vm10025_vm0, %v8360_v17, -inf  ;;  %v3790_v47 = vmax.f32 %v3635_v60, %v3636_v52  ;;  %v3639_v26 = vsel %vm10027_vm4, %v8353_v15, -inf }
 0x21a   : > { %v3640_v20 = vsel %vm10028_vm1, %v8360_v17, -inf  ;;  %v3744_v48 = vmax.f32 %v3743_v51, %v3604_v41  ;;  %vm10073_vm13 = vcmask 1043456   ;;  %v3605_v57 = vsel %vm10026_vm5, %v8339_v23, -inf  ;;  %3780 = vmax.xlane.f32.xlu1 %v3779_v49  ;;  %3737 = vmax.xlane.f32.xlu0 %v3736_v59 }
 0x21b   : > { %v3794_v63 = vsel %vm10073_vm13, %v3638_v14, -inf  ;;  %vm10074_vm3 = vmmov %vm10073_vm13  ;;  %v3606_v15 = vsel %vm10027_vm4, %v8342_v10, -inf  ;;  %v3607_v17 = vsel %vm10028_vm1, %v8347_v40, -inf  ;;  %v3791_v51 = vmax.f32 %v3790_v47, %v3637_v22 }
 0x21c   : > { %v3795_v55 = vsel %vm10074_vm3, %v3639_v26, -inf  ;;  %vm10075_vm0 = vmmov %vm10074_vm3  ;;  %vm10078_vm5 = vcmp.gt.f32.partialorder %v8299_v32, 0.5  ;;  %vm10079_vm4 = vcmp.gt.f32.partialorder %v8302_v36, 0.5  ;;  %vm10080_vm1 = vcmp.gt.f32.partialorder %v8304_v37, 0.5 }
 0x21d   : > { %v3796_v34 = vmax.f32 %v3794_v63, %v3795_v55  ;;  %v3797_v62 = vsel %vm10075_vm0, %v3640_v20, -inf  ;;  %vm10076_vm13 = vmmov %vm10075_vm0  ;;  %v3644_v23 = vsel %vm10078_vm5, %v8363_v11, -inf  ;;  %v3750_v26 = vsel %vm10075_vm0, %v3607_v17, -inf }
 0x21e   : > { %v3747_v60 = vsel %vm10076_vm13, %v3605_v57, -inf  ;;  %vm10077_vm3 = vmmov %vm10075_vm0  ;;  %v3645_v10 = vsel %vm10079_vm4, %v8366_v58, -inf  ;;  %v3646_v40 = vsel %vm10080_vm1, %v8369_v13, -inf  ;;  %vm10081_vm13 = vcmp.gt.f32.partialorder %v8315_v56, 0.5  ;;  %3784 = vmax.xlane.f32.xlu1 %v3783_v1  ;;  %3741 = vmax.xlane.f32.xlu0 %v3740_v45 }
 0x21f   : > { %v3748_v41 = vsel %vm10077_vm3, %v3606_v15, -inf  ;;  %v3798_v52 = vmax.f32 %v3796_v34, %v3797_v62  ;;  %v3805_v49 = vmax.f32 %v3644_v23, %v3645_v10  ;;  %v3641_v22 = vsel %vm10081_vm13, %v8363_v11, -inf  ;;  %vm10084_vm4 = vmmov %vm10081_vm13 }
 0x220   : > { %v3749_v14 = vmax.f32 %v3747_v60, %v3748_v41  ;;  %vm10082_vm5 = vcmp.gt.f32.partialorder %v8317_v61, 0.5  ;;  %vm10083_vm3 = vcmp.gt.f32.partialorder %v8320_v2, 0.5  ;;  %v3674_v63 = vsel %vm10084_vm4, %v8372_v18, -inf }
 0x221   : > { %v3642_v59 = vsel %vm10082_vm5, %v8366_v58, -inf  ;;  %v3643_v47 = vsel %vm10083_vm3, %v8369_v13, -inf  ;;  %vm10085_vm1 = vmmov %vm10082_vm5  ;;  %v3806_v34 = vmax.f32 %v3805_v49, %v3646_v40  ;;  %vm10086_vm0 = vcmp.gt.f32.partialorder %v8322_v44, 0.5 }
 0x222   : > { %v3801_v20 = vmax.f32 %v3641_v22, %v3642_v59  ;;  %v3675_v55 = vsel %vm10085_vm1, %v8375_v12, -inf  ;;  %v3751_v57 = vmax.f32 %v3749_v14, %v3750_v26  ;;  %v3647_v15 = vsel %vm10086_vm0, %v8363_v11, -inf  ;;  %vm10087_vm13 = vmmov %vm10083_vm3  ;;  %3788 = vmax.xlane.f32.xlu1 %v3787_v29  ;;  %3745 = vmax.xlane.f32.xlu0 %v3744_v48 }
 0x223   : > { %v3848_v62 = vmax.f32 %v3674_v63, %v3675_v55  ;;  %v3676_v60 = vsel %vm10087_vm13, %v8388_v31, -inf  ;;  %vm10088_vm5 = vcmp.gt.f32.partialorder %v8324_v8, 0.5  ;;  %vm10089_vm3 = vcmp.gt.f32.partialorder %v8355_v39, 0.5 }
 0x224   : > { %v8721_v17 = vmax.f32 %v3801_v20, %v3643_v47  ;;  %v3648_v41 = vsel %vm10088_vm5, %v8366_v58, -inf  ;;  %v3650_v1 = vsel %vm10089_vm3, %v8363_v11, -inf  ;;  %vm10090_vm4 = vcmp.gt.f32.partialorder %v8344_v38, 0.5 }
 0x225   : > { %v8732_v23 = vmax.f32 %v3848_v62, %v3676_v60  ;;  %v3649_v45 = vsel %vm10090_vm4, %v8369_v13, -inf  ;;  %v3809_v14 = vmax.f32 %v3647_v15, %v3648_v41  ;;  %vm10091_vm1 = vcmp.gt.f32.partialorder %v8357_v16, 0.5 }
 0x226   : > { %v3651_v26 = vsel %vm10091_vm1, %v8366_v58, -inf  ;;  %vm10092_vm0 = vcmp.gt.f32.partialorder %v8381_v27, 0.5  ;;  %vm10093_vm13 = vcmp.gt.f32.partialorder %v8299_v32, 0.5  ;;  %vm10094_vm5 = vcmp.gt.f32.partialorder %v8302_v36, 0.5  ;;  %3792 = vmax.xlane.f32.xlu1 %v3791_v51  ;;  %3799 = vmax.xlane.f32.xlu0 %v3798_v52 }
 0x227   : > { %v3652_v10 = vsel %vm10092_vm0, %v8369_v13, -inf  ;;  %v3813_v40 = vmax.f32 %v3650_v1, %v3651_v26  ;;  %v3677_v49 = vsel %vm10093_vm13, %v8372_v18, -inf  ;;  %v3678_v22 = vsel %vm10094_vm5, %v8375_v12, -inf }
 0x228   : > { %vm10095_vm3 = vcmp.gt.f32.partialorder %v8304_v37, 0.5  ;;  %v3852_v47 = vmax.f32 %v3677_v49, %v3678_v22  ;;  %vm10096_vm4 = vcmp.gt.f32.partialorder %v8383_v28, 0.5  ;;  %vm10097_vm1 = vcmp.gt.f32.partialorder %v8385_v30, 0.5 }
 0x229   : > { %v3679_v59 = vsel %vm10095_vm3, %v8388_v31, -inf  ;;  %v3653_v20 = vsel %vm10096_vm4, %v8363_v11, -inf  ;;  %v3654_v63 = vsel %vm10097_vm1, %v8366_v58, -inf  ;;  %v8758_v55 = vmax.f32 %v3809_v14, %v3649_v45 }
 0x22a   : > { %v8760_v62 = vmax.f32 %v3813_v40, %v3652_v10  ;;  %v3817_v15 = vmax.f32 %v3653_v20, %v3654_v63  ;;  %vm10098_vm0 = vcmp.gt.f32.partialorder %v8322_v44, 0.5  ;;  %v8765_v60 = vmax.f32 %v3852_v47, %v3679_v59  ;;  %3752 = vmax.xlane.f32.xlu1 %v3751_v57  ;;  %3807 = vmax.xlane.f32.xlu0 %v3806_v34 }
 0x22b   : > { %v3680_v29 = vsel %vm10098_vm0, %v8372_v18, -inf  ;;  %vm10099_vm13 = vcmp.gt.f32.partialorder %v8405_v9, 0.5  ;;  %vm10100_vm5 = vcmp.gt.f32.partialorder %v8324_v8, 0.5  ;;  %vm10101_vm3 = vcmp.gt.f32.partialorder %v8422_v7, 0.5 }
 0x22c   : > { %v3655_v41 = vsel %vm10099_vm13, %v8369_v13, -inf  ;;  %v3681_v1 = vsel %vm10100_vm5, %v8375_v12, -inf  ;;  %v3656_v48 = vsel %vm10101_vm3, %v8363_v11, -inf  ;;  %vm10102_vm4 = vcmp.gt.f32.partialorder %v8344_v38, 0.5 }
 0x22d   : > { %v8776_v45 = vmax.f32 %v3817_v15, %v3655_v41  ;;  %v3682_v14 = vsel %vm10102_vm4, %v8388_v31, -inf  ;;  %v3856_v26 = vmax.f32 %v3680_v29, %v3681_v1  ;;  %v3657_v10 = vsel %vm3396_vm15, %v8366_v58, -inf }
 0x22e   : > { %vm10103_vm1 = vcmp.gt.f32.partialorder %v8438_v33, 0.5  ;;  %v3821_v49 = vmax.f32 %v3656_v48, %v3657_v10  ;;  %vm10104_vm0 = vcmp.gt.f32.partialorder %v8355_v39, 0.5  ;;  %vm10105_vm13 = vcmp.gt.f32.partialorder %v8357_v16, 0.5  ;;  %3803 = vmax.xlane.f32.xlu1 %v8721_v17  ;;  %3850 = vmax.xlane.f32.xlu0 %v8732_v23 }
 0x22f   : > { %v3658_v40 = vsel %vm10103_vm1, %v8369_v13, -inf  ;;  %v3683_v22 = vsel %vm10104_vm0, %v8372_v18, -inf  ;;  %v3684_v59 = vsel %vm10105_vm13, %v8375_v12, -inf  ;;  %vm10106_vm5 = vcmp.gt.f32.partialorder %v8381_v27, 0.5 }
 0x230   : > { %v3685_v47 = vsel %vm10106_vm5, %v8388_v31, -inf  ;;  %v3860_v20 = vmax.f32 %v3683_v22, %v3684_v59  ;;  %v3659_v51 = vsel %vm3398_vm14, %v8363_v11, -inf  ;;  %v3660_v63 = vsel %vm3399_vm6, %v8366_v58, -inf }
 0x231   : > { %v8802_v15 = vmax.f32 %v3856_v26, %v3682_v14  ;;  %v8804_v29 = vmax.f32 %v3821_v49, %v3658_v40  ;;  %v3825_v41 = vmax.f32 %v3659_v51, %v3660_v63  ;;  %vm10107_vm3 = vcmp.gt.f32.partialorder %v8383_v28, 0.5 }
 0x232   : > { %v3686_v52 = vsel %vm10107_vm3, %v8372_v18, -inf  ;;  %v8809_v1 = vmax.f32 %v3860_v20, %v3685_v47  ;;  %vm10108_vm4 = vcmp.gt.f32.partialorder %v8457_v24, 0.5  ;;  %vm10109_vm1 = vcmp.gt.f32.partialorder %v8385_v30, 0.5  ;;  %3811 = vmax.xlane.f32.xlu1 %v8758_v55  ;;  %3815 = vmax.xlane.f32.xlu0 %v8760_v62 }
 0x233   : > { %v3661_v48 = vsel %vm10108_vm4, %v8369_v13, -inf  ;;  %v3687_v10 = vsel %vm10109_vm1, %v8375_v12, -inf  ;;  %v3662_v14 = vsel %vm3401_vm12, %v8363_v11, -inf  ;;  %vm10110_vm0 = vcmp.gt.f32.partialorder %v8405_v9, 0.5 }
 0x234   : > { %v8820_v26 = vmax.f32 %v3825_v41, %v3661_v48  ;;  %v3688_v40 = vsel %vm10110_vm0, %v8388_v31, -inf  ;;  %v3864_v49 = vmax.f32 %v3686_v52, %v3687_v10  ;;  %vm10111_vm13 = vcmp.gt.f32.partialorder %v8469_v35, 0.5 }
 0x235   : > { %v3663_v22 = vsel %vm10111_vm13, %v8366_v58, -inf  ;;  %v3664_v59 = vsel %vm3403_vm7, %v8369_v13, -inf  ;;  %vm10112_vm5 = vcmp.gt.f32.partialorder %v8422_v7, 0.5  ;;  %v3690_v20 = vsel %vm3396_vm15, %v8375_v12, -inf  ;;  %vm10114_vm1 = vmmov %vm10111_vm13 }
 0x236   : > { %v3829_v47 = vmax.f32 %v3662_v14, %v3663_v22  ;;  %v3689_v57 = vsel %vm10112_vm5, %v8372_v18, -inf  ;;  %vm10113_vm3 = vcmp.gt.f32.partialorder %v8438_v33, 0.5  ;;  %v3665_v34 = vsel %vm3404_vm2, %v8363_v11, -inf  ;;  %3854 = vmax.xlane.f32.xlu1 %v8765_v60  ;;  %3819 = vmax.xlane.f32.xlu0 %v8776_v45 }
 0x237   : > { %v3691_v51 = vsel %vm10113_vm3, %v8388_v31, -inf  ;;  %v3868_v63 = vmax.f32 %v3689_v57, %v3690_v20  ;;  %v3666_v41 = vsel %vm3405_vm8, %v8366_v58, -inf  ;;  %v8846_v52 = vmax.f32 %v3864_v49, %v3688_v40 }
 0x238   : > { %v8848_v48 = vmax.f32 %v3829_v47, %v3664_v59  ;;  %v3833_v10 = vmax.f32 %v3665_v34, %v3666_v41  ;;  %v3692_v14 = vsel %vm3398_vm14, %v8372_v18, -inf  ;;  %v3667_v57 = vsel %vm3406_vm9, %v8369_v13, -inf }
 0x239   : > { %v8854_v22 = vmax.f32 %v3868_v63, %v3691_v51  ;;  %v3693_v40 = vsel %vm3399_vm6, %v8375_v12, -inf  ;;  %v3698_v49 = vsel %vm3404_vm2, %v8372_v18, -inf  ;;  %v3694_v17 = vsel %vm10108_vm4, %v8388_v31, -inf }
 0x23a   : > { %v8866_v59 = vmax.f32 %v3833_v10, %v3667_v57  ;;  %v3872_v47 = vmax.f32 %v3692_v14, %v3693_v40  ;;  %v3699_v20 = vsel %vm3405_vm8, %v8375_v12, -inf  ;;  %v3700_v51 = vsel %vm3406_vm9, %v8388_v31, -inf  ;;  %3858 = vmax.xlane.f32.xlu1 %v8802_v15  ;;  %3823 = vmax.xlane.f32.xlu0 %v8804_v29 }
 0x23b   : > { %v3880_v63 = vmax.f32 %v3698_v49, %v3699_v20  ;;  %v3695_v23 = vsel %vm3401_vm12, %v8372_v18, -inf  ;;  %v3696_v34 = vsel %vm10114_vm1, %v8375_v12, -inf  ;;  %v3697_v41 = vsel %vm3403_vm7, %v8388_v31, -inf  ;;  %v10115_v12 = vld [vmem:[#allocation26_spill] sm:$0xff]  ;;  %v10119_v18 = vld [vmem:[#allocation27_spill] sm:$0xff] }
 0x23c   : > { %v3876_v10 = vmax.f32 %v3695_v23, %v3696_v34  ;;  %v3668_v14 = vsel %vm3407_vm11, %v8363_v11, -inf  ;;  %v3669_v57 = vsel %vm3408_vm10, %v8366_v58, -inf  ;;  %v8893_v40 = vmax.f32 %v3872_v47, %v3694_v17  ;;  %v10122_v47 = vld [vmem:[#allocation28_spill] sm:$0xff] }
 0x23d   : > { %v8895_v49 = vmax.f32 %v3880_v63, %v3700_v51  ;;  %v3837_v20 = vmax.f32 %v3668_v14, %v3669_v57  ;;  %vm10116_vm0 = vcmp.gt.f32.partialorder %v8299_v32, 0.5  ;;  %vm10118_vm13 = vcmp.gt.f32.partialorder %v8554_v46, 0.5 }
 0x23e   : > { %v3994_v31 = vsel %vm10116_vm0, %v10115_v12, -inf  ;;  %v8901_v23 = vmax.f32 %v3876_v10, %v3697_v41  ;;  %v3670_v34 = vsel %vm10118_vm13, %v8369_v13, -inf  ;;  %vm10120_vm5 = vcmp.gt.f32.partialorder %v8302_v36, 0.5  ;;  %3862 = vmax.xlane.f32.xlu1 %v8809_v1  ;;  %3827 = vmax.xlane.f32.xlu0 %v8820_v26 }
 0x23f   : > { %v3995_v55 = vsel %vm10120_vm5, %v10119_v18, -inf  ;;  %vm10121_vm3 = vcmp.gt.f32.partialorder %v8556_v53, 0.5  ;;  %vm10123_vm4 = vcmp.gt.f32.partialorder %v8304_v37, 0.5  ;;  %vm10124_vm1 = vcmp.gt.f32.partialorder %v8558_v54, 0.5  ;;  %v10131_v54 = vld [vmem:[#allocation30_spill] sm:$0xff] }
 0x240   : > { %10117 = vst [vmem:[#allocation26_spill] sm:$0xff] %v8901_v23  ;;  %v3671_v17 = vsel %vm10121_vm3, %v8363_v11, -inf  ;;  %v3996_v51 = vsel %vm10123_vm4, %v10122_v47, -inf  ;;  %v4127_v63 = vmax.f32 %v3994_v31, %v3995_v55  ;;  %v3672_v62 = vsel %vm10124_vm1, %v8366_v58, -inf  ;;  %v10128_v11 = vld [vmem:[#allocation29_spill] sm:$0xff] }
 0x241   : > { %vm10125_vm0 = vcmp.gt.f32.partialorder %v8571_v19, 0.5  ;;  %v8921_v10 = vmax.f32 %v3837_v20, %v3670_v34  ;;  %vm10126_vm13 = vcmask 1043456   ;;  %vm10129_vm3 = vcmp.gt.f32.partialorder %v8315_v56, 0.5  ;;  %v10133_v20 = vld [vmem:[#allocation31_spill] sm:$0xff] }
 0x242   : > { %v3673_v41 = vsel %vm10125_vm0, %v8369_v13, -inf  ;;  %v3841_v14 = vsel %vm10126_vm13, %v3671_v17, -inf  ;;  %vm10127_vm5 = vmmov %vm10126_vm13  ;;  %v4024_v23 = vsel %vm10129_vm3, %v10128_v11, -inf  ;;  %v8929_v31 = vmax.f32 %v4127_v63, %v3996_v51  ;;  %3866 = vmax.xlane.f32.xlu1 %v8846_v52  ;;  %3831 = vmax.xlane.f32.xlu0 %v8848_v48 }
 0x243   : > { %v3842_v57 = vsel %vm10127_vm5, %v3672_v62, -inf  ;;  %vm10130_vm4 = vmmov %vm10127_vm5  ;;  %vm10132_vm1 = vcmp.gt.f32.partialorder %v8317_v61, 0.5  ;;  %vm10134_vm0 = vcmp.gt.f32.partialorder %v8320_v2, 0.5  ;;  %vm10135_vm13 = vcmp.gt.f32.partialorder %v8322_v44, 0.5 }
 0x244   : > { %v3843_v55 = vmax.f32 %v3841_v14, %v3842_v57  ;;  %v3844_v58 = vsel %vm10130_vm4, %v3673_v41, -inf  ;;  %v4025_v13 = vsel %vm10132_vm1, %v10131_v54, -inf  ;;  %v4026_v34 = vsel %vm10134_vm0, %v10133_v20, -inf }
 0x245   : > { %v4170_v17 = vmax.f32 %v4024_v23, %v4025_v13  ;;  %v3997_v60 = vsel %vm10135_vm13, %v10115_v12, -inf  ;;  %vm10136_vm5 = vcmp.gt.f32.partialorder %v8324_v8, 0.5  ;;  %vm10137_vm3 = vcmp.gt.f32.partialorder %v8344_v38, 0.5 }
 0x246   : > { %v3998_v51 = vsel %vm10136_vm5, %v10119_v18, -inf  ;;  %v3999_v63 = vsel %vm10137_vm3, %v10122_v47, -inf  ;;  %vm10138_vm4 = vcmp.gt.f32.partialorder %v8315_v56, 0.5  ;;  %v3992_v23 = vsel %vm10132_vm1, %v10119_v18, -inf  ;;  %3870 = vmax.xlane.f32.xlu1 %v8854_v22  ;;  %3835 = vmax.xlane.f32.xlu0 %v8866_v59 }
 0x247   : > { %v4131_v62 = vmax.f32 %v3997_v60, %v3998_v51  ;;  %v3991_v45 = vsel %vm10138_vm4, %v10115_v12, -inf  ;;  %v8954_v41 = vmax.f32 %v3843_v55, %v3844_v58  ;;  %v8956_v14 = vmax.f32 %v4170_v17, %v4026_v34 }
 0x248   : > { %v4123_v57 = vmax.f32 %v3991_v45, %v3992_v23  ;;  %vm10139_vm0 = vcmp.gt.f32.partialorder %v8355_v39, 0.5  ;;  %vm10140_vm13 = vcmp.gt.f32.partialorder %v8320_v2, 0.5  ;;  %vm10141_vm5 = vcmp.gt.f32.partialorder %v8357_v16, 0.5 }
 0x249   : > { %v4000_v13 = vsel %vm10139_vm0, %v10115_v12, -inf  ;;  %v8962_v60 = vmax.f32 %v4131_v62, %v3999_v63  ;;  %v3993_v51 = vsel %vm10140_vm13, %v10122_v47, -inf  ;;  %v4001_v55 = vsel %vm10141_vm5, %v10119_v18, -inf }
 0x24a   : > { %vm10142_vm3 = vcmp.gt.f32.partialorder %v8299_v32, 0.5  ;;  %v8974_v34 = vmax.f32 %v4123_v57, %v3993_v51  ;;  %vm10144_vm4 = vcmp.gt.f32.partialorder %v8381_v27, 0.5  ;;  %v4135_v17 = vmax.f32 %v4000_v13, %v4001_v55  ;;  %3874 = vmax.xlane.f32.xlu1 %v8893_v40  ;;  %3882 = vmax.xlane.f32.xlu0 %v8895_v49  ;;  %v10172_v40 = vld [vmem:[#allocation38_spill] sm:$0xff] }
 0x24b   : > { %v4027_v58 = vsel %vm10142_vm3, %v10128_v11, -inf  ;;  %v4002_v15 = vsel %vm10144_vm4, %v10122_v47, -inf  ;;  %vm10145_vm1 = vcmp.gt.f32.partialorder %v8302_v36, 0.5  ;;  %vm10146_vm0 = vcmp.gt.f32.partialorder %v8304_v37, 0.5 }
 0x24c   : > { %10143 = vst [vmem:[#allocation27_spill] sm:$0xff] %v8974_v34  ;;  %v4028_v63 = vsel %vm10145_vm1, %v10131_v54, -inf  ;;  %v4029_v62 = vsel %vm10146_vm0, %v10133_v20, -inf  ;;  %vm10147_vm13 = vcmp.gt.f32.partialorder %v8383_v28, 0.5  ;;  %vm10148_vm5 = vcmp.gt.f32.partialorder %v8385_v30, 0.5 }
 0x24d   : > { %v4174_v45 = vmax.f32 %v4027_v58, %v4028_v63  ;;  %v4036_v29 = vsel %vm10147_vm13, %v10128_v11, -inf  ;;  %v4037_v23 = vsel %vm10148_vm5, %v10131_v54, -inf  ;;  %v8991_v57 = vmax.f32 %v4135_v17, %v4002_v15 }
 0x24e   : > { %v4186_v13 = vmax.f32 %v4036_v29, %v4037_v23  ;;  %vm10149_vm3 = vcmp.gt.f32.partialorder %v8322_v44, 0.5  ;;  %vm10150_vm4 = vcmp.gt.f32.partialorder %v8324_v8, 0.5  ;;  %vm10151_vm1 = vcmp.gt.f32.partialorder %v8405_v9, 0.5  ;;  %4129 = vmax.xlane.f32.xlu0 %v8929_v31 }
 0x24f   : > { %v4030_v51 = vsel %vm10149_vm3, %v10128_v11, -inf  ;;  %v4031_v55 = vsel %vm10150_vm4, %v10131_v54, -inf  ;;  %v9000_v58 = vmax.f32 %v4174_v45, %v4029_v62  ;;  %v4038_v63 = vsel %vm10151_vm1, %v10133_v20, -inf }
 0x250   : > { %v4178_v34 = vmax.f32 %v4030_v51, %v4031_v55  ;;  %vm10152_vm0 = vcmp.gt.f32.partialorder %v8422_v7, 0.5  ;;  %v9009_v17 = vmax.f32 %v4186_v13, %v4038_v63  ;;  %vm10153_vm13 = vcmp.gt.f32.partialorder %v8344_v38, 0.5 }
 0x251   : > { %v4039_v15 = vsel %vm10152_vm0, %v10128_v11, -inf  ;;  %v4032_v29 = vsel %vm10153_vm13, %v10133_v20, -inf  ;;  %v4040_v1 = vsel %vm3396_vm15, %v10131_v54, -inf  ;;  %vm10154_vm5 = vcmp.gt.f32.partialorder %v8355_v39, 0.5 }
 0x252   : > { %v4033_v62 = vsel %vm10154_vm5, %v10128_v11, -inf  ;;  %v9020_v45 = vmax.f32 %v4178_v34, %v4032_v29  ;;  %vm10156_vm3 = vcmp.gt.f32.partialorder %v8438_v33, 0.5  ;;  %v4190_v23 = vmax.f32 %v4039_v15, %v4040_v1  ;;  %4172 = vmax.xlane.f32.xlu0 %v8956_v14 }
 0x253   : > { %v4041_v26 = vsel %vm10156_vm3, %v10133_v20, -inf  ;;  %vm10157_vm4 = vcmp.gt.f32.partialorder %v8357_v16, 0.5  ;;  %vm10158_vm1 = vcmp.gt.f32.partialorder %v8381_v27, 0.5  ;;  %v4009_v63 = vsel %vm3398_vm14, %v10115_v12, -inf }
 0x254   : > { %10155 = vst [vmem:[#allocation28_spill] sm:$0xff] %v9020_v45  ;;  %v4034_v13 = vsel %vm10157_vm4, %v10131_v54, -inf  ;;  %v4035_v51 = vsel %vm10158_vm1, %v10133_v20, -inf  ;;  %v4010_v34 = vsel %vm3399_vm6, %v10119_v18, -inf  ;;  %v9038_v15 = vmax.f32 %v4190_v23, %v4041_v26 }
 0x255   : > { %v4182_v55 = vmax.f32 %v4033_v62, %v4034_v13  ;;  %v4147_v29 = vmax.f32 %v4009_v63, %v4010_v34  ;;  %vm10159_vm0 = vcmp.gt.f32.partialorder %v8383_v28, 0.5  ;;  %vm10160_vm13 = vcmp.gt.f32.partialorder %v8385_v30, 0.5 }
 0x256   : > { %v4003_v1 = vsel %vm10159_vm0, %v10115_v12, -inf  ;;  %v4004_v62 = vsel %vm10160_vm13, %v10119_v18, -inf  ;;  %vm10161_vm5 = vcmp.gt.f32.partialorder %v8457_v24, 0.5  ;;  %v4012_v26 = vsel %vm3401_vm12, %v10115_v12, -inf  ;;  %4133 = vmax.xlane.f32.xlu0 %v8962_v60 }
 0x257   : > { %v9047_v13 = vmax.f32 %v4182_v55, %v4035_v51  ;;  %v4011_v45 = vsel %vm10161_vm5, %v10122_v47, -inf  ;;  %v4139_v52 = vmax.f32 %v4003_v1, %v4004_v62  ;;  %vm10163_vm3 = vcmp.gt.f32.partialorder %v8405_v9, 0.5  ;;  %vm10168_vm13 = vmmov %vm10161_vm5 }
 0x258   : > { %v9055_v23 = vmax.f32 %v4147_v29, %v4011_v45  ;;  %v4005_v63 = vsel %vm10163_vm3, %v10122_v47, -inf  ;;  %vm10164_vm4 = vcmp.gt.f32.partialorder %v8469_v35, 0.5  ;;  %vm10165_vm1 = vcmp.gt.f32.partialorder %v8422_v7, 0.5 }
 0x259   : > { %v4013_v48 = vsel %vm10164_vm4, %v10119_v18, -inf  ;;  %v4006_v51 = vsel %vm10165_vm1, %v10115_v12, -inf  ;;  %v9066_v55 = vmax.f32 %v4139_v52, %v4005_v63  ;;  %v4014_v34 = vsel %vm3403_vm7, %v10122_v47, -inf  ;;  %vm10170_vm3 = vmmov %vm10164_vm4 }
 0x25a   : > { %10162 = vst [vmem:[#allocation29_spill] sm:$0xff] %v9055_v23  ;;  %v4151_v45 = vmax.f32 %v4012_v26, %v4013_v48  ;;  %v4007_v29 = vsel %vm3396_vm15, %v10119_v18, -inf  ;;  %vm10167_vm0 = vcmp.gt.f32.partialorder %v8438_v33, 0.5  ;;  %v4015_v52 = vsel %vm3404_vm2, %v10115_v12, -inf  ;;  %4137 = vmax.xlane.f32.xlu0 %v8991_v57 }
 0x25b   : > { %10166 = vst [vmem:[#allocation30_spill] sm:$0xff] %v9066_v55  ;;  %v4008_v1 = vsel %vm10167_vm0, %v10122_v47, -inf  ;;  %v4143_v62 = vmax.f32 %v4006_v51, %v4007_v29  ;;  %v4016_v63 = vsel %vm3405_vm8, %v10119_v18, -inf  ;;  %v4042_v22 = vsel %vm3398_vm14, %v10128_v11, -inf }
 0x25c   : > { %v9085_v26 = vmax.f32 %v4151_v45, %v4014_v34  ;;  %v4155_v48 = vmax.f32 %v4015_v52, %v4016_v63  ;;  %v4043_v51 = vsel %vm3399_vm6, %v10131_v54, -inf  ;;  %v4017_v55 = vsel %vm3406_vm9, %v10122_v47, -inf }
 0x25d   : > { %v9093_v29 = vmax.f32 %v4143_v62, %v4008_v1  ;;  %v4194_v23 = vmax.f32 %v4042_v22, %v4043_v51  ;;  %v4018_v59 = vsel %vm3407_vm11, %v10115_v12, -inf  ;;  %v4044_v45 = vsel %vm10168_vm13, %v10133_v20, -inf }
 0x25e   : > { %v9101_v34 = vmax.f32 %v4155_v48, %v4017_v55  ;;  %v4019_v1 = vsel %vm3408_vm10, %v10119_v18, -inf  ;;  %v4045_v62 = vsel %vm3401_vm12, %v10128_v11, -inf  ;;  %vm10169_vm5 = vcmp.gt.f32.partialorder %v8554_v46, 0.5  ;;  %4188 = vmax.xlane.f32.xlu0 %v9009_v17 }
 0x25f   : > { %v9113_v52 = vmax.f32 %v4194_v23, %v4044_v45  ;;  %v4020_v55 = vsel %vm10169_vm5, %v10122_v47, -inf  ;;  %v4159_v63 = vmax.f32 %v4018_v59, %v4019_v1  ;;  %v4046_v48 = vsel %vm10170_vm3, %v10131_v54, -inf }
 0x260   : > { %v4198_v22 = vmax.f32 %v4045_v62, %v4046_v48  ;;  %vm10171_vm4 = vcmp.gt.f32.partialorder %v8556_v53, 0.5  ;;  %vm10173_vm1 = vcmp.gt.f32.partialorder %v10172_v40, 0.5  ;;  %vm10174_vm0 = vcmp.gt.f32.partialorder %v8571_v19, 0.5 }
 0x261   : > { %v4021_v51 = vsel %vm10171_vm4, %v10115_v12, -inf  ;;  %v4022_v23 = vsel %vm10173_vm1, %v10119_v18, -inf  ;;  %v4023_v45 = vsel %vm10174_vm0, %v10122_v47, -inf  ;;  %v9131_v59 = vmax.f32 %v4159_v63, %v4020_v55  ;;  %v10178_v55 = vld [vmem:[#allocation26_spill] sm:$0xff] }
 0x262   : > { %v4047_v1 = vsel %vm3403_vm7, %v10133_v20, -inf  ;;  %vm10176_vm13 = vcmask 1043456   ;;  %v4048_v18 = vsel %vm3404_vm2, %v10128_v11, -inf  ;;  %v4049_v47 = vsel %vm3405_vm8, %v10131_v54, -inf  ;;  %3878 = vmax.xlane.f32.xlu1 %v10178_v55  ;;  %v10185_v55 = vld [vmem:[#allocation33_spill] sm:$0xff]  ;;  %4192 = vmax.xlane.f32.xlu0 %v9038_v15 }
 0x263   : > { %10175 = vst [vmem:[#allocation31_spill] sm:$0xff] %v9131_v59  ;;  %v4163_v49 = vsel %vm10176_vm13, %v4021_v51, -inf  ;;  %vm10177_vm5 = vmmov %vm10176_vm13  ;;  %v9138_v48 = vmax.f32 %v4198_v22, %v4047_v1  ;;  %v4202_v59 = vmax.f32 %v4048_v18, %v4049_v47  ;;  %v4051_v51 = vsel %vm3407_vm11, %v10128_v11, -inf }
 0x264   : > { %v4164_v62 = vsel %vm10177_vm5, %v4022_v23, -inf  ;;  %vm10179_vm3 = vmmov %vm10177_vm5  ;;  %v4052_v22 = vsel %vm3408_vm10, %v10131_v54, -inf  ;;  %v4050_v1 = vsel %vm3406_vm9, %v10133_v20, -inf  ;;  %vm10182_vm4 = vcmp.gt.f32.partialorder %v8315_v56, 0.5 }
 0x265   : > { %v4165_v12 = vmax.f32 %v4163_v49, %v4164_v62  ;;  %v4166_v63 = vsel %vm10179_vm3, %v4023_v45, -inf  ;;  %v4206_v49 = vmax.f32 %v4051_v51, %v4052_v22  ;;  %v10181_v62 = vld [vmem:[#allocation32_spill] sm:$0xff]  ;;  %v9163_v18 = vmax.f32 %v4202_v59, %v4050_v1  ;;  %v10191_v1 = vld [vmem:[#allocation34_spill] sm:$0xff] }
 0x266   : > { %v4057_v45 = vsel %vm10182_vm4, %v10181_v62, -inf  ;;  %vm10184_vm1 = vcmp.gt.f32.partialorder %v8554_v46, 0.5  ;;  %vm10186_vm0 = vcmp.gt.f32.partialorder %v8317_v61, 0.5  ;;  %vm10187_vm13 = vcmp.gt.f32.partialorder %v8556_v53, 0.5  ;;  %3839 = vmax.xlane.f32.xlu1 %v8921_v10 }
 0x267   : > { %v9155_v23 = vmax.f32 %v4165_v12, %v4166_v63  ;;  %10183 = vst [vmem:[#allocation26_spill] sm:$0xff] %v9163_v18  ;;  %v4053_v47 = vsel %vm10184_vm1, %v10133_v20, -inf  ;;  %v4058_v31 = vsel %vm10186_vm0, %v10185_v55, -inf  ;;  %v4054_v12 = vsel %vm10187_vm13, %v10128_v11, -inf }
 0x268   : > { %v9174_v63 = vmax.f32 %v4206_v49, %v4053_v47  ;;  %v4217_v51 = vmax.f32 %v4057_v45, %v4058_v31  ;;  %vm10189_vm5 = vcmp.gt.f32.partialorder %v10172_v40, 0.5  ;;  %vm10190_vm3 = vcmp.gt.f32.partialorder %v8571_v19, 0.5 }
 0x269   : > { %10180 = vst [vmem:[#allocation38_spill] sm:$0xff] %v9155_v23  ;;  %v4055_v59 = vsel %vm10189_vm5, %v10131_v54, -inf  ;;  %v4056_v22 = vsel %vm10190_vm3, %v10133_v20, -inf  ;;  %vm10192_vm4 = vcmp.gt.f32.partialorder %v8320_v2, 0.5  ;;  %vm10193_vm1 = vcmask 1043456  }
 0x26a   : > { %10188 = vst [vmem:[#allocation32_spill] sm:$0xff] %v9174_v63  ;;  %v4059_v18 = vsel %vm10192_vm4, %v10191_v1, -inf  ;;  %v4210_v23 = vsel %vm10193_vm1, %v4054_v12, -inf  ;;  %vm10194_vm0 = vmmov %vm10193_vm1  ;;  %vm10195_vm13 = vcmp.gt.f32.partialorder %v8322_v44, 0.5  ;;  %vm10197_vm3 = vcmp.gt.f32.partialorder %v8324_v8, 0.5  ;;  %3846 = vmax.xlane.f32.xlu1 %v8954_v41 }
 0x26b   : > { %v4211_v11 = vsel %vm10194_vm0, %v4055_v59, -inf  ;;  %v4063_v49 = vsel %vm10195_vm13, %v10181_v62, -inf  ;;  %v9192_v54 = vmax.f32 %v4217_v51, %v4059_v18  ;;  %vm10196_vm5 = vmmov %vm10194_vm0  ;;  %v4064_v10 = vsel %vm10197_vm3, %v10185_v55, -inf  ;;  %v10201_v51 = vld [vmem:[#allocation35_spill] sm:$0xff] }
 0x26c   : > { %v4212_v45 = vmax.f32 %v4210_v23, %v4211_v11  ;;  %v4213_v20 = vsel %vm10196_vm5, %v4056_v22, -inf  ;;  %vm10198_vm4 = vcmp.gt.f32.partialorder %v8344_v38, 0.5  ;;  %v4225_v31 = vmax.f32 %v4063_v49, %v4064_v10  ;;  %v10203_v22 = vld [vmem:[#allocation36_spill] sm:$0xff] }
 0x26d   : > { %v4065_v47 = vsel %vm10198_vm4, %v10191_v1, -inf  ;;  %vm10199_vm1 = vcmp.gt.f32.partialorder %v8299_v32, 0.5  ;;  %vm10200_vm0 = vcmp.gt.f32.partialorder %v8302_v36, 0.5  ;;  %vm10205_vm3 = vcmp.gt.f32.partialorder %v8304_v37, 0.5 }
 0x26e   : > { %v4060_v12 = vsel %vm10199_vm1, %v10181_v62, -inf  ;;  %v4061_v14 = vsel %vm10200_vm0, %v10185_v55, -inf  ;;  %v9207_v23 = vmax.f32 %v4212_v45, %v4213_v20  ;;  %vm10202_vm13 = vmmov %vm10199_vm1  ;;  %v9216_v49 = vmax.f32 %v4225_v31, %v4065_v47  ;;  %v10207_v20 = vld [vmem:[#allocation37_spill] sm:$0xff] }
 0x26f   : > { %v4221_v18 = vmax.f32 %v4060_v12, %v4061_v14  ;;  %v4093_v59 = vsel %vm10202_vm13, %v10201_v51, -inf  ;;  %vm10204_vm5 = vmmov %vm10200_vm0  ;;  %v4062_v10 = vsel %vm10205_vm3, %v10191_v1, -inf  ;;  %vm10206_vm4 = vcmp.gt.f32.partialorder %v8315_v56, 0.5  ;;  %v10214_v14 = vld [vmem:[#allocation27_spill] sm:$0xff] }
 0x270   : > { %v4094_v11 = vsel %vm10204_vm5, %v10203_v22, -inf  ;;  %v4090_v45 = vsel %vm10206_vm4, %v10201_v51, -inf  ;;  %vm10208_vm1 = vmmov %vm10205_vm3  ;;  %vm10209_vm0 = vcmp.gt.f32.partialorder %v8317_v61, 0.5  ;;  %vm10210_vm13 = vcmp.gt.f32.partialorder %v8322_v44, 0.5  ;;  %4125 = vmax.xlane.f32.xlu1 %v10214_v14 }
 0x271   : > { %v4268_v63 = vmax.f32 %v4093_v59, %v4094_v11  ;;  %v9225_v32 = vmax.f32 %v4221_v18, %v4062_v10  ;;  %v4095_v36 = vsel %vm10208_vm1, %v10207_v20, -inf  ;;  %v4091_v41 = vsel %vm10209_vm0, %v10203_v22, -inf }
 0x272   : > { %v4096_v47 = vsel %vm10210_vm13, %v10201_v51, -inf  ;;  %v4264_v56 = vmax.f32 %v4090_v45, %v4091_v41  ;;  %vm10211_vm5 = vcmp.gt.f32.partialorder %v8324_v8, 0.5  ;;  %vm10212_vm3 = vcmp.gt.f32.partialorder %v8320_v2, 0.5 }
 0x273   : > { %v9236_v31 = vmax.f32 %v4268_v63, %v4095_v36  ;;  %v4097_v60 = vsel %vm10211_vm5, %v10203_v22, -inf  ;;  %v4092_v37 = vsel %vm10212_vm3, %v10207_v20, -inf  ;;  %vm10213_vm4 = vcmp.gt.f32.partialorder %v8355_v39, 0.5 }
 0x274   : > { %v4272_v12 = vmax.f32 %v4096_v47, %v4097_v60  ;;  %v4066_v61 = vsel %vm10213_vm4, %v10181_v62, -inf  ;;  %v9248_v44 = vmax.f32 %v4264_v56, %v4092_v37  ;;  %vm10215_vm1 = vcmp.gt.f32.partialorder %v8344_v38, 0.5  ;;  %vm10217_vm13 = vmmov %vm10213_vm4  ;;  %4176 = vmax.xlane.f32.xlu1 %v9000_v58 }
 0x275   : > { %v4098_v63 = vsel %vm10215_vm1, %v10207_v20, -inf  ;;  %vm10216_vm0 = vcmp.gt.f32.partialorder %v8357_v16, 0.5  ;;  %v4099_v2 = vsel %vm10217_vm13, %v10201_v51, -inf  ;;  %vm10218_vm5 = vcmp.gt.f32.partialorder %v8381_v27, 0.5 }
 0x276   : > { %v4067_v8 = vsel %vm10216_vm0, %v10185_v55, -inf  ;;  %v9260_v18 = vmax.f32 %v4272_v12, %v4098_v63  ;;  %v4068_v11 = vsel %vm10218_vm5, %v10191_v1, -inf  ;;  %vm10219_vm3 = vmmov %vm10216_vm0  ;;  %vm10220_vm4 = vcmp.gt.f32.partialorder %v8383_v28, 0.5 }
 0x277   : > { %v4229_v59 = vmax.f32 %v4066_v61, %v4067_v8  ;;  %v4100_v38 = vsel %vm10219_vm3, %v10203_v22, -inf  ;;  %v4069_v10 = vsel %vm10220_vm4, %v10181_v62, -inf  ;;  %vm10221_vm1 = vcmp.gt.f32.partialorder %v8385_v30, 0.5  ;;  %vm10222_vm0 = vmmov %vm10218_vm5  ;;  %v10226_v8 = vld [vmem:[#allocation28_spill] sm:$0xff] }
 0x278   : > { %v4070_v39 = vsel %vm10221_vm1, %v10185_v55, -inf  ;;  %v4276_v45 = vmax.f32 %v4099_v2, %v4100_v38  ;;  %v4101_v36 = vsel %vm10222_vm0, %v10207_v20, -inf  ;;  %vm10223_vm13 = vcmp.gt.f32.partialorder %v8422_v7, 0.5  ;;  %4180 = vmax.xlane.f32.xlu1 %v10226_v8 }
 0x279   : > { %v9274_v57 = vmax.f32 %v4229_v59, %v4068_v11  ;;  %v4233_v41 = vmax.f32 %v4069_v10, %v4070_v39  ;;  %v4072_v16 = vsel %vm10223_vm13, %v10181_v62, -inf  ;;  %v4073_v47 = vsel %vm3396_vm15, %v10185_v55, -inf }
 0x27a   : > { %v9287_v56 = vmax.f32 %v4276_v45, %v4101_v36  ;;  %vm10224_vm5 = vcmp.gt.f32.partialorder %v8405_v9, 0.5  ;;  %v4237_v60 = vmax.f32 %v4072_v16, %v4073_v47  ;;  %vm10225_vm3 = vcmp.gt.f32.partialorder %v8438_v33, 0.5  ;;  %v10230_v16 = vld [vmem:[#allocation29_spill] sm:$0xff] }
 0x27b   : > { %v4071_v58 = vsel %vm10224_vm5, %v10191_v1, -inf  ;;  %v4074_v37 = vsel %vm10225_vm3, %v10191_v1, -inf  ;;  %v4102_v12 = vsel %vm10220_vm4, %v10201_v51, -inf  ;;  %v4103_v17 = vsel %vm10221_vm1, %v10203_v22, -inf  ;;  %vm10227_vm0 = vmmov %vm10224_vm5  ;;  %4149 = vmax.xlane.f32.xlu0 %v10230_v16 }
 0x27c   : > { %v9292_v27 = vmax.f32 %v4233_v41, %v4071_v58  ;;  %v9303_v61 = vmax.f32 %v4237_v60, %v4074_v37  ;;  %v4280_v14 = vmax.f32 %v4102_v12, %v4103_v17  ;;  %v4075_v63 = vsel %vm3398_vm14, %v10181_v62, -inf  ;;  %4184 = vmax.xlane.f32.xlu1 %v9047_v13  ;;  %v10232_v17 = vld [vmem:[#allocation30_spill] sm:$0xff] }
 0x27d   : > { %v4104_v2 = vsel %vm10227_vm0, %v10207_v20, -inf  ;;  %v4076_v28 = vsel %vm3399_vm6, %v10185_v55, -inf  ;;  %v4105_v11 = vsel %vm10223_vm13, %v10201_v51, -inf  ;;  %v4106_v38 = vsel %vm3396_vm15, %v10203_v22, -inf }
 0x27e   : > { %v9316_v30 = vmax.f32 %v4280_v14, %v4104_v2  ;;  %v4241_v59 = vmax.f32 %v4075_v63, %v4076_v28  ;;  %vm10228_vm5 = vcmp.gt.f32.partialorder %v8457_v24, 0.5  ;;  %v4284_v10 = vmax.f32 %v4105_v11, %v4106_v38 }
 0x27f   : > { %v4077_v9 = vsel %vm10228_vm5, %v10191_v1, -inf  ;;  %v4078_v15 = vsel %vm3401_vm12, %v10181_v62, -inf  ;;  %v4107_v7 = vsel %vm10225_vm3, %v10207_v20, -inf  ;;  %vm10229_vm4 = vcmp.gt.f32.partialorder %v8469_v35, 0.5  ;;  %4153 = vmax.xlane.f32.xlu0 %v9085_v26 }
 0x280   : > { %v9330_v39 = vmax.f32 %v4241_v59, %v4077_v9  ;;  %v4079_v25 = vsel %vm10229_vm4, %v10185_v55, -inf  ;;  %v9339_v45 = vmax.f32 %v4284_v10, %v4107_v7  ;;  %v4108_v41 = vsel %vm3398_vm14, %v10201_v51, -inf  ;;  %vm10231_vm14 = vmmov %vm10228_vm5  ;;  %4141 = vmax.xlane.f32.xlu1 %v10232_v17  ;;  %v10250_v17 = vld [vmem:[#allocation26_spill] sm:$0xff] }
 0x281   : > { %v4245_v36 = vmax.f32 %v4078_v15, %v4079_v25  ;;  %v4080_v33 = vsel %vm3403_vm7, %v10191_v1, -inf  ;;  %v4109_v47 = vsel %vm3399_vm6, %v10203_v22, -inf  ;;  %v4081_v13 = vsel %vm3404_vm2, %v10181_v62, -inf  ;;  %vm10233_vm15 = vmmov %vm10229_vm4 }
 0x282   : > { %v4288_v60 = vmax.f32 %v4108_v41, %v4109_v47  ;;  %v4082_v5 = vsel %vm3405_vm8, %v10185_v55, -inf  ;;  %v4110_v37 = vsel %vm10231_vm14, %v10207_v20, -inf  ;;  %v4111_v21 = vsel %vm3401_vm12, %v10201_v51, -inf  ;;  %v10244_v47 = vld [vmem:[#allocation31_spill] sm:$0xff] }
 0x283   : > { %v9354_v58 = vmax.f32 %v4245_v36, %v4080_v33  ;;  %v4249_v12 = vmax.f32 %v4081_v13, %v4082_v5  ;;  %v4083_v63 = vsel %vm3406_vm9, %v10191_v1, -inf  ;;  %v4112_v8 = vsel %vm10233_vm15, %v10203_v22, -inf  ;;  %4157 = vmax.xlane.f32.xlu0 %v9101_v34 }
 0x284   : > { %v9366_v14 = vmax.f32 %v4288_v60, %v4110_v37  ;;  %v4084_v24 = vsel %vm3407_vm11, %v10181_v62, -inf  ;;  %v4292_v2 = vmax.f32 %v4111_v21, %v4112_v8  ;;  %v4085_v28 = vsel %vm3408_vm10, %v10185_v55, -inf  ;;  %4145 = vmax.xlane.f32.xlu1 %v9093_v29  ;;  %v10249_v21 = vld [vmem:[#allocation38_spill] sm:$0xff] }
 0x285   : > { %v9378_v0 = vmax.f32 %v4249_v12, %v4083_v63  ;;  %v4113_v59 = vsel %vm3403_vm7, %v10207_v20, -inf  ;;  %v4253_v11 = vmax.f32 %v4084_v24, %v4085_v28  ;;  %vm10234_vm12 = vcmp.gt.f32.partialorder %v8554_v46, 0.5 }
 0x286   : > { %v9386_v35 = vmax.f32 %v4292_v2, %v4113_v59  ;;  %v4086_v38 = vsel %vm10234_vm12, %v10191_v1, -inf  ;;  %v4114_v26 = vsel %vm3404_vm2, %v10201_v51, -inf  ;;  %v4115_v9 = vsel %vm3405_vm8, %v10203_v22, -inf  ;;  %v3714_v8 = vpop.xlane.xlu0 %3713  ;;  %v3710_v24 = vpop.xlane.xlu1 %3709 }
 0x287   : > { %v9398_v10 = vmax.f32 %v4253_v11, %v4086_v38  ;;  %v4296_v50 = vmax.f32 %v4114_v26, %v4115_v9  ;;  %vm10235_vm6 = vcmp.gt.f32.partialorder %v8556_v53, 0.5  ;;  %v4116_v43 = vsel %vm3406_vm9, %v10207_v20, -inf  ;;  %vm10241_vm9 = vmmov %vm10234_vm12  ;;  %4161 = vmax.xlane.f32.xlu0 %v10244_v47 }
 0x288   : > { %v4087_v15 = vsel %vm10235_vm6, %v10181_v62, -inf  ;;  %vm10236_vm2 = vcmp.gt.f32.partialorder %v10172_v40, 0.5  ;;  %vm10237_vm7 = vcmp.gt.f32.partialorder %v8571_v19, 0.5  ;;  %vm10238_vm8 = vcmask 1043456   ;;  %4196 = vmax.xlane.f32.xlu1 %v9113_v52  ;;  %vm10242_vm13 = vmmov %vm10235_vm6 }
 0x289   : > { %v4088_v42 = vsel %vm10236_vm2, %v10185_v55, -inf  ;;  %v4089_v29 = vsel %vm10237_vm7, %v10191_v1, -inf  ;;  %v4257_v7 = vsel %vm10238_vm8, %v4087_v15, -inf  ;;  %v9414_v25 = vmax.f32 %v4296_v50, %v4116_v43  ;;  %vm10239_vm1 = vmmov %vm10238_vm8 }
 0x28a   : > { %v4258_v62 = vsel %vm10239_vm1, %v4088_v42, -inf  ;;  %vm10240_vm0 = vmmov %vm10239_vm1  ;;  %v4117_v6 = vsel %vm3407_vm11, %v10201_v51, -inf  ;;  %v4118_v55 = vsel %vm3408_vm10, %v10203_v22, -inf  ;;  %v4119_v1 = vsel %vm10241_vm9, %v10207_v20, -inf }
 0x28b   : > { %v4259_v36 = vmax.f32 %v4257_v7, %v4258_v62  ;;  %v4260_v34 = vsel %vm10240_vm0, %v4089_v29, -inf  ;;  %v4300_v41 = vmax.f32 %v4117_v6, %v4118_v55  ;;  %v4120_v16 = vsel %vm10242_vm13, %v10201_v51, -inf  ;;  %vm10243_vm5 = vmmov %vm10236_vm2  ;;  %4168 = vmax.xlane.f32.xlu0 %v10249_v21 }
 0x28c   : > { %v4121_v33 = vsel %vm10243_vm5, %v10203_v22, -inf  ;;  %vm10245_vm3 = vmmov %vm10237_vm7  ;;  %4200 = vmax.xlane.f32.xlu1 %v9138_v48  ;;  %v10252_v48 = vlaneseq  ;;  %vm4366_vm12 = vcmask 130112   ;;  %vm4373_vm6 = vcmask 195712  }
 0x28d   : > { %v9435_v13 = vmax.f32 %v4259_v36, %v4260_v34  ;;  %v4122_v52 = vsel %vm10245_vm3, %v10207_v20, -inf  ;;  %vm10246_vm4 = vmmov %vm10240_vm0  ;;  %v9442_v37 = vmax.f32 %v4300_v41, %v4119_v1  ;;  %v10251_v20 = vld [vmem:[#allocation32_spill] sm:$0xff]  ;;  %vm4380_vm2 = vcmask 261312  }
 0x28e   : > { %v4304_v60 = vsel %vm10246_vm4, %v4120_v16, -inf  ;;  %vm10247_vm14 = vmmov %vm10240_vm0  ;;  %v9458_v63 = vand.u32 127, %v10252_v48  ;;  %vm4387_vm7 = vcmask 326912   ;;  %vm4394_vm8 = vcmask 392512  }
 0x28f   : > { %v4305_v5 = vsel %vm10247_vm14, %v4121_v33, -inf  ;;  %vm10248_vm15 = vmmov %vm10240_vm0  ;;  %4219 = vmax.xlane.f32.xlu0 %v9192_v54  ;;  %vm4401_vm1 = vcmask 458112  }
 0x290   : > { %v4306_v12 = vmax.f32 %v4304_v60, %v4305_v5  ;;  %v4307_v51 = vsel %vm10248_vm15, %v4122_v52, -inf  ;;  %4204 = vmax.xlane.f32.xlu1 %v10250_v17  ;;  %v4361_v54 = vadd.s32 4294967288, %v9458_v63  ;;  %v4382_v59 = vadd.s32 4294967264, %v9458_v63  ;;  %vm10255_vm0 = vmmov %vm10242_vm13 }
 0x291   : > { %v4389_v9 = vadd.s32 4294967256, %v9458_v63  ;;  %v4396_v55 = vadd.s32 4294967248, %v9458_v63  ;;  %v4410_v48 = vadd.s32 4294967232, %v9458_v63  ;;  %vm10257_vm9 = vmmov %vm10243_vm5  ;;  %vm4408_vm13 = vcmask 523712  }
 0x292   : > { %v9446_v22 = vmax.f32 %v4306_v12, %v4307_v51  ;;  %vm10258_vm5 = vmmov %vm10246_vm4  ;;  %vm4422_vm15 = vcmask 654912  }
 0x293   : > { %4227 = vmax.xlane.f32.xlu0 %v9216_v49  ;;  %v3761_v49 = vpop.xlane.xlu0 %3760  ;;  %vm10262_vm14 = vmmov %vm10258_vm5 }
 0x294   : > { %4208 = vmax.xlane.f32.xlu1 %v10251_v20 }
 0x297   : > { %4270 = vmax.xlane.f32.xlu0 %v9236_v31  ;;  %v3757_v31 = vpop.xlane.xlu1 %3756 }
 0x298   : > { %4215 = vmax.xlane.f32.xlu1 %v9207_v23  ;;  %v4368_v23 = vadd.s32 4294967280, %v9458_v63 }
 0x29b   : > { %4274 = vmax.xlane.f32.xlu0 %v9260_v18 }
 0x29c   : > { %4223 = vmax.xlane.f32.xlu1 %v9225_v32  ;;  %v10253_v32 = vld [vmem:[#allocation22_spill] sm:$0xff] }
 0x29d   : > { %v9468_v18 = vsub.s32 %v9458_v63, %v10253_v32  ;;  %v9471_v2 = vsub.s32 %v4361_v54, %v10253_v32  ;;  %v9475_v28 = vsub.s32 %v4368_v23, %v10253_v32  ;;  %v9488_v15 = vsub.s32 %v4382_v59, %v10253_v32  ;;  %v10254_v54 = vld [vmem:[#allocation23_spill] sm:$0xff] }
 0x29e   : > { %v9498_v36 = vsub.s32 %v4389_v9, %v10253_v32  ;;  %v9514_v12 = vsub.s32 %v4396_v55, %v10253_v32  ;;  %v9545_v40 = vsub.s32 %v4410_v48, %v10253_v32 }
 0x29f   : > { %4278 = vmax.xlane.f32.xlu0 %v9287_v56  ;;  %v4375_v56 = vadd.s32 4294967272, %v9458_v63  ;;  %v4365_v11 = vrot.slane %v3714_v8, %v9471_v2 }
 0x2a0   : > { %4266 = vmax.xlane.f32.xlu1 %v9248_v44  ;;  %v3765_v44 = vpop.xlane.xlu0 %3764 }
 0x2a1   : > { %v9483_v38 = vsub.s32 %v4375_v56, %v10253_v32  ;;  %v4443_v29 = vrot.slane %v3765_v44, %v9475_v28 }
 0x2a3   : > { %4239 = vmax.xlane.f32.xlu0 %v9303_v61  ;;  %v4360_v61 = vrot.slane %v3710_v24, %v9468_v18 }
 0x2a4   : > { %4231 = vmax.xlane.f32.xlu1 %v9274_v57  ;;  %v3718_v57 = vpop.xlane.xlu1 %3717  ;;  %v3769_v26 = vpop.xlane.xlu0 %3768 }
 0x2a5   : > { %v4372_v50 = vrot.slane %v3718_v57, %v9475_v28  ;;  %v4367_v42 = vsel %vm4366_vm12, %v4365_v11, %v4360_v61  ;;  %v4448_v34 = vrot.slane %v3769_v26, %v9483_v38  ;;  %v4417_v11 = vadd.s32 4294967224, %v9458_v63 }
 0x2a7   : > { %4243 = vmax.xlane.f32.xlu0 %v9330_v39  ;;  %v4438_v39 = vrot.slane %v3761_v49, %v9471_v2 }
 0x2a8   : > { %4235 = vmax.xlane.f32.xlu1 %v9292_v27  ;;  %v4434_v27 = vrot.slane %v3757_v31, %v9468_v18  ;;  %v3722_v43 = vpop.xlane.xlu1 %3721  ;;  %v3726_v62 = vpop.xlane.xlu0 %3725  ;;  %v3701_v31 = vsel %vm3407_vm11, %v10254_v54, -inf  ;;  %vm10259_vm11 = vmmov %vm10246_vm4  ;;  %vm10261_vm4 = vcmp.gt.f32.partialorder %v8554_v46, 0.5 }
 0x2a9   : > { %v4379_v7 = vrot.slane %v3722_v43, %v9483_v38  ;;  %v4386_v6 = vrot.slane %v3726_v62, %v9488_v15  ;;  %v9564_v62 = vsub.s32 %v4417_v11, %v10253_v32 }
 0x2aa   : > { %v4439_v1 = vsel %vm4366_vm12, %v4438_v39, %v4434_v27  ;;  %v10260_v39 = vld [vmem:[#allocation25_spill] sm:$0xff] }
 0x2ab   : > { %4247 = vmax.xlane.f32.xlu0 %v9354_v58  ;;  %v4444_v33 = vsel %vm4373_vm6, %v4443_v29, %v4439_v1  ;;  %v3706_v43 = vsel %vm10245_vm3, %v10260_v39, -inf  ;;  %v3703_v29 = vsel %vm10261_vm4, %v10260_v39, -inf }
 0x2ac   : > { %4282 = vmax.xlane.f32.xlu1 %v9316_v30  ;;  %v4374_v30 = vsel %vm4373_vm6, %v4372_v50, %v4367_v42  ;;  %v3773_v41 = vpop.xlane.xlu1 %3772  ;;  %v3730_v52 = vpop.xlane.xlu0 %3729  ;;  %v4449_v60 = vsel %vm4380_vm2, %v4448_v34, %v4444_v33 }
 0x2ad   : > { %v4381_v58 = vsel %vm4380_vm2, %v4379_v7, %v4374_v30  ;;  %v4453_v47 = vrot.slane %v3773_v41, %v9488_v15  ;;  %v4393_v5 = vrot.slane %v3730_v52, %v9498_v36 }
 0x2ae   : > { %v4388_v16 = vsel %vm4387_vm7, %v4386_v6, %v4381_v58  ;;  %v3891_v6 = vsel %vm10262_vm14, %v3706_v43, -inf }
 0x2af   : > { %4251 = vmax.xlane.f32.xlu0 %v9378_v0  ;;  %v4454_v51 = vsel %vm4387_vm7, %v4453_v47, %v4449_v60  ;;  %v4395_v21 = vsel %vm4394_vm8, %v4393_v5, %v4388_v16 }
 0x2b0   : > { %4286 = vmax.xlane.f32.xlu1 %v9339_v45  ;;  %v4403_v45 = vadd.s32 4294967240, %v9458_v63  ;;  %v3777_v0 = vpop.xlane.xlu1 %3776  ;;  %v3734_v20 = vpop.xlane.xlu0 %3733 }
 0x2b1   : > { %v4458_v17 = vrot.slane %v3777_v0, %v9498_v36  ;;  %v4400_v8 = vrot.slane %v3734_v20, %v9514_v12 }
 0x2b2   : > { %v9525_v24 = vsub.s32 %v4403_v45, %v10253_v32 }
 0x2b3   : > { %4255 = vmax.xlane.f32.xlu0 %v9398_v10  ;;  %v4459_v49 = vsel %vm4394_vm8, %v4458_v17, %v4454_v51  ;;  %v10256_v10 = vld [vmem:[#allocation24_spill] sm:$0xff]  ;;  %v4402_v53 = vsel %vm4401_vm1, %v4400_v8, %v4395_v21 }
 0x2b4   : > { %4290 = vmax.xlane.f32.xlu1 %v9366_v14  ;;  %v3704_v14 = vsel %vm10255_vm0, %v10254_v54, -inf  ;;  %v3705_v23 = vsel %vm10257_vm9, %v10256_v10, -inf  ;;  %v3702_v44 = vsel %vm3408_vm10, %v10256_v10, -inf  ;;  %v3781_v56 = vpop.xlane.xlu1 %3780  ;;  %vm4415_vm10 = vcmask 589312  }
 0x2b5   : > { %v4463_v59 = vrot.slane %v3781_v56, %v9514_v12  ;;  %v3888_v57 = vsel %vm10258_vm5, %v3704_v14, -inf  ;;  %v3889_v61 = vsel %vm10259_vm11, %v3705_v23, -inf  ;;  %v3884_v3 = vmax.f32 %v3701_v31, %v3702_v44 }
 0x2b6   : > { %v3890_v42 = vmax.f32 %v3888_v57, %v3889_v61  ;;  %vm4429_vm0 = vcmask 720512   ;;  %vm4593_vm9 = vcmask 1041409   ;;  %vm4595_vm5 = vcmask 1042434  }
 0x2b7   : > { %4262 = vmax.xlane.f32.xlu0 %v9435_v13  ;;  %v4464_v26 = vsel %vm4401_vm1, %v4463_v59, %v4459_v49  ;;  %v3885_v7 = vmax.f32 %v3884_v3, %v3703_v29 }
 0x2b8   : > { %4294 = vmax.xlane.f32.xlu1 %v9386_v35  ;;  %v3738_v35 = vpop.xlane.xlu0 %3737  ;;  %v3785_v13 = vpop.xlane.xlu1 %3784  ;;  %v3892_v55 = vmax.f32 %v3890_v42, %v3891_v6 }
 0x2b9   : > { %v4407_v4 = vrot.slane %v3738_v35, %v9525_v24  ;;  %v4468_v50 = vrot.slane %v3785_v13, %v9525_v24 }
 0x2bb   : > { %v4409_v9 = vsel %vm4408_vm13, %v4407_v4, %v4402_v53  ;;  %4309 = vmax.xlane.f32.xlu0 %v9446_v22  ;;  %v4424_v22 = vadd.s32 4294967216, %v9458_v63  ;;  %v4469_v30 = vsel %vm4408_vm13, %v4468_v50, %v4464_v26 }
 0x2bc   : > { %4298 = vmax.xlane.f32.xlu1 %v9414_v25  ;;  %v3742_v27 = vpop.xlane.xlu0 %3741  ;;  %v3789_v34 = vpop.xlane.xlu1 %3788 }
 0x2bd   : > { %v4414_v25 = vrot.slane %v3742_v27, %v9545_v40  ;;  %v4473_v46 = vrot.slane %v3789_v34, %v9545_v40  ;;  %v9574_v41 = vsub.s32 %v4424_v22, %v10253_v32 }
 0x2bf   : > { %v4416_v19 = vsel %vm4415_vm10, %v4414_v25, %v4409_v9  ;;  %3886 = vmax.xlane.f32.xlu0 %v3885_v7  ;;  %v4474_v63 = vsel %vm4415_vm10, %v4473_v46, %v4469_v30 }
 0x2c0   : > { %4302 = vmax.xlane.f32.xlu1 %v9442_v37  ;;  %v3746_v58 = vpop.xlane.xlu0 %3745  ;;  %v3793_v37 = vpop.xlane.xlu1 %3792 }
 0x2c1   : > { %v4421_v1 = vrot.slane %v3746_v58, %v9564_v62  ;;  %v4478_v33 = vrot.slane %v3793_v37, %v9564_v62 }
 0x2c3   : > { %v4423_v16 = vsel %vm4422_vm15, %v4421_v1, %v4416_v19  ;;  %v4479_v60 = vsel %vm4422_vm15, %v4478_v33, %v4474_v63 }
 0x2c4   : > { %3893 = vmax.xlane.f32.xlu1 %v3892_v55  ;;  %v3800_v47 = vpop.xlane.xlu0 %3799  ;;  %v3753_v5 = vpop.xlane.xlu1 %3752 }
 0x2c5   : > { %v4483_v52 = vrot.slane %v3800_v47, %v9574_v41  ;;  %v4428_v32 = vrot.slane %v3753_v5, %v9574_v41 }
 0x2c7   : > { %v4484_v45 = vsel %vm4429_vm0, %v4483_v52, %v4479_v60  ;;  %v4430_v0 = vsel %vm4429_vm0, %v4428_v32, %v4423_v16 }
 0x2c8   : > { %v3808_v51 = vpop.xlane.xlu0 %3807  ;;  %v4594_v17 = vsel %vm4593_vm9, %v4484_v45, %v4430_v0  ;;  %v3804_v20 = vpop.xlane.xlu1 %3803 }
 0x2c9   : > { %v4492_v21 = vrot.slane %v3808_v51, %v9471_v2  ;;  %v4488_v48 = vrot.slane %v3804_v20, %v9468_v18 }
 0x2cb   : > { %v4493_v54 = vsel %vm4366_vm12, %v4492_v21, %v4488_v48 }
 0x2cc   : > { %v3851_v8 = vpop.xlane.xlu0 %3850  ;;  %v3812_v14 = vpop.xlane.xlu1 %3811 }
 0x2cd   : > { %v4497_v49 = vrot.slane %v3812_v14, %v9475_v28  ;;  %v4542_v53 = vrot.slane %v3851_v8, %v9468_v18 }
 0x2cf   : > { %v4498_v31 = vsel %vm4373_vm6, %v4497_v49, %v4493_v54 }
 0x2d0   : > { %v3816_v10 = vpop.xlane.xlu0 %3815  ;;  %v3855_v44 = vpop.xlane.xlu1 %3854 }
 0x2d1   : > { %v4502_v23 = vrot.slane %v3816_v10, %v9483_v38  ;;  %v4546_v59 = vrot.slane %v3855_v44, %v9471_v2 }
 0x2d3   : > { %v4503_v56 = vsel %vm4380_vm2, %v4502_v23, %v4498_v31  ;;  %v4547_v4 = vsel %vm4366_vm12, %v4546_v59, %v4542_v53 }
 0x2d4   : > { %v3820_v35 = vpop.xlane.xlu0 %3819  ;;  %v3859_v61 = vpop.xlane.xlu1 %3858 }
 0x2d5   : > { %v4507_v57 = vrot.slane %v3820_v35, %v9488_v15  ;;  %v4551_v11 = vrot.slane %v3859_v61, %v9475_v28 }
 0x2d7   : > { %v4508_v3 = vsel %vm4387_vm7, %v4507_v57, %v4503_v56  ;;  %v4552_v9 = vsel %vm4373_vm6, %v4551_v11, %v4547_v4 }
 0x2d8   : > { %v3824_v26 = vpop.xlane.xlu0 %3823  ;;  %v3863_v50 = vpop.xlane.xlu1 %3862 }
 0x2d9   : > { %v4512_v13 = vrot.slane %v3824_v26, %v9498_v36  ;;  %v4556_v39 = vrot.slane %v3863_v50, %v9483_v38 }
 0x2db   : > { %v4513_v27 = vsel %vm4394_vm8, %v4512_v13, %v4508_v3  ;;  %v4557_v29 = vsel %vm4380_vm2, %v4556_v39, %v4552_v9 }
 0x2dc   : > { %v3828_v43 = vpop.xlane.xlu0 %3827  ;;  %v3867_v25 = vpop.xlane.xlu1 %3866 }
 0x2dd   : > { %v4517_v42 = vrot.slane %v3828_v43, %v9514_v12  ;;  %v4561_v22 = vrot.slane %v3867_v25, %v9488_v15 }
 0x2df   : > { %v4518_v7 = vsel %vm4401_vm1, %v4517_v42, %v4513_v27  ;;  %v4562_v19 = vsel %vm4387_vm7, %v4561_v22, %v4557_v29 }
 0x2e0   : > { %v3832_v30 = vpop.xlane.xlu0 %3831  ;;  %v3871_v6 = vpop.xlane.xlu1 %3870 }
 0x2e1   : > { %v4522_v34 = vrot.slane %v3832_v30, %v9525_v24  ;;  %v4566_v55 = vrot.slane %v3871_v6, %v9498_v36 }
 0x2e3   : > { %v4523_v46 = vsel %vm4408_vm13, %v4522_v34, %v4518_v7  ;;  %v4567_v63 = vsel %vm4394_vm8, %v4566_v55, %v4562_v19 }
 0x2e4   : > { %v3836_v58 = vpop.xlane.xlu0 %3835  ;;  %v3875_v37 = vpop.xlane.xlu1 %3874 }
 0x2e5   : > { %v4527_v1 = vrot.slane %v3836_v58, %v9545_v40  ;;  %v4571_v33 = vrot.slane %v3875_v37, %v9514_v12 }
 0x2e7   : > { %v4528_v16 = vsel %vm4415_vm10, %v4527_v1, %v4523_v46  ;;  %v4572_v52 = vsel %vm4401_vm1, %v4571_v33, %v4567_v63 }
 0x2e8   : > { %v3883_v47 = vpop.xlane.xlu0 %3882 }
 0x2e9   : > { %v4581_v5 = vrot.slane %v3883_v47, %v9545_v40 }
 0x2eb   : > { %v3879_v60 = vpop.xlane.xlu1 %3878 }
 0x2ec   : > { %v4576_v45 = vrot.slane %v3879_v60, %v9525_v24  ;;  %v4130_v32 = vpop.xlane.xlu0 %4129 }
 0x2ed   : > { %v4650_v56 = vrot.slane %v4130_v32, %v9471_v2 }
 0x2ee   : > { %v4577_v51 = vsel %vm4408_vm13, %v4576_v45, %v4572_v52 }
 0x2ef   : > { %v9619_v0 = vsel %vm4415_vm10, %v4581_v5, %v4577_v51  ;;  %v3840_v21 = vpop.xlane.xlu1 %3839 }
 0x2f0   : > { %v4532_v20 = vrot.slane %v3840_v21, %v9564_v62  ;;  %v4173_v48 = vpop.xlane.xlu0 %4172 }
 0x2f1   : > { %v4700_v3 = vrot.slane %v4173_v48, %v9468_v18 }
 0x2f2   : > { %v4533_v8 = vsel %vm4422_vm15, %v4532_v20, %v4528_v16 }
 0x2f3   : > { %v3847_v54 = vpop.xlane.xlu1 %3846 }
 0x2f4   : > { %v4537_v14 = vrot.slane %v3847_v54, %v9574_v41  ;;  %v4134_v49 = vpop.xlane.xlu0 %4133 }
 0x2f5   : > { %v4655_v44 = vrot.slane %v4134_v49, %v9475_v28 }
 0x2f6   : > { %v4538_v10 = vsel %vm4429_vm0, %v4537_v14, %v4533_v8 }
 0x2f7   : > { %v9626_v23 = vsel %vm4595_vm5, %v4538_v10, %v4594_v17 }
 0x2f8   : > { %v4138_v59 = vpop.xlane.xlu0 %4137 }
 0x2f9   : > { %v4126_v31 = vpop.xlane.xlu1 %4125  ;;  %v4660_v35 = vrot.slane %v4138_v59, %v9483_v38 }
 0x2fa   : > { %v4646_v53 = vrot.slane %v4126_v31, %v9468_v18 }
 0x2fc   : > { %v4651_v57 = vsel %vm4366_vm12, %v4650_v56, %v4646_v53  ;;  %v4189_v26 = vpop.xlane.xlu0 %4188 }
 0x2fd   : > { %v4656_v4 = vsel %vm4373_vm6, %v4655_v44, %v4651_v57  ;;  %v4177_v61 = vpop.xlane.xlu1 %4176  ;;  %v4719_v25 = vrot.slane %v4189_v26, %v9488_v15 }
 0x2fe   : > { %v4704_v17 = vrot.slane %v4177_v61, %v9471_v2  ;;  %v4661_v11 = vsel %vm4380_vm2, %v4660_v35, %v4656_v4 }
 0x300   : > { %v4705_v13 = vsel %vm4366_vm12, %v4704_v17, %v4700_v3  ;;  %v4193_v50 = vpop.xlane.xlu0 %4192 }
 0x301   : > { %v4181_v9 = vpop.xlane.xlu1 %4180  ;;  %v4724_v32 = vrot.slane %v4193_v50, %v9498_v36 }
 0x302   : > { %v4709_v27 = vrot.slane %v4181_v9, %v9475_v28 }
 0x304   : > { %v4150_v42 = vpop.xlane.xlu0 %4149  ;;  %v4710_v29 = vsel %vm4373_vm6, %v4709_v27, %v4705_v13 }
 0x305   : > { %v4185_v39 = vpop.xlane.xlu1 %4184  ;;  %v4675_v52 = vrot.slane %v4150_v42, %v9514_v12 }
 0x306   : > { %v4714_v43 = vrot.slane %v4185_v39, %v9483_v38 }
 0x308   : > { %v4715_v7 = vsel %vm4380_vm2, %v4714_v43, %v4710_v29  ;;  %v4154_v34 = vpop.xlane.xlu0 %4153 }
 0x309   : > { %v4720_v22 = vsel %vm4387_vm7, %v4719_v25, %v4715_v7  ;;  %v4142_v30 = vpop.xlane.xlu1 %4141  ;;  %v4680_v51 = vrot.slane %v4154_v34, %v9525_v24 }
 0x30a   : > { %v4665_v58 = vrot.slane %v4142_v30, %v9488_v15  ;;  %v4725_v14 = vsel %vm4394_vm8, %v4724_v32, %v4720_v22 }
 0x30c   : > { %v4158_v6 = vpop.xlane.xlu0 %4157  ;;  %v4666_v16 = vsel %vm4387_vm7, %v4665_v58, %v4661_v11 }
 0x30d   : > { %v4146_v19 = vpop.xlane.xlu1 %4145  ;;  %v4685_v48 = vrot.slane %v4158_v6, %v9545_v40 }
 0x30e   : > { %v4670_v1 = vrot.slane %v4146_v19, %v9498_v36 }
 0x310   : > { %v4162_v55 = vpop.xlane.xlu0 %4161  ;;  %v4671_v33 = vsel %vm4394_vm8, %v4670_v1, %v4666_v16 }
 0x311   : > { %v4197_v46 = vpop.xlane.xlu1 %4196  ;;  %v4676_v5 = vsel %vm4401_vm1, %v4675_v52, %v4671_v33  ;;  %v4690_v10 = vrot.slane %v4162_v55, %v9564_v62 }
 0x312   : > { %v4729_v45 = vrot.slane %v4197_v46, %v9514_v12  ;;  %v4681_v49 = vsel %vm4408_vm13, %v4680_v51, %v4676_v5 }
 0x313   : > { %v4686_v35 = vsel %vm4415_vm10, %v4685_v48, %v4681_v49 }
 0x314   : > { %v4169_v37 = vpop.xlane.xlu0 %4168  ;;  %v4730_v44 = vsel %vm4401_vm1, %v4729_v45, %v4725_v14  ;;  %v4691_v3 = vsel %vm4422_vm15, %v4690_v10, %v4686_v35 }
 0x315   : > { %v4201_v63 = vpop.xlane.xlu1 %4200  ;;  %v4695_v56 = vrot.slane %v4169_v37, %v9574_v41 }
 0x316   : > { %v4734_v21 = vrot.slane %v4201_v63, %v9525_v24 }
 0x317   : > { %v4696_v11 = vsel %vm4429_vm0, %v4695_v56, %v4691_v3 }
 0x318   : > { %v4220_v60 = vpop.xlane.xlu0 %4219  ;;  %v4735_v53 = vsel %vm4408_vm13, %v4734_v21, %v4730_v44 }
 0x319   : > { %v4205_v47 = vpop.xlane.xlu1 %4204  ;;  %v4754_v6 = vrot.slane %v4220_v60, %v9468_v18 }
 0x31a   : > { %v4739_v8 = vrot.slane %v4205_v47, %v9545_v40 }
 0x31c   : > { %v4228_v54 = vpop.xlane.xlu0 %4227  ;;  %v4740_v57 = vsel %vm4415_vm10, %v4739_v8, %v4735_v53 }
 0x31d   : > { %v4209_v20 = vpop.xlane.xlu1 %4208  ;;  %v4763_v1 = vrot.slane %v4228_v54, %v9475_v28 }
 0x31e   : > { %v4744_v31 = vrot.slane %v4209_v20, %v9564_v62 }
 0x320   : > { %v4271_v61 = vpop.xlane.xlu0 %4270  ;;  %v4745_v17 = vsel %vm4422_vm15, %v4744_v31, %v4740_v57 }
 0x321   : > { %v4216_v59 = vpop.xlane.xlu1 %4215  ;;  %v4812_v33 = vrot.slane %v4271_v61, %v9471_v2 }
 0x322   : > { %v4749_v4 = vrot.slane %v4216_v59, %v9574_v41 }
 0x324   : > { %v4750_v26 = vsel %vm4429_vm0, %v4749_v4, %v4745_v17  ;;  %v4275_v50 = vpop.xlane.xlu0 %4274 }
 0x325   : > { %v9671_v13 = vsel %vm4593_vm9, %v4750_v26, %v4696_v11  ;;  %v4224_v9 = vpop.xlane.xlu1 %4223  ;;  %v4817_v52 = vrot.slane %v4275_v50, %v9475_v28 }
 0x326   : > { %v4758_v30 = vrot.slane %v4224_v9, %v9471_v2 }
 0x328   : > { %v4279_v39 = vpop.xlane.xlu0 %4278  ;;  %v4759_v46 = vsel %vm4366_vm12, %v4758_v30, %v4754_v6 }
 0x329   : > { %v4267_v27 = vpop.xlane.xlu1 %4266  ;;  %v4764_v47 = vsel %vm4373_vm6, %v4763_v1, %v4759_v46  ;;  %v4822_v51 = vrot.slane %v4279_v39, %v9483_v38 }
 0x32a   : > { %v4808_v63 = vrot.slane %v4267_v27, %v9468_v18 }
 0x32c   : > { %v4240_v42 = vpop.xlane.xlu0 %4239  ;;  %v4813_v32 = vsel %vm4366_vm12, %v4812_v33, %v4808_v63  ;;  %vm4597_vm12 = vcmask 1043459  }
 0x32d   : > { %v4232_v43 = vpop.xlane.xlu1 %4231  ;;  %v4778_v5 = vrot.slane %v4240_v42, %v9498_v36  ;;  %v4818_v54 = vsel %vm4373_vm6, %v4817_v52, %v4813_v32  ;;  %vm10263_vm6 = vcmask 687104  }
 0x32e   : > { %v4768_v55 = vrot.slane %v4232_v43, %v9483_v38  ;;  %v4823_v31 = vsel %vm4380_vm2, %v4822_v51, %v4818_v54 }
 0x330   : > { %v4244_v25 = vpop.xlane.xlu0 %4243  ;;  %v4769_v60 = vsel %vm4380_vm2, %v4768_v55, %v4764_v47  ;;  %vm10265_vm2 = vmmov %vm10263_vm6 }
 0x331   : > { %v4236_v29 = vpop.xlane.xlu1 %4235  ;;  %v4783_v21 = vrot.slane %v4244_v25, %v9514_v12 }
 0x332   : > { %v4773_v37 = vrot.slane %v4236_v29, %v9488_v15 }
 0x334   : > { %v4248_v22 = vpop.xlane.xlu0 %4247  ;;  %v4774_v18 = vsel %vm4387_vm7, %v4773_v37, %v4769_v60 }
 0x335   : > { %v4283_v7 = vpop.xlane.xlu1 %4282  ;;  %v4788_v48 = vrot.slane %v4248_v22, %v9525_v24  ;;  %v4779_v14 = vsel %vm4394_vm8, %v4778_v5, %v4774_v18  ;;  %v10264_v22 = vmov 0.0  }
 0x336   : > { %v4827_v2 = vrot.slane %v4283_v7, %v9488_v15  ;;  %v4784_v44 = vsel %vm4401_vm1, %v4783_v21, %v4779_v14 }
 0x337   : > { %v4789_v59 = vsel %vm4408_vm13, %v4788_v48, %v4784_v44  ;;  %v363_v48 = vld [vmem:[%s9966_s6 + $0x8] sm:$0xf] }
 0x338   : > { %v4252_v19 = vpop.xlane.xlu0 %4251  ;;  %v4828_v53 = vsel %vm4387_vm7, %v4827_v2, %v4823_v31  ;;  %vm10266_vm7 = vmmov 0  }
 0x339   : > { %v4287_v34 = vpop.xlane.xlu1 %4286  ;;  %v4793_v8 = vrot.slane %v4252_v19, %v9545_v40  ;;  %v9744_v19 = vld [vmem:[%s7845_s13] sm:$0xff] }
 0x33a   : > { %v4832_v28 = vrot.slane %v4287_v34, %v9498_v36  ;;  %v10270_v34 = vld [vmem:[#allocation9_spill] sm:$0xff] }
 0x33b   : > { %v4794_v57 = vsel %vm4415_vm10, %v4793_v8, %v4789_v59 }
 0x33c   : > { %v4256_v16 = vpop.xlane.xlu0 %4255 }
 0x33d   : > { %v4291_v58 = vpop.xlane.xlu1 %4290  ;;  %v4798_v38 = vrot.slane %v4256_v16, %v9564_v62 }
 0x33e   : > { %v4837_v49 = vrot.slane %v4291_v58, %v9514_v12  ;;  %v4833_v12 = vsel %vm4394_vm8, %v4832_v28, %v4828_v53  ;;  %vm10267_vm8 = vmmov %vm10259_vm11 }
 0x33f   : > { %v4799_v61 = vsel %vm4422_vm15, %v4798_v38, %v4794_v57 }
 0x340   : > { %v4263_v20 = vpop.xlane.xlu0 %4262  ;;  %v4838_v4 = vsel %vm4401_vm1, %v4837_v49, %v4833_v12  ;;  %vm10268_vm1 = vmmov %vm10267_vm8 }
 0x341   : > { %v4295_v45 = vpop.xlane.xlu1 %4294  ;;  %v4803_v56 = vrot.slane %v4263_v20, %v9574_v41  ;;  %vm10271_vm11 = vmmov %vm10268_vm1 }
 0x342   : > { %v4842_v15 = vrot.slane %v4295_v45, %v9525_v24  ;;  %vm10274_vm4 = vmmov %vm10268_vm1 }
 0x343   : > { %v4804_v11 = vsel %vm4429_vm0, %v4803_v56, %v4799_v61  ;;  %vm10275_vm14 = vmmov %vm10268_vm1 }
 0x344   : > { %v4310_v36 = vpop.xlane.xlu0 %4309  ;;  %v4843_v17 = vsel %vm4408_vm13, %v4842_v15, %v4838_v4  ;;  %v4860_v39 = vsel %vm4595_vm5, %v4804_v11, %v9671_v13  ;;  %v9739_v13 = vld [vmem:[%s7845_s13 + $0x8] sm:$0xff]  ;;  %vm5099_vm13 = vcmask 1031168   ;;  %s7723_s13 = smov 124  }
 0x345   : > { %v4299_v10 = vpop.xlane.xlu1 %4298  ;;  %v4857_v24 = vrot.slane %v4310_v36, %v9574_v41  ;;  %5095 = vrot.lane.b32.xlu1 %v9739_v13, %s7722_s25  ;;  %v364_v11 = vld [vmem:[%s9966_s6 + $0xc] sm:$0xf] }
 0x346   : > { %v4847_v35 = vrot.slane %v4299_v10, %v9545_v40 }
 0x348   : > { %v3887_v9 = vpop.xlane.xlu0 %3886  ;;  %v4848_v40 = vsel %vm4415_vm10, %v4847_v35, %v4843_v17  ;;  %vm10272_vm10 = vcmask 31744  }
 0x349   : > { %v4303_v3 = vpop.xlane.xlu1 %4302  ;;  %v4586_v50 = vrot.slane %v3887_v9, %v9564_v62  ;;  %5091 = vrot.lane.b32.xlu1 %v9744_v19, %s7722_s25  ;;  %vm10273_vm3 = vmmov %vm10272_vm10 }
 0x34a   : > { %v4852_v26 = vrot.slane %v4303_v3, %v9564_v62  ;;  %vm10277_vm9 = vmmov %vm10273_vm3 }
 0x34b   : > { %v4587_v29 = vsel %vm4422_vm15, %v4586_v50, %v9619_v0  ;;  %v361_v0 = vld [vmem:[%s9966_s6] sm:$0xf]  ;;  %vm10278_vm5 = vmmov %vm10273_vm3 }
 0x34c   : > { %v4853_v27 = vsel %vm4422_vm15, %v4852_v26, %v4848_v40  ;;  %7442 = vmatpush3.msk.msra.mxu1 %vm10267_vm8, %v361_v0  ;;  %vm10276_vm15 = vmmov %vm10268_vm1  ;;  %v10295_v40 = vld [vmem:[#allocation10_spill] sm:$0xff] }
 0x34d   : > { %v4858_v43 = vsel %vm4429_vm0, %v4857_v24, %v4853_v27  ;;  %v3894_v42 = vpop.xlane.xlu1 %3893  ;;  %vm10282_vm8 = vmmov %vm10273_vm3 }
 0x34e   : > { %v4591_v25 = vrot.slane %v3894_v42, %v9574_v41  ;;  %v4861_v7 = vsel %vm4597_vm12, %v4858_v43, %v4860_v39  ;;  %v362_v41 = vld [vmem:[%s9966_s6 + $0x4] sm:$0xf] }
 0x34f   : > { %7437 = vmatpush3.xpose.msk.msra.mxu0 %vm10263_vm6, %v4861_v7  ;;  %vm10280_vm6 = vmmov %vm10268_vm1  ;;  %v365_v7 = vld [vmem:[%s9966_s6 + $0x10] sm:$0xf] }
 0x350   : > { %v4592_v62 = vsel %vm4429_vm0, %v4591_v25, %v4587_v29  ;;  %7446 = vmatprep.subr.mxu0 %v10264_v22  ;;  %vm5484_vm0 = vcmask 1014784  }
 0x351   : > { %v4598_v30 = vsel %vm4597_vm12, %v4592_v62, %v9626_v23  ;;  %v10269_v23 = vld [vmem:[#allocation8_spill] sm:$0xff]  ;;  %vm10279_vm12 = vmmov %vm10268_vm1 }
 0x352   : > { %7439 = vmatmul.mubr.msk.f32.vlgmr.msra.gmra.mxu0 %vm10265_vm2, %v4598_v30  ;;  %5093 = vrot.lane.b32.xlu0 %v10269_v23, %s7722_s25  ;;  %vm10281_vm2 = vmmov %vm10268_vm1  ;;  %v10298_v30 = vld [vmem:[#allocation11_spill] sm:$0xff] }
 0x353   : > { %7448 = vmatprep.mubr.msk.f32.mxu0 %vm10266_vm7, %v10264_v22  ;;  %7447 = vmatpush3.msk.msra.mxu0 %vm10268_vm1, %v362_v41  ;;  %vm10283_vm1 = vmmov %vm10273_vm3  ;;  %v10302_v41 = vld [vmem:[#allocation12_spill] sm:$0xff] }
 0x354   : > { %7451 = vmatprep.subr.mxu0 %v10264_v22  ;;  %5478 = vrot.lane.b32.xlu1 %v10269_v23, %s7723_s13 }
 0x356   : > { %5097 = vrot.lane.b32.xlu0 %v10270_v34, %s7722_s25  ;;  %s7004_s25 = scalar_lea.sflag [#allocation4], %s326_s12 }
 0x358   : > { %5476 = vrot.lane.b32.xlu1 %v9744_v19, %s7723_s13 }
 0x35a   : > { %5480 = vrot.lane.b32.xlu0 %v9739_v13, %s7723_s13 }
 0x35c   : > { %5716 = vrot.lane.b32.xlu1 %v10269_v23, %s7724_s26 }
 0x35e   : > { %5482 = vrot.lane.b32.xlu0 %v10270_v34, %s7723_s13 }
 0x360   : > { %5714 = vrot.lane.b32.xlu1 %v9744_v19, %s7724_s26 }
 0x362   : > { %5718 = vrot.lane.b32.xlu0 %v9739_v13, %s7724_s26 }
 0x364   : > { %6394 = vrot.lane.b32.xlu1 %v10269_v23, %s7725_s21 }
 0x366   : > { %5720 = vrot.lane.b32.xlu0 %v10270_v34, %s7724_s26  ;;  %s7644_s26 = sshll.u32 %s7726_s9, 4  ;;  %s7645_s26 = int_to_ptr.vmem [resolvable:$false] %s7644_s26 }
 0x367   : > { %s7646_s10 = scalar_lea.vmem %s7645_s26, 384 }
 0x368   : > { %6392 = vrot.lane.b32.xlu1 %v9744_v19, %s7725_s21 }
 0x36a   : > { %6396 = vrot.lane.b32.xlu0 %v9739_v13, %s7725_s21 }
 0x36e   : > { %6398 = vrot.lane.b32.xlu0 %v10270_v34, %s7725_s21  ;;  %v10312_v34 = vld [vmem:[#allocation15_spill] sm:$0xff]  ;;  %s7018_s21 = sshll.u32 %s328_s20, 4  ;;  %s7019_s21 = int_to_ptr.vmem [resolvable:$true] %s7018_s21 }
 0x36f   : > { %s7640_s13 = scalar_lea.vmem %s7019_s21, 192  ;;  %p7647_p11 = scmp.lt.s32.totalorder %s7019_s21, %s7645_s26 }
 0x370   : > { %p7641_p6 = scmp.ne.s32.totalorder %s7019_s21, %s7640_s13  ;;  %p7648_p12 = scmp.lt.s32.totalorder %s7646_s10, %s7640_s13 }
 0x372   : > { %p7642_p9 = pnand %p7641_p6, %p7810_p5  ;;  %p7649_p13 = por %p7648_p12, %p7647_p11 }
 0x374   : > { %p7643_p10 = pneg %p7642_p9 }
 0x376   : > { %p7650_p0 = pnand %p7649_p13, %p7643_p10 }
 0x3b7   : > { %v5096_v37 = vpop.permute.xlu1 %5095 }
 0x3bb   : > { %v5092_v47 = vpop.permute.xlu1 %5091 }
 0x3c4   : > { %v5094_v63 = vpop.permute.xlu0 %5093 }
 0x3c5   : > { %v5101_v16 = vsel %vm5099_vm13, %v5094_v63, %v5096_v37  ;;  %v5100_v60 = vsel %vm5099_vm13, %v5092_v47, %v5094_v63 }
 0x3c6   : > { %7208 = vmatprep.subr.msk.mxu1 %vm10271_vm11, %v5101_v16  ;;  %v5479_v45 = vpop.permute.xlu1 %5478  ;;  %vm10285_vm11 = vmmov %vm10283_vm1 }
 0x3c8   : > { %v5098_v33 = vpop.permute.xlu0 %5097 }
 0x3c9   : > { %v5102_v52 = vsel %vm5099_vm13, %v5096_v37, %v5098_v33  ;;  %vm10284_vm13 = vmmov %vm10281_vm2  ;;  %v366_v33 = vld [vmem:[%s9966_s6 + $0x14] sm:$0xf] }
 0x3ca   : > { %v5477_v28 = vpop.permute.xlu1 %5476 }
 0x3cb   : > { %v5485_v8 = vsel %vm5484_vm0, %v5477_v28, %v5479_v45 }
 0x3cc   : > { %v5481_v32 = vpop.permute.xlu0 %5480 }
 0x3cd   : > { %v5486_v21 = vsel %vm5484_vm0, %v5479_v45, %v5481_v32 }
 0x3ce   : > { %v5717_v31 = vpop.permute.xlu1 %5716 }
 0x3d0   : > { %v5483_v54 = vpop.permute.xlu0 %5482 }
 0x3d1   : > { %v5487_v14 = vsel %vm5484_vm0, %v5481_v32, %v5483_v54  ;;  %vm10290_vm0 = vmmov %vm10283_vm1 }
 0x3d2   : > { %v5715_v15 = vpop.permute.xlu1 %5714 }
 0x3d4   : > { %v5719_v49 = vpop.permute.xlu0 %5718 }
 0x3d6   : > { %v6395_v45 = vpop.permute.xlu1 %6394 }
 0x3d8   : > { %v5721_v38 = vpop.permute.xlu0 %5720 }
 0x412   : > { %v4932_v6 = vpop.f32.mrf.mxu0 }
 0x413   : > { %v7203_v46 = vmul.f32 -1.442695, %v4932_v6  ;;  %v10304_v6 = vld [vmem:[#allocation13_spill] sm:$0xff] }
 0x414   : > { %v7440_v55 = vpop.f32.mrf.mxu0 }
 0x415   : > { %7608 = vpow2.f32 %v7203_v46 }
 0x422   : > { %v7609_v58 = vpop.eup %7608 }
 0x423   : > { %v4939_v1 = vadd.f32 1.0, %v7609_v58 }
 0x425   : > { %7610 = vrcp.f32 %v4939_v1 }
 0x432   : > { %v9748_v5 = vpop.eup %7610 }
 0x433   : > { %7444 = vmatmul.mubr.msk.f32.vlgmr.msra.gmra.mxu1 %vm10272_vm10, %v9748_v5  ;;  %7449 = vmatmul.mubr.msk.f32.vlgmr.msra.gmra.mxu0 %vm10273_vm3, %v9748_v5  ;;  %vm10286_vm10 = vmmov %vm10281_vm2 }
 0x434   : > { %7452 = vmatpush3.msk.msra.mxu0 %vm10274_vm4, %v5102_v52  ;;  %7209 = vmatpush1.msk.msra.mxu1 %vm10275_vm14, %v5100_v60  ;;  %vm10287_vm3 = vmmov %vm10281_vm2  ;;  %vm5722_vm4 = vcmask 719872  }
 0x435   : > { %5176 = vmatprep.mubr.f32.mxu1 %v10264_v22  ;;  %7453 = vmatprep.mubr.msk.f32.mxu0 %vm10266_vm7, %v10264_v22  ;;  %v5725_v10 = vsel %vm5722_vm4, %v5719_v49, %v5721_v38  ;;  %v5724_v44 = vsel %vm5722_vm4, %v5717_v31, %v5719_v49  ;;  %vm10288_vm14 = vmmov %vm10281_vm2  ;;  %v5723_v56 = vsel %vm5722_vm4, %v5715_v15, %v5717_v31 }
 0x436   : > { %7213 = vmatprep.subr.msk.mxu1 %vm10276_vm15, %v10269_v23  ;;  %7456 = vmatprep.subr.mxu0 %v10264_v22  ;;  %vm10289_vm15 = vmmov %vm10283_vm1  ;;  %v10308_v23 = vld [vmem:[#allocation14_spill] sm:$0xff] }
 0x437   : > { %vm10305_vm4 = vmmov %vm10281_vm2 }
 0x4f3   : > { %v5014_v51 = vpop.f32.mrf.mxu1  ;;  %v5087_v18 = vpop.f32.mrf.mxu0 }
 0x4f4   : > { %7210 = vmatmul.mubr.msk.f32.vlgmr.msra.gmra.mxu1 %vm10277_vm9, %v5087_v18  ;;  %7454 = vmatmul.mubr.msk.f32.vlgmr.msra.gmra.mxu0 %vm10278_vm5, %v5087_v18  ;;  %vm10291_vm9 = vmmov %vm10281_vm2 }
 0x4f5   : > { %v7445_v20 = vpop.f32.mrf.mxu1  ;;  %v7450_v2 = vpop.f32.mrf.mxu0  ;;  %7214 = vmatpush1.msk.msra.mxu1 %vm10279_vm12, %v9744_v19  ;;  %5326 = vmatprep.mubr.f32.mxu1 %v10264_v22  ;;  %vm10292_vm5 = vmmov %vm10281_vm2 }
 0x4f6   : > { %7457 = vmatpush3.msk.msra.mxu0 %vm10280_vm6, %v9739_v13  ;;  %7458 = vmatprep.mubr.msk.f32.mxu0 %vm10266_vm7, %v10264_v22  ;;  %vm10293_vm12 = vmmov %vm10290_vm0  ;;  %v6397_v19 = vpop.permute.xlu0 %6396 }
 0x4f7   : > { %7461 = vmatprep.subr.mxu1 %v10264_v22  ;;  %7220 = vmatprep.subr.msk.mxu0 %vm10281_vm2, %v5486_v21  ;;  %vm10294_vm6 = vmmov %vm10281_vm2 }
 0x4f8   : > { %7215 = vmatmul.mubr.msk.f32.vlgmr.msra.gmra.mxu1 %vm10282_vm8, %v5014_v51  ;;  %7459 = vmatmul.mubr.msk.f32.vlgmr.msra.gmra.mxu0 %vm10283_vm1, %v5014_v51  ;;  %vm10296_vm8 = vmmov %vm10290_vm0  ;;  %v6393_v51 = vpop.permute.xlu1 %6392 }
 0x4f9   : > { %7462 = vmatpush3.msk.msra.mxu1 %vm10284_vm13, %v363_v48  ;;  %7463 = vmatprep.mubr.msk.f32.mxu1 %vm10266_vm7, %v10264_v22  ;;  %vm10297_vm1 = vmmov %vm10290_vm0 }
 0x4fa   : > { %7466 = vmatprep.subr.mxu1 %v10264_v22  ;;  %5561 = vmatprep.mubr.f32.mxu0 %v10264_v22  ;;  %vm10299_vm13 = vmmov %vm10281_vm2  ;;  %v6399_v52 = vpop.permute.xlu0 %6398 }
 0x4fb   : > { %7221 = vmatpush1.msk.msra.mxu0 %vm10286_vm10, %v5485_v8  ;;  %vm10301_vm10 = vmmov %vm10290_vm0 }
 0x4fc   : > { %7464 = vmatmul.mubr.msk.f32.vlgmr.msra.gmra.mxu1 %vm10285_vm11, %v9748_v5  ;;  %7471 = vmatprep.subr.mxu0 %v10264_v22  ;;  %vm10300_vm11 = vmmov %vm10281_vm2 }
 0x4fd   : > { %7468 = vmatprep.mubr.msk.f32.mxu1 %vm10266_vm7, %v10264_v22  ;;  %7467 = vmatpush3.msk.msra.mxu1 %vm10287_vm3, %v5487_v14  ;;  %vm10303_vm3 = vmmov %vm10281_vm2  ;;  %v367_v14 = vld [vmem:[%s9966_s6 + $0x18] sm:$0xf] }
 0x4fe   : > { %7227 = vmatprep.subr.msk.mxu1 %vm10288_vm14, %v5724_v44  ;;  %vm10306_vm14 = vmmov %vm10290_vm0 }
 0x5b4   : > { %v5178_v36 = vpop.f32.mrf.mxu1  ;;  %v5249_v53 = vpop.f32.mrf.mxu0 }
 0x5b6   : > { %v5180_v59 = vpop.f32.mrf.mxu1  ;;  %v7455_v35 = vpop.f32.mrf.mxu0 }
 0x5b7   : > { %v368_v35 = vld [vmem:[%s9966_s6 + $0x1c] sm:$0xf] }
 0x5b8   : > { %v5328_v12 = vpop.f32.mrf.mxu1  ;;  %v5399_v57 = vpop.f32.mrf.mxu0 }
 0x5b9   : > { %v5329_v4 = vadd.f32 %v5328_v12, %v5178_v36  ;;  %v5400_v61 = vadd.f32 %v5399_v57, %v5249_v53  ;;  %v10324_v57 = vld [vmem:[#allocation17_spill] sm:$0xff] }
 0x5ba   : > { %v5330_v3 = vpop.f32.mrf.mxu1  ;;  %v7460_v24 = vpop.f32.mrf.mxu0 }
 0x5bb   : > { %v5331_v17 = vadd.f32 %v5330_v3, %v5180_v59  ;;  %v10329_v3 = vld [vmem:[#allocation19_spill] sm:$0xff] }
 0x5bc   : > { %v5472_v26 = vpop.f32.mrf.mxu1 }
 0x5bd   : > { %7222 = vmatmul.mubr.msk.f32.vlgmr.msra.gmra.mxu0 %vm10289_vm15, %v5472_v26  ;;  %7469 = vmatmul.mubr.msk.f32.vlgmr.msra.gmra.mxu1 %vm10290_vm0, %v5472_v26  ;;  %vm10307_vm15 = vmmov %vm10290_vm0 }
 0x5be   : > { %v7465_v9 = vpop.f32.mrf.mxu1  ;;  %7472 = vmatpush3.msk.msra.mxu0 %vm10291_vm9, %v364_v11  ;;  %7473 = vmatprep.mubr.msk.f32.mxu0 %vm10266_vm7, %v10264_v22  ;;  %vm10309_vm0 = vmmov %vm10281_vm2 }
 0x5bf   : > { %7476 = vmatprep.subr.mxu0 %v10264_v22  ;;  %7228 = vmatpush1.msk.msra.mxu1 %vm10292_vm5, %v5723_v56  ;;  %vm10310_vm9 = vmmov %vm10309_vm0 }
 0x5c0   : > { %5799 = vmatprep.mubr.f32.mxu1 %v10264_v22  ;;  %7481 = vmatprep.subr.mxu1 %v10264_v22  ;;  %vm10311_vm5 = vmmov %vm10297_vm1 }
 0x5c1   : > { %7474 = vmatmul.mubr.msk.f32.vlgmr.msra.gmra.mxu0 %vm10293_vm12, %v9748_v5  ;;  %vm10313_vm12 = vmmov %vm10309_vm0 }
 0x5c2   : > { %7477 = vmatpush3.msk.msra.mxu0 %vm10294_vm6, %v5725_v10  ;;  %7478 = vmatprep.mubr.msk.f32.mxu0 %vm10266_vm7, %v10264_v22  ;;  %vm6400_vm6 = vcmask 392192   ;;  %v10320_v10 = vld [vmem:[#allocation16_spill] sm:$0xff] }
 0x5c3   : > { %7234 = vmatprep.subr.msk.mxu0 %vm10281_vm2, %v10295_v40  ;;  %v6403_v60 = vsel %vm6400_vm6, %v6397_v19, %v6399_v52  ;;  %v6402_v32 = vsel %vm6400_vm6, %v6395_v45, %v6397_v19  ;;  %vm10314_vm2 = vmmov %vm10309_vm0  ;;  %v6401_v18 = vsel %vm6400_vm6, %v6393_v51, %v6395_v45 }
 0x5c4   : > { %vm10330_vm6 = vmmov %vm10309_vm0 }
 0x67d   : > { %v5563_v50 = vpop.f32.mrf.mxu0  ;;  %v5634_v27 = vpop.f32.mrf.mxu1 }
 0x67e   : > { %v5638_v39 = vadd.f32 %v5563_v50, %v5329_v4  ;;  %v5640_v43 = vadd.f32 %v5634_v27, %v5400_v61  ;;  %v10327_v61 = vld [vmem:[#allocation18_spill] sm:$0xff]  ;;  %v369_v27 = vld [vmem:[%s9966_s6 + $0x20] sm:$0xf] }
 0x67f   : > { %v5565_v42 = vpop.f32.mrf.mxu0  ;;  %v7470_v29 = vpop.f32.mrf.mxu1 }
 0x680   : > { %v5639_v25 = vadd.f32 %v5565_v42, %v5331_v17  ;;  %v10337_v29 = vld [vmem:[#allocation21_spill] sm:$0xff] }
 0x681   : > { %v5710_v62 = vpop.f32.mrf.mxu0 }
 0x682   : > { %7229 = vmatmul.mubr.msk.f32.vlgmr.msra.gmra.mxu1 %vm10296_vm8, %v5710_v62  ;;  %7479 = vmatmul.mubr.msk.f32.vlgmr.msra.gmra.mxu0 %vm10297_vm1, %v5710_v62  ;;  %vm10315_vm8 = vmmov %vm10297_vm1 }
 0x683   : > { %7235 = vmatpush1.msk.msra.mxu0 %vm10299_vm13, %v10298_v30  ;;  %v7475_v0 = vpop.f32.mrf.mxu0  ;;  %7482 = vmatpush3.msk.msra.mxu1 %vm10300_vm11, %v365_v7  ;;  %vm10316_vm13 = vmmov %vm10309_vm0 }
 0x684   : > { %7483 = vmatprep.mubr.msk.f32.mxu1 %vm10266_vm7, %v10264_v22  ;;  %7486 = vmatprep.subr.mxu1 %v10264_v22  ;;  %vm10317_vm11 = vmmov %vm10309_vm0 }
 0x685   : > { %6019 = vmatprep.mubr.f32.mxu0 %v10264_v22  ;;  %7491 = vmatprep.subr.mxu0 %v10264_v22 }
 0x686   : > { %7484 = vmatmul.mubr.msk.f32.vlgmr.msra.gmra.mxu1 %vm10301_vm10, %v9748_v5  ;;  %vm10318_vm10 = vmmov %vm10297_vm1 }
 0x687   : > { %7487 = vmatpush3.msk.msra.mxu1 %vm10303_vm3, %v10302_v41  ;;  %7488 = vmatprep.mubr.msk.f32.mxu1 %vm10266_vm7, %v10264_v22  ;;  %vm10319_vm3 = vmmov %vm10309_vm0 }
 0x688   : > { %7241 = vmatprep.subr.msk.mxu1 %vm10305_vm4, %v10304_v6  ;;  %vm10321_vm4 = vmmov %vm10309_vm0 }
 0x742   : > { %v5801_v46 = vpop.f32.mrf.mxu1  ;;  %v5872_v55 = vpop.f32.mrf.mxu0 }
 0x743   : > { %v5876_v58 = vadd.f32 %v5801_v46, %v5638_v39  ;;  %v5878_v1 = vadd.f32 %v5872_v55, %v5640_v43  ;;  %v10333_v43 = vld [vmem:[#allocation20_spill] sm:$0xff] }
 0x744   : > { %v5803_v63 = vpop.f32.mrf.mxu1  ;;  %v7480_v37 = vpop.f32.mrf.mxu0 }
 0x745   : > { %v5877_v16 = vadd.f32 %v5803_v63, %v5639_v25 }
 0x746   : > { %v5948_v47 = vpop.f32.mrf.mxu1 }
 0x747   : > { %7236 = vmatmul.mubr.msk.f32.vlgmr.msra.gmra.mxu0 %vm10306_vm14, %v5948_v47  ;;  %7489 = vmatmul.mubr.msk.f32.vlgmr.msra.gmra.mxu1 %vm10307_vm15, %v5948_v47  ;;  %vm10322_vm14 = vmmov %vm10297_vm1 }
 0x748   : > { %7242 = vmatpush1.msk.msra.mxu1 %vm10309_vm0, %v10308_v23  ;;  %v7485_v13 = vpop.f32.mrf.mxu1  ;;  %7492 = vmatpush3.msk.msra.mxu0 %vm10310_vm9, %v366_v33  ;;  %vm10323_vm15 = vmmov %vm10297_vm1 }
 0x749   : > { %7493 = vmatprep.mubr.msk.f32.mxu0 %vm10266_vm7, %v10264_v22  ;;  %7496 = vmatprep.subr.mxu0 %v10264_v22  ;;  %vm10325_vm9 = vmmov %vm10309_vm0 }
 0x74a   : > { %6239 = vmatprep.mubr.f32.mxu1 %v10264_v22  ;;  %7501 = vmatprep.subr.mxu1 %v10264_v22 }
 0x74b   : > { %7494 = vmatmul.mubr.msk.f32.vlgmr.msra.gmra.mxu0 %vm10311_vm5, %v9748_v5  ;;  %vm10326_vm5 = vmmov %vm10297_vm1 }
 0x74c   : > { %7497 = vmatpush3.msk.msra.mxu0 %vm10313_vm12, %v10312_v34  ;;  %7498 = vmatprep.mubr.msk.f32.mxu0 %vm10266_vm7, %v10264_v22  ;;  %vm10328_vm12 = vmmov %vm10309_vm0 }
 0x74d   : > { %7248 = vmatprep.subr.msk.mxu0 %vm10314_vm2, %v6402_v32  ;;  %vm10331_vm2 = vmmov %vm10297_vm1 }
 0x807   : > { %v6021_v21 = vpop.f32.mrf.mxu0  ;;  %v6092_v20 = vpop.f32.mrf.mxu1 }
 0x808   : > { %v6096_v2 = vadd.f32 %v6021_v21, %v5876_v58  ;;  %v6098_v48 = vadd.f32 %v6092_v20, %v5878_v1 }
 0x809   : > { %v6023_v28 = vpop.f32.mrf.mxu0  ;;  %v7490_v8 = vpop.f32.mrf.mxu1 }
 0x80a   : > { %v6097_v54 = vadd.f32 %v6023_v28, %v5877_v16 }
 0x80b   : > { %v6168_v49 = vpop.f32.mrf.mxu0 }
 0x80c   : > { %7243 = vmatmul.mubr.msk.f32.vlgmr.msra.gmra.mxu1 %vm10315_vm8, %v6168_v49  ;;  %7499 = vmatmul.mubr.msk.f32.vlgmr.msra.gmra.mxu0 %vm10297_vm1, %v6168_v49  ;;  %vm10332_vm8 = vmmov %vm10297_vm1 }
 0x80d   : > { %v7495_v38 = vpop.f32.mrf.mxu0  ;;  %7502 = vmatpush3.msk.msra.mxu1 %vm10316_vm13, %v367_v14  ;;  %7503 = vmatprep.mubr.msk.f32.mxu1 %vm10266_vm7, %v10264_v22  ;;  %vm10334_vm1 = vmmov %vm10309_vm0 }
 0x80e   : > { %7506 = vmatprep.subr.mxu1 %v10264_v22  ;;  %7249 = vmatpush1.msk.msra.mxu0 %vm10317_vm11, %v6401_v18  ;;  %vm10335_vm13 = vmmov %vm10309_vm0 }
 0x80f   : > { %6477 = vmatprep.mubr.f32.mxu0 %v10264_v22  ;;  %7511 = vmatprep.subr.mxu0 %v10264_v22  ;;  %vm10336_vm11 = vmmov %vm10331_vm2 }
 0x810   : > { %7504 = vmatmul.mubr.msk.f32.vlgmr.msra.gmra.mxu1 %vm10318_vm10, %v9748_v5  ;;  %vm10338_vm10 = vmmov %vm10309_vm0 }
 0x811   : > { %7507 = vmatpush3.msk.msra.mxu1 %vm10319_vm3, %v6403_v60  ;;  %7508 = vmatprep.mubr.msk.f32.mxu1 %vm10266_vm7, %v10264_v22  ;;  %vm10339_vm3 = vmmov %vm10331_vm2 }
 0x812   : > { %7255 = vmatprep.subr.msk.mxu1 %vm10321_vm4, %v10320_v10  ;;  %vm10340_vm4 = vmmov %vm10331_vm2 }
 0x8cc   : > { %v6241_v31 = vpop.f32.mrf.mxu1  ;;  %v6312_v44 = vpop.f32.mrf.mxu0 }
 0x8cd   : > { %v6316_v15 = vadd.f32 %v6241_v31, %v6096_v2  ;;  %v6318_v56 = vadd.f32 %v6312_v44, %v6098_v48 }
 0x8ce   : > { %v6243_v36 = vpop.f32.mrf.mxu1  ;;  %v7500_v53 = vpop.f32.mrf.mxu0 }
 0x8cf   : > { %v6317_v59 = vadd.f32 %v6243_v36, %v6097_v54 }
 0x8d0   : > { %v6388_v12 = vpop.f32.mrf.mxu1 }
 0x8d1   : > { %7250 = vmatmul.mubr.msk.f32.vlgmr.msra.gmra.mxu0 %vm10322_vm14, %v6388_v12  ;;  %7509 = vmatmul.mubr.msk.f32.vlgmr.msra.gmra.mxu1 %vm10323_vm15, %v6388_v12 }
 0x8d2   : > { %7256 = vmatpush1.msk.msra.mxu1 %vm10309_vm0, %v10324_v57  ;;  %v7505_v4 = vpop.f32.mrf.mxu1  ;;  %7512 = vmatpush3.msk.msra.mxu0 %vm10325_vm9, %v368_v35 }
 0x8d3   : > { %7513 = vmatprep.mubr.msk.f32.mxu0 %vm10266_vm7, %v10264_v22  ;;  %7516 = vmatprep.subr.mxu0 %v10264_v22 }
 0x8d4   : > { %6697 = vmatprep.mubr.f32.mxu1 %v10264_v22  ;;  %7521 = vmatprep.subr.mxu1 %v10264_v22 }
 0x8d5   : > { %7514 = vmatmul.mubr.msk.f32.vlgmr.msra.gmra.mxu0 %vm10326_vm5, %v9748_v5 }
 0x8d6   : > { %7517 = vmatpush3.msk.msra.mxu0 %vm10328_vm12, %v10327_v61  ;;  %7518 = vmatprep.mubr.msk.f32.mxu0 %vm10266_vm7, %v10264_v22 }
 0x8d7   : > { %7262 = vmatprep.subr.msk.mxu0 %vm10330_vm6, %v10329_v3 }
 0x991   : > { %v6479_v24 = vpop.f32.mrf.mxu0  ;;  %v6550_v17 = vpop.f32.mrf.mxu1 }
 0x992   : > { %v6554_v11 = vadd.f32 %v6479_v24, %v6316_v15  ;;  %v6556_v26 = vadd.f32 %v6550_v17, %v6318_v56 }
 0x993   : > { %v6481_v9 = vpop.f32.mrf.mxu0  ;;  %v7510_v40 = vpop.f32.mrf.mxu1 }
 0x994   : > { %v6555_v50 = vadd.f32 %v6481_v9, %v6317_v59 }
 0x995   : > { %v6626_v39 = vpop.f32.mrf.mxu0 }
 0x996   : > { %7257 = vmatmul.mubr.msk.f32.vlgmr.msra.gmra.mxu1 %vm10331_vm2, %v6626_v39  ;;  %7519 = vmatmul.mubr.msk.f32.vlgmr.msra.gmra.mxu0 %vm10332_vm8, %v6626_v39 }
 0x997   : > { %7263 = vmatpush1.msk.msra.mxu0 %vm10334_vm1, %v10333_v43  ;;  %v7515_v42 = vpop.f32.mrf.mxu0  ;;  %7522 = vmatpush3.msk.msra.mxu1 %vm10335_vm13, %v369_v27 }
 0x998   : > { %7523 = vmatprep.mubr.msk.f32.mxu1 %vm10266_vm7, %v10264_v22  ;;  %7526 = vmatprep.subr.mxu1 %v10264_v22 }
 0x999   : > { %6917 = vmatprep.mubr.f32.mxu0 %v10264_v22 }
 0x99a   : > { %7524 = vmatmul.mubr.msk.f32.vlgmr.msra.gmra.mxu1 %vm10336_vm11, %v9748_v5 }
 0x99b   : > { %7527 = vmatpush3.msk.msra.mxu1 %vm10338_vm10, %v10337_v29  ;;  %7528 = vmatprep.mubr.msk.f32.mxu1 %vm10266_vm7, %v10264_v22 }
 0xa56   : > { %v6699_v25 = vpop.f32.mrf.mxu1  ;;  %v6770_v7 = vpop.f32.mrf.mxu0 }
 0xa57   : > { %v6774_v62 = vadd.f32 %v6699_v25, %v6554_v11  ;;  %v6776_v30 = vadd.f32 %v6770_v7, %v6556_v26 }
 0xa58   : > { %v6701_v0 = vpop.f32.mrf.mxu1  ;;  %v7520_v41 = vpop.f32.mrf.mxu0 }
 0xa59   : > { %v6775_v6 = vadd.f32 %v6701_v0, %v6555_v50 }
 0xa5a   : > { %v6846_v46 = vpop.f32.mrf.mxu1 }
 0xa5b   : > { %7264 = vmatmul.mubr.msk.f32.vlgmr.msra.gmra.mxu0 %vm10339_vm3, %v6846_v46  ;;  %7529 = vmatmul.mubr.msk.f32.vlgmr.msra.gmra.mxu1 %vm10340_vm4, %v6846_v46 }
 0xa5c   : > { %v7525_v5 = vpop.f32.mrf.mxu1 }
 0xb1b   : > { %v6919_v55 = vpop.f32.mrf.mxu0  ;;  %v6990_v58 = vpop.f32.mrf.mxu1 }
 0xb1c   : > { %v6996_v1 = vadd.f32 %v6990_v58, %v6776_v30  ;;  %v6994_v37 = vadd.f32 %v6919_v55, %v6774_v62 }
 0xb1d   : > { %v6921_v22 = vpop.f32.mrf.mxu0  ;;  %v7530_v63 = vpop.f32.mrf.mxu1 }
 0xb1e   : > { %7002 = vst [vmem:[%s328_s20 + $0x8] sm:$0xf] %v6996_v1  ;;  %v6995_v16 = vadd.f32 %v6921_v22, %v6775_v6 }
 0xb20   : > { %v6999_v33 = vcombine.low %v6994_v37, %v6995_v16 }
 0xb22   : > { %7001 = vst [vmem:[%s328_s20] sm:$0xff] %v6999_v33 }
 0xb23   : > { %7653 = shalt.err (!%p7650_p0)
}
 0xb24   : > { %s7654_s17 = scalar_lea.hbm %s7016_s24, 192  ;;  %s7658_s19 = scalar_lea.hbm %s9968_s8, 384 }
 0xb25   : > { %p7655_p1 = scmp.ne.s32.totalorder %s7016_s24, %s7654_s17  ;;  %p7659_p4 = scmp.lt.s32.totalorder %s7016_s24, %s9968_s8 }
 0xb26   : > { %p7660_p7 = scmp.lt.s32.totalorder %s7658_s19, %s7654_s17 }
 0xb27   : > { %p7656_p2 = pnand %p7655_p1, %p7810_p5 }
 0xb28   : > { %p7661_p8 = por %p7660_p7, %p7659_p4 }
 0xb29   : > { %p7657_p3 = pneg %p7656_p2 }
 0xb2b   : > { %p7662_p6 = pnand %p7661_p8, %p7657_p3 }
 0xb2d   : > { %7665 = shalt.err (!%p7662_p6)
}
 0xb2e   : > { %7537 = dma.vmem_to_hbm [thread:$0]  (%p7810_p5), %s7019_s21, 192, %s7016_s24, %s7004_s25  }
 0xb2f PF: > { %p7549_p9 = scmp.ge.s32.totalorder %s7704_s30, 2  ;;  %s7030_s23 = sand.u32 1, %s7692_s27  }
 0xb30   : > { %p10341_p10 = scmp.ne.s32.totalorder %s10038_s16, 0  ;;  %s7031_s13 = scalar_lea.sflag [#allocation4], %s7030_s23 }
 0xb32   : > { %p7544_p11 = pnand %p7549_p9, %p10341_p10 }
 0xb34   : > { %p7545_p12 = pneg %p7544_p11 }
 0xb36   : > { %7687 = dma.done.wait (%p7545_p12), %s7031_s13, 192  }
 0xb37   : > { %7689 = vsyncadd (%p7545_p12), %s7031_s13, 4294967104  ;;  %p19_p13 = scmp.ge.s32.totalorder %s7797_s11, 4   ;;  %s10342_s27 = smov %s7696_s28 }
 0xb38   : > { %s10343_s28 = smov %s7700_s29  ;;  %s10344_s29 = smov %s7808_s14 }
 0xb39   : > { %s10345_s30 = smov %s7797_s11  ;;  %21 = sbr.rel (!%p19_p13) target bundleno = 4 (0x4), region = 95 }
 0xb3e   :  { %7036 = vsyncpa [#allocation3], 1 }
 0xb3f   :  { %7038 = vsyncpa [#allocation3 + $0x1], 1 }
 0xb40   :  { %7039 = vsyncpa [#allocation4], 1 }
 0xb41   :  { %7041 = vsyncpa [#allocation4 + $0x1], 1 }

</bundles_post_ra>
